<compile_context>
chip_gen: v7x
topology: tpu7x:2x2x1
jax: 0.10.0
libtpu: 0.0.40
codegen_flags: <defaults>
</compile_context>

<pallas_src>
import jax
import jax.numpy as jnp
from jax.experimental import pallas as pl
from jax.experimental.pallas import tpu as pltpu


# ---------------------------------------------------------------------------
# Single fused kernel: doc_embs -> final word_dists
# Grid: (DEC_HIDDEN // TK,)  -- reduction axis of the transform / word_embedding pair.
# ---------------------------------------------------------------------------
def make_fused_kernel(num_hidden, ncomp):
    def kernel(de_ref, wa_ref, ba_ref, *rest):
        hidden_refs = rest[: 2 * num_hidden]
        (wms_ref, ssms_ref, eps_ref, beta_ref, ssb_ref,
         w1_ref, ss1_ref, wet_ref, web_ref, sswe_ref,
         o_ref, wd_ref, acc_ref) = rest[2 * num_hidden:]

        k = pl.program_id(0)

        # ---- step 0: inference-net head + accumulator init -------------------
        @pl.when(k == 0)
        def _head_and_init():
            de = de_ref[...]                                       # (B, CTX) f32
            # adapt_bert + softplus
            h = jax.nn.softplus(
                jnp.dot(de, wa_ref[...].astype(jnp.float32),
                        preferred_element_type=jnp.float32) + ba_ref[...])
            # hidden stack (Linear + softplus)
            for li in range(num_hidden):
                w = hidden_refs[2 * li][...].astype(jnp.float32)
                b = hidden_refs[2 * li + 1][...]
                h = jax.nn.softplus(
                    jnp.dot(h, w, preferred_element_type=jnp.float32) + b)

            # fused [f_mu | f_sigma] matmul + folded BatchNorm (affine=False)
            ms = jnp.dot(h, wms_ref[...].astype(jnp.float32),
                         preferred_element_type=jnp.float32)
            ms = ms * ssms_ref[0:1, :] + ssms_ref[1:2, :]
            mu = ms[:, :ncomp]
            log_sigma = ms[:, ncomp:]

            # reparameterize + softmax -> theta (stays in registers)
            theta = jax.nn.softmax(mu + eps_ref[...] * jnp.exp(0.5 * log_sigma),
                                   axis=-1)

            # prodLDA decoder: softmax(BN(theta @ beta)) -> word_dists (resident)
            logits = jnp.dot(theta, beta_ref[...].astype(jnp.float32),
                             preferred_element_type=jnp.float32)
            logits = logits * ssb_ref[0:1, :] + ssb_ref[1:2, :]
            wd_ref[...] = jax.nn.softmax(logits, axis=-1)

            # concat(docvec, doc_embs) @ We  ==  docvec @ We_top + doc_embs @ We_bot
            # -> init accumulator with the doc_embs part.
            acc_ref[...] = jnp.dot(de, web_ref[...].astype(jnp.float32),
                                   preferred_element_type=jnp.float32)

        # ---- every step: transform chunk + word_embedding accumulate ---------
        # docvec chunk = sigmoid(BN(word_dists @ W1[:, tile]))   (f32 activations)
        dv = jax.nn.sigmoid(
            jnp.dot(wd_ref[...], w1_ref[...].astype(jnp.float32),
                    preferred_element_type=jnp.float32)
            * ss1_ref[0:1, :] + ss1_ref[1:2, :])
        acc_ref[...] += jnp.dot(dv, wet_ref[...].astype(jnp.float32),
                                preferred_element_type=jnp.float32)

        # ---- last step: folded BatchNorm + sigmoid, write output -------------
        @pl.when(k == pl.num_programs(0) - 1)
        def _finalize():
            o_ref[...] = jax.nn.sigmoid(
                acc_ref[...] * sswe_ref[0:1, :] + sswe_ref[1:2, :])

    return kernel


def ztm_word_embed_forward(params, target, doc_embs, eps, *, tk=2048):
    """Fused forward pass. `target` only feeds the is_train=True loss path."""
    del target
    B, _ = doc_embs.shape
    bow = params["beta"].shape[1]
    ncomp = eps.shape[1]
    dec_hidden = params["W1"].shape[1]
    num_hidden = len(params["hiddens"])
    assert dec_hidden % tk == 0

    # VMEM-resident (tiny) inputs: same block every grid step.
    resident = [doc_embs, params["Wa"], params["ba"]]
    for (w, b) in params["hiddens"]:
        resident += [w, b]
    resident += [params["Wms"], params["ss_ms"], eps, params["beta"], params["ss_beta"]]
    resident_specs = [pl.BlockSpec(x.shape, lambda k: (0, 0)) for x in resident]

    # Streamed weight tiles over the 4096 reduction axis.
    streamed = [params["W1"], params["ss1"], params["We_top"],
                params["We_bot"], params["ss_we"]]
    streamed_specs = [
        pl.BlockSpec((bow, tk), lambda k: (0, k)),          # W1 column tile  (bf16)
        pl.BlockSpec((2, tk), lambda k: (0, k)),            # packed scale/shift for W1+BN
        pl.BlockSpec((tk, bow), lambda k: (k, 0)),          # We_top row tile (bf16)
        pl.BlockSpec(params["We_bot"].shape, lambda k: (0, 0)),   # We_bot (resident)
        pl.BlockSpec(params["ss_we"].shape, lambda k: (0, 0)),    # final BN scale/shift
    ]

    return pl.pallas_call(
        make_fused_kernel(num_hidden, ncomp),
        out_shape=jax.ShapeDtypeStruct((B, bow), jnp.float32),
        grid=(dec_hidden // tk,),
        in_specs=resident_specs + streamed_specs,
        out_specs=pl.BlockSpec((B, bow), lambda k: (0, 0)),
        scratch_shapes=[
            pltpu.VMEM((B, bow), jnp.float32),   # word_dists (resident across steps)
            pltpu.VMEM((B, bow), jnp.float32),   # f32 accumulator
        ],
        compiler_params=pltpu.CompilerParams(
            dimension_semantics=("arbitrary",)),  # reduction axis
    )(*(resident + streamed))


# ---------------------------------------------------------------------------
# Parameter construction (deterministic, synthetic) + eval-BN folding
# ---------------------------------------------------------------------------
def _fold_bn(bias, running_mean, running_var, gamma=None, beta=None, eps=1e-5):
    inv_std = 1.0 / jnp.sqrt(running_var + eps)
    scale = inv_std if gamma is None else gamma * inv_std
    shift = scale * (bias - running_mean)
    if beta is not None:
        shift = shift + beta
    return jnp.stack([scale, shift], axis=0).astype(jnp.float32)   # (2, N): [scale; shift]


def make_params(key, bow, ctx, ncomp, hidden_sizes, dec_hidden=4096):
    def nxt():
        nonlocal key
        key, sub = jax.random.split(key)
        return sub

    def lin(i, o, std=0.05):
        w = jax.random.normal(nxt(), (i, o), jnp.float32) * std
        b = jax.random.normal(nxt(), (o,), jnp.float32) * 0.01
        return w, b

    def bn_stats(n, affine):
        rm = jax.random.normal(nxt(), (n,), jnp.float32) * 0.01
        rv = jax.random.uniform(nxt(), (n,), jnp.float32, 0.5, 1.5)
        if affine:
            g = jax.random.uniform(nxt(), (n,), jnp.float32, 0.8, 1.2)
            bt = jax.random.normal(nxt(), (n,), jnp.float32) * 0.01
            return rm, rv, g, bt
        return rm, rv, None, None

    p = {}
    # inference network: adapt_bert + hidden stack (softplus, plain bias)
    wa, ba = lin(ctx, hidden_sizes[0])
    p["Wa"], p["ba"] = wa.astype(jnp.bfloat16), ba[None, :]
    p["hiddens"] = []
    for hi, ho in zip(hidden_sizes[:-1], hidden_sizes[1:]):
        w, b = lin(hi, ho)
        p["hiddens"].append((w.astype(jnp.bfloat16), b[None, :]))

    # f_mu / f_sigma (+ BatchNorm1d(affine=False)) concatenated along output dim
    w_mu, b_mu = lin(hidden_sizes[-1], ncomp)
    w_sig, b_sig = lin(hidden_sizes[-1], ncomp)
    rm_mu, rv_mu, _, _ = bn_stats(ncomp, False)
    rm_sg, rv_sg, _, _ = bn_stats(ncomp, False)
    p["Wms"] = jnp.concatenate([w_mu, w_sig], axis=1).astype(jnp.bfloat16)  # (H, 2*NC)
    p["ss_ms"] = jnp.concatenate([_fold_bn(b_mu, rm_mu, rv_mu),
                                  _fold_bn(b_sig, rm_sg, rv_sg)], axis=1)   # (2, 2*NC)

    # beta (n_components, bow) + beta_batchnorm (affine=False), no bias
    p["beta"] = (jax.random.normal(nxt(), (ncomp, bow), jnp.float32) * 0.05
                 ).astype(jnp.bfloat16)
    rm, rv, _, _ = bn_stats(bow, False)
    p["ss_beta"] = _fold_bn(jnp.zeros((bow,), jnp.float32), rm, rv)

    # transform: Linear(bow, 4096) + BatchNorm1d(4096) + Sigmoid  (bf16 weight, HBM-bound)
    w1, b1 = lin(bow, dec_hidden, std=0.02)
    rm, rv, g, bt = bn_stats(dec_hidden, True)
    p["W1"] = w1.astype(jnp.bfloat16)
    p["ss1"] = _fold_bn(b1, rm, rv, g, bt)

    # word_embedding: (dec_hidden + ctx, bow) parameter, no bias, + BatchNorm1d(bow)
    we = jax.random.normal(nxt(), (dec_hidden + ctx, bow), jnp.float32) * 0.02
    rm, rv, g, bt = bn_stats(bow, True)
    p["We_top"] = we[:dec_hidden].astype(jnp.bfloat16)   # multiplies docvec
    p["We_bot"] = we[dec_hidden:].astype(jnp.bfloat16)   # multiplies doc_embs
    p["ss_we"] = _fold_bn(jnp.zeros((bow,), jnp.float32), rm, rv, g, bt)
    return p


# ---------------------------------------------------------------------------
# Pure-JAX reference (same bf16-stored weights upcast to f32, f32 activations)
# ---------------------------------------------------------------------------
def ztm_word_embed_reference(params, target, doc_embs, eps):
    del target
    f32 = lambda a: a.astype(jnp.float32)
    h = jax.nn.softplus(doc_embs @ f32(params["Wa"]) + params["ba"])
    for (w, b) in params["hiddens"]:
        h = jax.nn.softplus(h @ f32(w) + b)
    ms = (h @ f32(params["Wms"])) * params["ss_ms"][0:1] + params["ss_ms"][1:2]
    nc = eps.shape[1]
    mu, log_sigma = ms[:, :nc], ms[:, nc:]
    theta = jax.nn.softmax(mu + eps * jnp.exp(0.5 * log_sigma), axis=-1)
    word_dists = jax.nn.softmax((theta @ f32(params["beta"])) * params["ss_beta"][0:1]
                                + params["ss_beta"][1:2], axis=-1)
    docvec = jax.nn.sigmoid((word_dists @ f32(params["W1"]))
                            * params["ss1"][0:1] + params["ss1"][1:2])
    emb = jnp.concatenate([docvec, doc_embs], axis=1)
    we = jnp.concatenate([f32(params["We_top"]), f32(params["We_bot"])], axis=0)
    return jax.nn.sigmoid((emb @ we) * params["ss_we"][0:1] + params["ss_we"][1:2])


if __name__ == "__main__":
    BOW, CTX, NCOMP, B = 256, 128, 16, 8
    HIDDEN = (128, 128)
    DEC_HIDDEN = 4096

    key = jax.random.PRNGKey(0)
    kp, kt, kd, ke = jax.random.split(key, 4)

    params = make_params(kp, BOW, CTX, NCOMP, HIDDEN, DEC_HIDDEN)
    target = jax.random.uniform(kt, (B, BOW), jnp.float32)       # BoW counts (loss path only)
    doc_embs = jax.random.normal(kd, (B, CTX), jnp.float32)      # contextual embeddings
    eps = jax.random.normal(ke, (B, NCOMP), jnp.float32)         # reparameterization noise

    out = jax.block_until_ready(ztm_word_embed_forward(params, target, doc_embs, eps))
    ref = ztm_word_embed_reference(params, target, doc_embs, eps)

    assert out.shape == (B, BOW), out.shape
    assert bool(jnp.all(jnp.isfinite(out)))
    max_err = float(jnp.max(jnp.abs(out - ref)))
    assert bool(jnp.allclose(out, ref, atol=2e-2, rtol=2e-2)), max_err

    print("KERNEL_OK")
</pallas_src>

<mosaic_0001>
module attributes {stable_mosaic.version = 11 : i64} {
  func.func @kernel(%arg0: i32, %arg1: memref<8x128xf32, #tpu.memory_space<vmem>>, %arg2: memref<128x128xbf16, #tpu.memory_space<vmem>>, %arg3: memref<1x128xf32, #tpu.memory_space<vmem>>, %arg4: memref<128x128xbf16, #tpu.memory_space<vmem>>, %arg5: memref<1x128xf32, #tpu.memory_space<vmem>>, %arg6: memref<128x32xbf16, #tpu.memory_space<vmem>>, %arg7: memref<2x32xf32, #tpu.memory_space<vmem>>, %arg8: memref<8x16xf32, #tpu.memory_space<vmem>>, %arg9: memref<16x256xbf16, #tpu.memory_space<vmem>>, %arg10: memref<2x256xf32, #tpu.memory_space<vmem>>, %arg11: memref<256x2048xbf16, #tpu.memory_space<vmem>>, %arg12: memref<2x2048xf32, #tpu.memory_space<vmem>>, %arg13: memref<2048x256xbf16, #tpu.memory_space<vmem>>, %arg14: memref<128x256xbf16, #tpu.memory_space<vmem>>, %arg15: memref<2x256xf32, #tpu.memory_space<vmem>>, %arg16: memref<8x256xf32, #tpu.memory_space<vmem>>, %arg17: memref<8x256xf32, #tpu.memory_space<vmem>>, %arg18: memref<8x256xf32, #tpu.memory_space<vmem>>) attributes {dimension_semantics = [#tpu.dimension_semantics<arbitrary>], iteration_bounds = array<i64: 2>, scalar_prefetch = 0 : i64, scratch_operands = 2 : i64, tpu.core_type = #tpu.core_type<tc>, window_params = [{pipeline_mode = #tpu.pipeline_mode<synchronous>, transform_indices = @transform_0, window_bounds = array<i64: 8, 128>}, {pipeline_mode = #tpu.pipeline_mode<synchronous>, transform_indices = @transform_1, window_bounds = array<i64: 128, 128>}, {pipeline_mode = #tpu.pipeline_mode<synchronous>, transform_indices = @transform_2, window_bounds = array<i64: 1, 128>}, {pipeline_mode = #tpu.pipeline_mode<synchronous>, transform_indices = @transform_3, window_bounds = array<i64: 128, 128>}, {pipeline_mode = #tpu.pipeline_mode<synchronous>, transform_indices = @transform_4, window_bounds = array<i64: 1, 128>}, {pipeline_mode = #tpu.pipeline_mode<synchronous>, transform_indices = @transform_5, window_bounds = array<i64: 128, 32>}, {pipeline_mode = #tpu.pipeline_mode<synchronous>, transform_indices = @transform_6, window_bounds = array<i64: 2, 32>}, {pipeline_mode = #tpu.pipeline_mode<synchronous>, transform_indices = @transform_7, window_bounds = array<i64: 8, 16>}, {pipeline_mode = #tpu.pipeline_mode<synchronous>, transform_indices = @transform_8, window_bounds = array<i64: 16, 256>}, {pipeline_mode = #tpu.pipeline_mode<synchronous>, transform_indices = @transform_9, window_bounds = array<i64: 2, 256>}, {transform_indices = @transform_10, window_bounds = array<i64: 256, 2048>}, {transform_indices = @transform_11, window_bounds = array<i64: 2, 2048>}, {transform_indices = @transform_12, window_bounds = array<i64: 2048, 256>}, {pipeline_mode = #tpu.pipeline_mode<synchronous>, transform_indices = @transform_13, window_bounds = array<i64: 128, 256>}, {pipeline_mode = #tpu.pipeline_mode<synchronous>, transform_indices = @transform_14, window_bounds = array<i64: 2, 256>}, {pipeline_mode = #tpu.pipeline_mode<synchronous>, transform_indices = @transform_15, window_bounds = array<i64: 8, 256>}]} {
    %c0_i32 = arith.constant 0 : i32
    %0 = arith.cmpi eq, %arg0, %c0_i32 : i32
    %1 = arith.extui %0 : i1 to i32
    %c0_i32_0 = arith.constant 0 : i32
    %2 = arith.cmpi ne, %1, %c0_i32_0 : i32
    scf.if %2 {
      %c0_16 = arith.constant 0 : index
      %c0_17 = arith.constant 0 : index
      %27 = vector.load %arg1[%c0_16, %c0_17] : memref<8x128xf32, #tpu.memory_space<vmem>>, vector<8x128xf32>
      %c0_18 = arith.constant 0 : index
      %c0_19 = arith.constant 0 : index
      %28 = vector.load %arg2[%c0_18, %c0_19] : memref<128x128xbf16, #tpu.memory_space<vmem>>, vector<128x128xbf16>
      %29 = arith.extf %28 : vector<128x128xbf16> to vector<128x128xf32>
      %cst_20 = arith.constant dense<0.000000e+00> : vector<8x128xf32>
      %30 = tpu.matmul %27, %29, %cst_20 {dimension_numbers = #tpu.dot_dimension_numbers<[1], [0], [0], [1], [0, 0, 1, 1], [], []>} : vector<8x128xf32>, vector<128x128xf32>, vector<8x128xf32> -> vector<8x128xf32>
      %c0_21 = arith.constant 0 : index
      %c0_22 = arith.constant 0 : index
      %31 = vector.load %arg3[%c0_21, %c0_22] : memref<1x128xf32, #tpu.memory_space<vmem>>, vector<1x128xf32>
      %32 = vector.broadcast %31 : vector<1x128xf32> to vector<8x128xf32>
      %33 = arith.addf %30, %32 : vector<8x128xf32>
      %cst_23 = arith.constant 0.000000e+00 : f32
      %34 = vector.broadcast %cst_23 : f32 to vector<8x128xf32>
      %35 = arith.maximumf %33, %34 : vector<8x128xf32>
      %36 = vector.broadcast %cst_23 : f32 to vector<8x128xf32>
      %37 = arith.subf %33, %36 : vector<8x128xf32>
      %38 = arith.cmpf one, %37, %37 : vector<8x128xf32>
      %39 = vector.broadcast %cst_23 : f32 to vector<8x128xf32>
      %40 = arith.addf %33, %39 : vector<8x128xf32>
      %41 = math.absf %37 : vector<8x128xf32>
      %cst_24 = arith.constant 0.000000e+00 : f32
      %42 = vector.broadcast %cst_24 : f32 to vector<8x128xf32>
      %43 = arith.subf %42, %41 : vector<8x128xf32>
      %44 = math.exp %43 : vector<8x128xf32>
      %45 = math.log1p %44 : vector<8x128xf32>
      %46 = arith.addf %35, %45 : vector<8x128xf32>
      %47 = arith.select %38, %40, %46 : vector<8x128xi1>, vector<8x128xf32>
      %c0_25 = arith.constant 0 : index
      %c0_26 = arith.constant 0 : index
      %48 = vector.load %arg4[%c0_25, %c0_26] : memref<128x128xbf16, #tpu.memory_space<vmem>>, vector<128x128xbf16>
      %49 = arith.extf %48 : vector<128x128xbf16> to vector<128x128xf32>
      %c0_27 = arith.constant 0 : index
      %c0_28 = arith.constant 0 : index
      %50 = vector.load %arg5[%c0_27, %c0_28] : memref<1x128xf32, #tpu.memory_space<vmem>>, vector<1x128xf32>
      %cst_29 = arith.constant dense<0.000000e+00> : vector<8x128xf32>
      %51 = tpu.matmul %47, %49, %cst_29 {dimension_numbers = #tpu.dot_dimension_numbers<[1], [0], [0], [1], [0, 0, 1, 1], [], []>} : vector<8x128xf32>, vector<128x128xf32>, vector<8x128xf32> -> vector<8x128xf32>
      %52 = vector.broadcast %50 : vector<1x128xf32> to vector<8x128xf32>
      %53 = arith.addf %51, %52 : vector<8x128xf32>
      %cst_30 = arith.constant 0.000000e+00 : f32
      %54 = vector.broadcast %cst_30 : f32 to vector<8x128xf32>
      %55 = arith.maximumf %53, %54 : vector<8x128xf32>
      %56 = vector.broadcast %cst_30 : f32 to vector<8x128xf32>
      %57 = arith.subf %53, %56 : vector<8x128xf32>
      %58 = arith.cmpf one, %57, %57 : vector<8x128xf32>
      %59 = vector.broadcast %cst_30 : f32 to vector<8x128xf32>
      %60 = arith.addf %53, %59 : vector<8x128xf32>
      %61 = math.absf %57 : vector<8x128xf32>
      %cst_31 = arith.constant 0.000000e+00 : f32
      %62 = vector.broadcast %cst_31 : f32 to vector<8x128xf32>
      %63 = arith.subf %62, %61 : vector<8x128xf32>
      %64 = math.exp %63 : vector<8x128xf32>
      %65 = math.log1p %64 : vector<8x128xf32>
      %66 = arith.addf %55, %65 : vector<8x128xf32>
      %67 = arith.select %58, %60, %66 : vector<8x128xi1>, vector<8x128xf32>
      %c0_32 = arith.constant 0 : index
      %c0_33 = arith.constant 0 : index
      %68 = vector.load %arg6[%c0_32, %c0_33] : memref<128x32xbf16, #tpu.memory_space<vmem>>, vector<128x32xbf16>
      %69 = arith.extf %68 : vector<128x32xbf16> to vector<128x32xf32>
      %cst_34 = arith.constant dense<0.000000e+00> : vector<8x32xf32>
      %70 = tpu.matmul %67, %69, %cst_34 {dimension_numbers = #tpu.dot_dimension_numbers<[1], [0], [0], [1], [0, 0, 1, 1], [], []>} : vector<8x128xf32>, vector<128x32xf32>, vector<8x32xf32> -> vector<8x32xf32>
      %c0_35 = arith.constant 0 : index
      %c0_36 = arith.constant 0 : index
      %71 = vector.load %arg7[%c0_35, %c0_36] : memref<2x32xf32, #tpu.memory_space<vmem>>, vector<1x32xf32>
      %72 = vector.broadcast %71 : vector<1x32xf32> to vector<8x32xf32>
      %73 = arith.mulf %70, %72 : vector<8x32xf32>
      %c1_37 = arith.constant 1 : index
      %c0_38 = arith.constant 0 : index
      %74 = vector.load %arg7[%c1_37, %c0_38] : memref<2x32xf32, #tpu.memory_space<vmem>>, vector<1x32xf32>
      %75 = vector.broadcast %74 : vector<1x32xf32> to vector<8x32xf32>
      %76 = arith.addf %73, %75 : vector<8x32xf32>
      %77 = vector.extract_strided_slice %76 {offsets = [0, 0], sizes = [8, 16], strides = [1, 1]} : vector<8x32xf32> to vector<8x16xf32>
      %78 = vector.extract_strided_slice %76 {offsets = [0, 16], sizes = [8, 16], strides = [1, 1]} : vector<8x32xf32> to vector<8x16xf32>
      %c0_39 = arith.constant 0 : index
      %c0_40 = arith.constant 0 : index
      %79 = vector.load %arg8[%c0_39, %c0_40] : memref<8x16xf32, #tpu.memory_space<vmem>>, vector<8x16xf32>
      %cst_41 = arith.constant 5.000000e-01 : f32
      %80 = vector.broadcast %cst_41 : f32 to vector<8x16xf32>
      %81 = arith.mulf %80, %78 : vector<8x16xf32>
      %82 = math.exp %81 : vector<8x16xf32>
      %83 = arith.mulf %79, %82 : vector<8x16xf32>
      %84 = arith.addf %77, %83 : vector<8x16xf32>
      %cst_42 = arith.constant dense<0xFF800000> : vector<8xf32>
      %85 = vector.multi_reduction <maximumf>, %84, %cst_42 [1] : vector<8x16xf32> to vector<8xf32>
      %cst_43 = arith.constant 0xFF800000 : f32
      %86 = vector.broadcast %cst_43 : f32 to vector<8xf32>
      %87 = arith.maximumf %86, %85 : vector<8xf32>
      %88 = vector.shape_cast %87 : vector<8xf32> to vector<8x1xf32>
      %89 = vector.broadcast %88 : vector<8x1xf32> to vector<8x16xf32>
      %90 = arith.subf %84, %89 : vector<8x16xf32>
      %91 = math.exp %90 : vector<8x16xf32>
      %cst_44 = arith.constant dense<0.000000e+00> : vector<8xf32>
      %92 = vector.multi_reduction <add>, %91, %cst_44 [1] : vector<8x16xf32> to vector<8xf32>
      %93 = vector.shape_cast %92 : vector<8xf32> to vector<8x1xf32>
      %94 = vector.broadcast %93 : vector<8x1xf32> to vector<8x16xf32>
      %95 = arith.divf %91, %94 : vector<8x16xf32>
      %c0_45 = arith.constant 0 : index
      %c0_46 = arith.constant 0 : index
      %96 = vector.load %arg9[%c0_45, %c0_46] : memref<16x256xbf16, #tpu.memory_space<vmem>>, vector<16x256xbf16>
      %97 = arith.extf %96 : vector<16x256xbf16> to vector<16x256xf32>
      %cst_47 = arith.constant dense<0.000000e+00> : vector<8x256xf32>
      %98 = tpu.matmul %95, %97, %cst_47 {dimension_numbers = #tpu.dot_dimension_numbers<[1], [0], [0], [1], [0, 0, 1, 1], [], []>} : vector<8x16xf32>, vector<16x256xf32>, vector<8x256xf32> -> vector<8x256xf32>
      %c0_48 = arith.constant 0 : index
      %c0_49 = arith.constant 0 : index
      %99 = vector.load %arg10[%c0_48, %c0_49] : memref<2x256xf32, #tpu.memory_space<vmem>>, vector<1x256xf32>
      %100 = vector.broadcast %99 : vector<1x256xf32> to vector<8x256xf32>
      %101 = arith.mulf %98, %100 : vector<8x256xf32>
      %c1_50 = arith.constant 1 : index
      %c0_51 = arith.constant 0 : index
      %102 = vector.load %arg10[%c1_50, %c0_51] : memref<2x256xf32, #tpu.memory_space<vmem>>, vector<1x256xf32>
      %103 = vector.broadcast %102 : vector<1x256xf32> to vector<8x256xf32>
      %104 = arith.addf %101, %103 : vector<8x256xf32>
      %cst_52 = arith.constant dense<0xFF800000> : vector<8xf32>
      %105 = vector.multi_reduction <maximumf>, %104, %cst_52 [1] : vector<8x256xf32> to vector<8xf32>
      %cst_53 = arith.constant 0xFF800000 : f32
      %106 = vector.broadcast %cst_53 : f32 to vector<8xf32>
      %107 = arith.maximumf %106, %105 : vector<8xf32>
      %108 = vector.shape_cast %107 : vector<8xf32> to vector<8x1xf32>
      %109 = vector.broadcast %108 : vector<8x1xf32> to vector<8x256xf32>
      %110 = arith.subf %104, %109 : vector<8x256xf32>
      %111 = math.exp %110 : vector<8x256xf32>
      %cst_54 = arith.constant dense<0.000000e+00> : vector<8xf32>
      %112 = vector.multi_reduction <add>, %111, %cst_54 [1] : vector<8x256xf32> to vector<8xf32>
      %113 = vector.shape_cast %112 : vector<8xf32> to vector<8x1xf32>
      %114 = vector.broadcast %113 : vector<8x1xf32> to vector<8x256xf32>
      %115 = arith.divf %111, %114 : vector<8x256xf32>
      %c0_55 = arith.constant 0 : index
      %c0_56 = arith.constant 0 : index
      %116 = vector.load %arg17[%c0_55, %c0_56] : memref<8x256xf32, #tpu.memory_space<vmem>>, vector<8x256xf32>
      tpu.vector_store %arg17[%c0_55, %c0_56], %115 {strides = array<i32>} : memref<8x256xf32, #tpu.memory_space<vmem>>, vector<8x256xf32>,
      %c0_57 = arith.constant 0 : index
      %c0_58 = arith.constant 0 : index
      %117 = vector.load %arg14[%c0_57, %c0_58] : memref<128x256xbf16, #tpu.memory_space<vmem>>, vector<128x256xbf16>
      %118 = arith.extf %117 : vector<128x256xbf16> to vector<128x256xf32>
      %cst_59 = arith.constant dense<0.000000e+00> : vector<8x256xf32>
      %119 = tpu.matmul %27, %118, %cst_59 {dimension_numbers = #tpu.dot_dimension_numbers<[1], [0], [0], [1], [0, 0, 1, 1], [], []>} : vector<8x128xf32>, vector<128x256xf32>, vector<8x256xf32> -> vector<8x256xf32>
      %c0_60 = arith.constant 0 : index
      %c0_61 = arith.constant 0 : index
      %120 = vector.load %arg18[%c0_60, %c0_61] : memref<8x256xf32, #tpu.memory_space<vmem>>, vector<8x256xf32>
      tpu.vector_store %arg18[%c0_60, %c0_61], %119 {strides = array<i32>} : memref<8x256xf32, #tpu.memory_space<vmem>>, vector<8x256xf32>,
    } else {
    }
    %c0 = arith.constant 0 : index
    %c0_1 = arith.constant 0 : index
    %3 = vector.load %arg17[%c0, %c0_1] : memref<8x256xf32, #tpu.memory_space<vmem>>, vector<8x256xf32>
    %c0_2 = arith.constant 0 : index
    %c0_3 = arith.constant 0 : index
    %4 = vector.load %arg11[%c0_2, %c0_3] : memref<256x2048xbf16, #tpu.memory_space<vmem>>, vector<256x2048xbf16>
    %5 = arith.extf %4 : vector<256x2048xbf16> to vector<256x2048xf32>
    %cst = arith.constant dense<0.000000e+00> : vector<8x2048xf32>
    %6 = tpu.matmul %3, %5, %cst {dimension_numbers = #tpu.dot_dimension_numbers<[1], [0], [0], [1], [0, 0, 1, 1], [], []>} : vector<8x256xf32>, vector<256x2048xf32>, vector<8x2048xf32> -> vector<8x2048xf32>
    %c0_4 = arith.constant 0 : index
    %c0_5 = arith.constant 0 : index
    %7 = vector.load %arg12[%c0_4, %c0_5] : memref<2x2048xf32, #tpu.memory_space<vmem>>, vector<1x2048xf32>
    %8 = vector.broadcast %7 : vector<1x2048xf32> to vector<8x2048xf32>
    %9 = arith.mulf %6, %8 : vector<8x2048xf32>
    %c1 = arith.constant 1 : index
    %c0_6 = arith.constant 0 : index
    %10 = vector.load %arg12[%c1, %c0_6] : memref<2x2048xf32, #tpu.memory_space<vmem>>, vector<1x2048xf32>
    %11 = vector.broadcast %10 : vector<1x2048xf32> to vector<8x2048xf32>
    %12 = arith.addf %9, %11 : vector<8x2048xf32>
    %13 = arith.negf %12 : vector<8x2048xf32>
    %14 = math.exp %13 : vector<8x2048xf32>
    %cst_7 = arith.constant 1.000000e+00 : f32
    %15 = vector.broadcast %cst_7 : f32 to vector<8x2048xf32>
    %16 = arith.addf %15, %14 : vector<8x2048xf32>
    %17 = arith.divf %15, %16 : vector<8x2048xf32>
    %c0_8 = arith.constant 0 : index
    %c0_9 = arith.constant 0 : index
    %18 = vector.load %arg18[%c0_8, %c0_9] : memref<8x256xf32, #tpu.memory_space<vmem>>, vector<8x256xf32>
    %c0_10 = arith.constant 0 : index
    %c0_11 = arith.constant 0 : index
    %19 = vector.load %arg13[%c0_10, %c0_11] : memref<2048x256xbf16, #tpu.memory_space<vmem>>, vector<2048x256xbf16>
    %20 = arith.extf %19 : vector<2048x256xbf16> to vector<2048x256xf32>
    %cst_12 = arith.constant dense<0.000000e+00> : vector<8x256xf32>
    %21 = tpu.matmul %17, %20, %cst_12 {dimension_numbers = #tpu.dot_dimension_numbers<[1], [0], [0], [1], [0, 0, 1, 1], [], []>} : vector<8x2048xf32>, vector<2048x256xf32>, vector<8x256xf32> -> vector<8x256xf32>
    %22 = arith.addf %18, %21 : vector<8x256xf32>
    %c0_13 = arith.constant 0 : index
    %c0_14 = arith.constant 0 : index
    %23 = vector.load %arg18[%c0_13, %c0_14] : memref<8x256xf32, #tpu.memory_space<vmem>>, vector<8x256xf32>
    tpu.vector_store %arg18[%c0_13, %c0_14], %22 {strides = array<i32>} : memref<8x256xf32, #tpu.memory_space<vmem>>, vector<8x256xf32>,
    %c1_i32 = arith.constant 1 : i32
    %24 = arith.cmpi eq, %arg0, %c1_i32 : i32
    %25 = arith.extui %24 : i1 to i32
    %c0_i32_15 = arith.constant 0 : i32
    %26 = arith.cmpi ne, %25, %c0_i32_15 : i32
    scf.if %26 {
      %c0_16 = arith.constant 0 : index
      %c0_17 = arith.constant 0 : index
      %27 = vector.load %arg18[%c0_16, %c0_17] : memref<8x256xf32, #tpu.memory_space<vmem>>, vector<8x256xf32>
      %c0_18 = arith.constant 0 : index
      %c0_19 = arith.constant 0 : index
      %28 = vector.load %arg15[%c0_18, %c0_19] : memref<2x256xf32, #tpu.memory_space<vmem>>, vector<1x256xf32>
      %29 = vector.broadcast %28 : vector<1x256xf32> to vector<8x256xf32>
      %30 = arith.mulf %27, %29 : vector<8x256xf32>
      %c1_20 = arith.constant 1 : index
      %c0_21 = arith.constant 0 : index
      %31 = vector.load %arg15[%c1_20, %c0_21] : memref<2x256xf32, #tpu.memory_space<vmem>>, vector<1x256xf32>
      %32 = vector.broadcast %31 : vector<1x256xf32> to vector<8x256xf32>
      %33 = arith.addf %30, %32 : vector<8x256xf32>
      %34 = arith.negf %33 : vector<8x256xf32>
      %35 = math.exp %34 : vector<8x256xf32>
      %cst_22 = arith.constant 1.000000e+00 : f32
      %36 = vector.broadcast %cst_22 : f32 to vector<8x256xf32>
      %37 = arith.addf %36, %35 : vector<8x256xf32>
      %38 = arith.divf %36, %37 : vector<8x256xf32>
      %c0_23 = arith.constant 0 : index
      %c0_24 = arith.constant 0 : index
      %39 = vector.load %arg16[%c0_23, %c0_24] : memref<8x256xf32, #tpu.memory_space<vmem>>, vector<8x256xf32>
      tpu.vector_store %arg16[%c0_23, %c0_24], %38 {strides = array<i32>} : memref<8x256xf32, #tpu.memory_space<vmem>>, vector<8x256xf32>,
    } else {
    }
    return
  }
  func.func @transform_0(%arg0: i32) -> (i32, i32) {
    %c0_i32 = arith.constant 0 : i32
    %c0_i32_0 = arith.constant 0 : i32
    %c0_i32_1 = arith.constant 0 : i32
    return %c0_i32, %c0_i32_0 : i32, i32
  }
  func.func @transform_1(%arg0: i32) -> (i32, i32) {
    %c0_i32 = arith.constant 0 : i32
    %c0_i32_0 = arith.constant 0 : i32
    %c0_i32_1 = arith.constant 0 : i32
    return %c0_i32, %c0_i32_0 : i32, i32
  }
  func.func @transform_2(%arg0: i32) -> (i32, i32) {
    %c0_i32 = arith.constant 0 : i32
    %c0_i32_0 = arith.constant 0 : i32
    %c0_i32_1 = arith.constant 0 : i32
    return %c0_i32, %c0_i32_0 : i32, i32
  }
  func.func @transform_3(%arg0: i32) -> (i32, i32) {
    %c0_i32 = arith.constant 0 : i32
    %c0_i32_0 = arith.constant 0 : i32
    %c0_i32_1 = arith.constant 0 : i32
    return %c0_i32, %c0_i32_0 : i32, i32
  }
  func.func @transform_4(%arg0: i32) -> (i32, i32) {
    %c0_i32 = arith.constant 0 : i32
    %c0_i32_0 = arith.constant 0 : i32
    %c0_i32_1 = arith.constant 0 : i32
    return %c0_i32, %c0_i32_0 : i32, i32
  }
  func.func @transform_5(%arg0: i32) -> (i32, i32) {
    %c0_i32 = arith.constant 0 : i32
    %c0_i32_0 = arith.constant 0 : i32
    %c0_i32_1 = arith.constant 0 : i32
    return %c0_i32, %c0_i32_0 : i32, i32
  }
  func.func @transform_6(%arg0: i32) -> (i32, i32) {
    %c0_i32 = arith.constant 0 : i32
    %c0_i32_0 = arith.constant 0 : i32
    %c0_i32_1 = arith.constant 0 : i32
    return %c0_i32, %c0_i32_0 : i32, i32
  }
  func.func @transform_7(%arg0: i32) -> (i32, i32) {
    %c0_i32 = arith.constant 0 : i32
    %c0_i32_0 = arith.constant 0 : i32
    %c0_i32_1 = arith.constant 0 : i32
    return %c0_i32, %c0_i32_0 : i32, i32
  }
  func.func @transform_8(%arg0: i32) -> (i32, i32) {
    %c0_i32 = arith.constant 0 : i32
    %c0_i32_0 = arith.constant 0 : i32
    %c0_i32_1 = arith.constant 0 : i32
    return %c0_i32, %c0_i32_0 : i32, i32
  }
  func.func @transform_9(%arg0: i32) -> (i32, i32) {
    %c0_i32 = arith.constant 0 : i32
    %c0_i32_0 = arith.constant 0 : i32
    %c0_i32_1 = arith.constant 0 : i32
    return %c0_i32, %c0_i32_0 : i32, i32
  }
  func.func @transform_10(%arg0: i32) -> (i32, i32) {
    %c0_i32 = arith.constant 0 : i32
    %c0_i32_0 = arith.constant 0 : i32
    return %c0_i32, %arg0 : i32, i32
  }
  func.func @transform_11(%arg0: i32) -> (i32, i32) {
    %c0_i32 = arith.constant 0 : i32
    %c0_i32_0 = arith.constant 0 : i32
    return %c0_i32, %arg0 : i32, i32
  }
  func.func @transform_12(%arg0: i32) -> (i32, i32) {
    %c0_i32 = arith.constant 0 : i32
    %c0_i32_0 = arith.constant 0 : i32
    return %arg0, %c0_i32 : i32, i32
  }
  func.func @transform_13(%arg0: i32) -> (i32, i32) {
    %c0_i32 = arith.constant 0 : i32
    %c0_i32_0 = arith.constant 0 : i32
    %c0_i32_1 = arith.constant 0 : i32
    return %c0_i32, %c0_i32_0 : i32, i32
  }
  func.func @transform_14(%arg0: i32) -> (i32, i32) {
    %c0_i32 = arith.constant 0 : i32
    %c0_i32_0 = arith.constant 0 : i32
    %c0_i32_1 = arith.constant 0 : i32
    return %c0_i32, %c0_i32_0 : i32, i32
  }
  func.func @transform_15(%arg0: i32) -> (i32, i32) {
    %c0_i32 = arith.constant 0 : i32
    %c0_i32_0 = arith.constant 0 : i32
    %c0_i32_1 = arith.constant 0 : i32
    return %c0_i32, %c0_i32_0 : i32, i32
  }
}

</mosaic_0001>

<bundles_post_ra>
// kernel: tpu_custom_call.1
= control target key start
LH: loop header
LB: loop body
LE: loop exit
PB: predicated region body
PF: predicated region fallthrough
CT: control target
= control target key end

     0   :  { %s9136_s0 = inlined_call_operand.hbm [shape: f32[8,128], index: 0, kind: input, shape index: {}]   ;;  %s9137_s1 = inlined_call_operand.hbm [shape: bf16[128,128], index: 1, kind: input, shape index: {}]   ;;  %s9138_s2 = inlined_call_operand.hbm [shape: f32[1,128], index: 2, kind: input, shape index: {}]   ;;  %s9139_s3 = inlined_call_operand.hbm [shape: bf16[128,128], index: 3, kind: input, shape index: {}]   ;;  %s9140_s4 = inlined_call_operand.hbm [shape: f32[1,128], index: 4, kind: input, shape index: {}]   ;;  %s9141_s5 = inlined_call_operand.vmem [shape: bf16[128,32], index: 5, kind: input, shape index: {}]   ;;  %s9142_s6 = inlined_call_operand.hbm [shape: f32[2,32], index: 6, kind: input, shape index: {}]   ;;  %s9143_s7 = inlined_call_operand.hbm [shape: f32[8,16], index: 7, kind: input, shape index: {}]   ;;  %s9144_s8 = inlined_call_operand.hbm [shape: bf16[16,256], index: 8, kind: input, shape index: {}]   ;;  %s9145_s9 = inlined_call_operand.hbm [shape: f32[2,256], index: 9, kind: input, shape index: {}]   ;;  %s9146_s10 = inlined_call_operand.hbm [shape: bf16[256,4096], index: 10, kind: input, shape index: {}]   ;;  %s9147_s11 = inlined_call_operand.hbm [shape: f32[2,4096], index: 11, kind: input, shape index: {}]   ;;  %s9148_s12 = inlined_call_operand.hbm [shape: bf16[4096,256], index: 12, kind: input, shape index: {}]   ;;  %s9149_s13 = inlined_call_operand.hbm [shape: bf16[128,256], index: 13, kind: input, shape index: {}]   ;;  %s9150_s14 = inlined_call_operand.hbm [shape: f32[2,256], index: 14, kind: input, shape index: {}]   ;;  %s9151_s15 = inlined_call_operand.hbm [shape: f32[8,256], index: 15, kind: output, shape index: {}]  }
   0x1   :  { %9175 = sst [smem:[#allocation40_spill]] %s9137_s1 }
   0x2   :  { %9176 = sst [smem:[#allocation41_spill]] %s9139_s3 }
   0x3   :  { %9177 = sst [smem:[#allocation42_spill]] %s9141_s5 }
   0x4   :  { %9178 = sst [smem:[#allocation43_spill]] %s9142_s6 }
   0x5   :  { %9179 = sst [smem:[#allocation44_spill]] %s9144_s8 }
   0x6   :  { %9180 = sst [smem:[#allocation45_spill]] %s9145_s9 }
   0x7   :  { %9181 = sst [smem:[#allocation46_spill]] %s9146_s10 }
   0x8   :  { %9182 = sst [smem:[#allocation47_spill]] %s9147_s11 }
   0x9   :  { %9183 = sst [smem:[#allocation48_spill]] %s9148_s12 }
   0xa   :  { %9184 = sst [smem:[#allocation49_spill]] %s9149_s13 }
   0xb   :  { %9185 = sst [smem:[#allocation50_spill]] %s9150_s14 }
   0xc   :  { %9186 = sst [smem:[#allocation51_spill]] %s9151_s15 }
   0xd   :  { %20 = vsyncpa [#allocation5], 0 }
   0xe   :  { %21 = vsyncpa [#allocation8], 0 }
   0xf   :  { %22 = vsyncpa [#allocation11], 0 }
  0x10   :  { %23 = vsyncpa [#allocation14], 0 }
  0x11   :  { %24 = vsyncpa [#allocation17], 0 }
  0x12   :  { %25 = vsyncpa [#allocation20], 0 }
  0x13   :  { %27 = vsyncpa [#allocation20 + $0x1], 0 }
  0x14   :  { %28 = vsyncpa [#allocation23], 0 }
  0x15   :  { %30 = vsyncpa [#allocation23 + $0x1], 0 }
  0x16   :  { %31 = vsyncpa [#allocation26], 0 }
  0x17   :  { %32 = vsyncpa [#allocation6], 0  ;;  %s7914_s18 = smov 0   ;;  %s7916_s19 = smov 0  }
  0x18   :  { %s7918_s20 = smov 0   ;;  %s7920_s21 = smov 0  }
  0x19 LB: > { %s7809_s22 = smov [#allocation7]   ;;  %s7935_s24 = sadd.s32 4294967295, %s7807_s21   ;;  %s7807_s21 = sphi %s7920_s21, %s9239_s21   ;;  %s7803_s20 = sphi %s7918_s20, %s9238_s20   ;;  %s7799_s19 = sphi %s7916_s19, %s9237_s19   ;;  %s7795_s18 = sphi %s7914_s18, %s9236_s18  }
  0x1a   : > { %s417_s23 = sshll.u32 %s7809_s22, 4  ;;  %p4604_p0 = scmp.ge.s32.totalorder %s7807_s21, 1  ;;  %s7941_s23 = int_to_ptr.vmem [resolvable:$true] %s417_s23 }
  0x1b   : > { %p9159_p1 = scmp.eq.s32.totalorder %s7935_s24, 0  ;;  %p394_p2 = scmp.lt.s32.totalorder %s7807_s21, 3 }
  0x1c   : > { %s7810_s26 = smov [#allocation10]   ;;  %s7811_s29 = smov [#allocation13]  }
  0x1d   : > { %p7943_p4 = pnand %p4604_p0, %p394_p2  ;;  %s441_s27 = sshll.u32 %s7810_s26, 4  ;;  %s7955_s27 = int_to_ptr.vmem [resolvable:$true] %s441_s27 }
  0x1e   : > { %s469_s30 = sshll.u32 %s7811_s29, 4  ;;  %s9190_s1 = sld [smem:[#allocation40_spill]]  ;;  %s7957_s30 = int_to_ptr.vmem [resolvable:$true] %s469_s30 }
  0x1f   : > { %s9187_s25 = scalar_select %p7943_p4, 1, 0 }
  0x20   : > { %p6681_p5 = pneg %p7943_p4 }
  0x21   : > { %9188 = sst [smem:[#allocation38_spill]] %s9187_s25 }
  0x22   : > { %p7951_p6 = pnand %p6681_p5, %p9159_p1 }
  0x24   : > { %s9189_s28 = scalar_select %p7951_p6, 1, 0 }
  0x25   : > { %s7313_s22 = scalar_lea.hbm %s9190_s1, 1024  ;;  %p7967_p8 = pneg %p7951_p6 }
  0x26   : > { %p7314_p7 = scmp.ne.s32.totalorder %s9190_s1, %s7313_s22  ;;  %p7320_p11 = scmp.lt.u32.totalorder %s7313_s22, %s9190_s1 }
  0x27   : > { %s9191_s26 = scalar_select %p7967_p8, 1, 0 }
  0x28   : > { %p7316_p9 = pnand %p7967_p8, %p7314_p7 }
  0x2a   : > { %p7317_p10 = pneg %p7316_p9 }
  0x2c   : > { %p7322_p12 = pnand %p7320_p11, %p7317_p10 }
  0x2e   : > { %7325 = shalt.err (!%p7322_p12)
}
  0x2f   : > { %s7326_s5 = scalar_lea.vmem %s7941_s23, 1024  ;;  %p7334_p5 = scmp.lt.s32.totalorder %s7941_s23, %s7941_s23 }
  0x30   : > { %p7327_p13 = scmp.ne.s32.totalorder %s7941_s23, %s7326_s5  ;;  %p7335_p3 = scmp.lt.s32.totalorder %s7326_s5, %s7326_s5 }
  0x32   : > { %p7329_p0 = pnand %p7327_p13, %p7967_p8  ;;  %p7336_p7 = por %p7335_p3, %p7334_p5 }
  0x34   : > { %p7330_p2 = pneg %p7329_p0 }
  0x36   : > { %p7337_p9 = pnand %p7336_p7, %p7330_p2 }
  0x38   : > { %7340 = shalt.err (!%p7337_p9)
}
  0x39   : > { %s9161_s15 = smov 64   ;;  %s7813_s25 = smov 4  }
  0x3a   : > { %6687 = dma.hbm_to_vmem [thread:$0]  (!%p7951_p6), %s9190_s1, 1024, %s7941_s23, [#allocation8], %s9161_s15, %s9161_s15, %s7813_s25  }
  0x3b   : > { %s9192_s3 = sld [smem:[#allocation41_spill]] }
  0x41   : > { %s7341_s12 = scalar_lea.hbm %s9192_s3, 1024 }
  0x42   : > { %p7342_p3 = scmp.ne.s32.totalorder %s9192_s3, %s7341_s12  ;;  %p7348_p12 = scmp.lt.u32.totalorder %s7341_s12, %s9192_s3 }
  0x44   : > { %p7344_p10 = pnand %p7342_p3, %p7967_p8 }
  0x46   : > { %p7345_p11 = pneg %p7344_p10 }
  0x48   : > { %p7350_p13 = pnand %p7348_p12, %p7345_p11 }
  0x4a   : > { %7353 = shalt.err (!%p7350_p13)
}
  0x4b   : > { %s7354_s23 = scalar_lea.vmem %s7955_s27, 1024  ;;  %p7362_p7 = scmp.lt.s32.totalorder %s7955_s27, %s7955_s27 }
  0x4c   : > { %p7355_p0 = scmp.ne.s32.totalorder %s7955_s27, %s7354_s23  ;;  %p7363_p9 = scmp.lt.s32.totalorder %s7354_s23, %s7354_s23 }
  0x4e   : > { %p7357_p2 = pnand %p7355_p0, %p7967_p8  ;;  %p7364_p3 = por %p7363_p9, %p7362_p7 }
  0x50   : > { %p7358_p5 = pneg %p7357_p2 }
  0x52   : > { %p7365_p10 = pnand %p7364_p3, %p7358_p5 }
  0x54   : > { %7368 = shalt.err (!%p7365_p10)
}
  0x55   : > { %6693 = dma.hbm_to_vmem [thread:$0]  (!%p7951_p6), %s9192_s3, 1024, %s7955_s27, [#allocation11], %s9161_s15, %s9161_s15, %s7813_s25  }
  0x56   : > { %s9193_s6 = sld [smem:[#allocation43_spill]] }
  0x5c   : > { %s7369_s16 = scalar_lea.hbm %s9193_s6, 32 }
  0x5d   : > { %p7370_p11 = scmp.ne.s32.totalorder %s9193_s6, %s7369_s16  ;;  %p7376_p0 = scmp.lt.u32.totalorder %s7369_s16, %s9193_s6 }
  0x5f   : > { %p7372_p12 = pnand %p7370_p11, %p7967_p8 }
  0x61   : > { %p7373_p13 = pneg %p7372_p12 }
  0x63   : > { %p7378_p2 = pnand %p7376_p0, %p7373_p13 }
  0x65   : > { %7381 = shalt.err (!%p7378_p2)
}
  0x66   : > { %s7382_s27 = scalar_lea.vmem %s7957_s30, 32  ;;  %p7390_p3 = scmp.lt.s32.totalorder %s7957_s30, %s7957_s30 }
  0x67   : > { %p7383_p5 = scmp.ne.s32.totalorder %s7957_s30, %s7382_s27  ;;  %p7391_p10 = scmp.lt.s32.totalorder %s7382_s27, %s7382_s27 }
  0x69   : > { %p7385_p7 = pnand %p7383_p5, %p7967_p8  ;;  %p7392_p11 = por %p7391_p10, %p7390_p3 }
  0x6b   : > { %p7386_p9 = pneg %p7385_p7 }
  0x6d   : > { %p7393_p12 = pnand %p7392_p11, %p7386_p9 }
  0x6f   : > { %7396 = shalt.err (!%p7393_p12)
}
  0x70   : > { %6699 = dma.hbm_to_vmem [thread:$0]  (!%p7951_p6), %s9193_s6, 32, %s7957_s30, [#allocation14]  }
  0x71   : > { %s7814_s9 = smov [#allocation16]   ;;  %s9194_s8 = sld [smem:[#allocation44_spill]] }
  0x72   : > { %s490_s11 = sshll.u32 %s7814_s9, 4  ;;  %s491_s11 = int_to_ptr.vmem [resolvable:$true] %s490_s11 }
  0x77   : > { %s7397_s16 = scalar_lea.hbm %s9194_s8, 256 }
  0x78   : > { %p7398_p13 = scmp.ne.s32.totalorder %s9194_s8, %s7397_s16  ;;  %p7404_p5 = scmp.lt.u32.totalorder %s7397_s16, %s9194_s8 }
  0x7a   : > { %p7400_p0 = pnand %p7398_p13, %p7967_p8 }
  0x7c   : > { %p7401_p2 = pneg %p7400_p0 }
  0x7e   : > { %p7406_p7 = pnand %p7404_p5, %p7401_p2 }
  0x80   : > { %7409 = shalt.err (!%p7406_p7)
}
  0x81   : > { %s7410_s30 = scalar_lea.vmem %s491_s11, 256  ;;  %p7418_p11 = scmp.lt.s32.totalorder %s491_s11, %s491_s11 }
  0x82   : > { %p7411_p9 = scmp.ne.s32.totalorder %s491_s11, %s7410_s30  ;;  %p7419_p12 = scmp.lt.s32.totalorder %s7410_s30, %s7410_s30 }
  0x84   : > { %p7413_p3 = pnand %p7411_p9, %p7967_p8  ;;  %p7420_p1 = por %p7419_p12, %p7418_p11 }
  0x86   : > { %p7414_p10 = pneg %p7413_p3 }
  0x88   : > { %p7421_p4 = pnand %p7420_p1, %p7414_p10 }
  0x8a   : > { %7424 = shalt.err (!%p7421_p4)
}
  0x8b   : > { %s9162_s27 = smov 128   ;;  %s9163_s25 = smov 8  }
  0x8c   : > { %6705 = dma.hbm_to_vmem [thread:$0]  (!%p7951_p6), %s9194_s8, 256, %s491_s11, [#allocation17], %s9162_s27, %s9162_s27, %s9163_s25  }
  0x8d   : > { %s7817_s12 = smov [#allocation24]   ;;  %s9195_s13 = sld [smem:[#allocation49_spill]] }
  0x8e   : > { %s514_s14 = sshll.u32 %s7817_s12, 4  ;;  %s515_s14 = int_to_ptr.vmem [resolvable:$true] %s514_s14 }
  0x93   : > { %s7425_s22 = scalar_lea.hbm %s9195_s13, 2048 }
  0x94   : > { %p7426_p1 = scmp.ne.s32.totalorder %s9195_s13, %s7425_s22  ;;  %p7432_p0 = scmp.lt.u32.totalorder %s7425_s22, %s9195_s13 }
  0x96   : > { %p7428_p4 = pnand %p7426_p1, %p7967_p8 }
  0x98   : > { %p7429_p13 = pneg %p7428_p4 }
  0x9a   : > { %p7434_p2 = pnand %p7432_p0, %p7429_p13 }
  0x9c   : > { %7437 = shalt.err (!%p7434_p2)
}
  0x9d   : > { %s7438_s11 = scalar_lea.vmem %s515_s14, 2048  ;;  %p7446_p3 = scmp.lt.s32.totalorder %s515_s14, %s515_s14 }
  0x9e   : > { %p7439_p5 = scmp.ne.s32.totalorder %s515_s14, %s7438_s11  ;;  %p7447_p10 = scmp.lt.s32.totalorder %s7438_s11, %s7438_s11 }
  0xa0   : > { %p7441_p7 = pnand %p7439_p5, %p7967_p8  ;;  %p7448_p11 = por %p7447_p10, %p7446_p3 }
  0xa2   : > { %p7442_p9 = pneg %p7441_p7 }
  0xa4   : > { %p7449_p12 = pnand %p7448_p11, %p7442_p9 }
  0xa6   : > { %7452 = shalt.err (!%p7449_p12)
}
  0xa7   : > { %6711 = dma.hbm_to_vmem [thread:$0]  (!%p7951_p6), %s9195_s13, 2048, %s515_s14, [#allocation23], %s9162_s27, %s9162_s27, %s9163_s25  }
  0xa8   : > { %s8081_s9 = sadd.s32 1, %s7807_s21   ;;  %s255_s16 = sadd.s32 1, %s7803_s20 }
  0xa9   : > { %s252_s12 = ssub.s32 %s7807_s21, %s8081_s9  ;;  %p262_p4 = scmp.ne.s32.totalorder %s7803_s20, %s7799_s19 }
  0xaa   : > { %p253_p1 = scmp.eq.s32.totalorder %s252_s12, 0  ;;  %p263_p13 = scmp.eq.s32.totalorder %s7807_s21, 0 }
  0xab   : > { %p268_p0 = scmp.ne.s32.totalorder %s7799_s19, %s7795_s18  ;;  %p9197_p5 = scmp.eq.s32.totalorder %s7935_s24, 0 }
  0xac   : > { %s8092_s17 = scalar_select %p253_p1, %s7803_s20, %s255_s16  }
  0xad   : > { %p264_p2 = por %p263_p13, %p262_p4  ;;  %p8096_p7 = por %p9197_p5, %p268_p0 }
  0xae   : > { %9196 = sst [smem:[#allocation39_spill]] %s8092_s17  ;;  %p6736_p9 = scmp.lt.s32.totalorder %s7807_s21, 2 }
  0xaf   : > { %s9198_s22 = scalar_select %p8096_p7, 1, 0 }
  0xb0   : > { %s9165_s14 = sand.u32 1, %s7807_s21   ;;  %s9164_s29 = sand.u32 1, %s7803_s20  }
  0xb1   : > { %s8105_s5 = sshll.u32 %s9164_s29, 11  ;;  %s4674_s30 = sshll.u32 %s7807_s21, 10 }
  0xb2   : > { %s9199_s10 = sld [smem:[#allocation46_spill]]  ;;  %s543_s23 = scalar_lea.vmem [#allocation19], %s8105_s5 }
  0xb3   : > { %s550_s12 = sshll.u32 %s543_s23, 4  ;;  %p8114_p3 = pnand %p6736_p9, %p264_p2  ;;  %s8118_s12 = int_to_ptr.vmem [resolvable:$true] %s550_s12 }
  0xb4   : > { %s8122_s27 = scalar_lea.sflag [#allocation20], %s9165_s14 }
  0xb5   : > { %s9200_s16 = scalar_select %p8114_p3, 1, 0 }
  0xb6   : > { %p8128_p11 = pneg %p8114_p3 }
  0xb8   : > { %s8111_s18 = scalar_lea.hbm %s9199_s10, %s4674_s30  ;;  %s7458_s23 = scalar_lea.hbm %s9199_s10, 65536 }
  0xb9   : > { %s7453_s25 = scalar_lea.hbm %s8111_s18, 32768  ;;  %p7459_p4 = scmp.lt.u32.totalorder %s8111_s18, %s9199_s10 }
  0xba   : > { %p7454_p10 = scmp.ne.s32.totalorder %s8111_s18, %s7453_s25  ;;  %p7460_p13 = scmp.lt.u32.totalorder %s7458_s23, %s7453_s25 }
  0xbb   : > { %s9201_s30 = scalar_select %p8128_p11, 1, 0 }
  0xbc   : > { %p7456_p12 = pnand %p8128_p11, %p7454_p10  ;;  %p7461_p0 = por %p7460_p13, %p7459_p4 }
  0xbd   : > { %p7462_p2 = scmp.lt.u32.totalorder %s7453_s25, %s8111_s18 }
  0xbe   : > { %p7457_p1 = pneg %p7456_p12 }
  0xbf   : > { %p7463_p5 = por %p7462_p2, %p7461_p0 }
  0xc1   : > { %p7464_p9 = pnand %p7463_p5, %p7457_p1 }
  0xc3   : > { %7467 = shalt.err (!%p7464_p9)
}
  0xc4   : > { %s7468_s14 = scalar_lea.vmem %s8118_s12, 32768  ;;  %s7818_s11 = smov [#allocation19]  }
  0xc5   : > { %p7469_p10 = scmp.ne.s32.totalorder %s8118_s12, %s7468_s14  ;;  %s7473_s15 = sshll.u32 %s7818_s11, 4  ;;  %s7474_s15 = int_to_ptr.vmem [resolvable:$false] %s7473_s15 }
  0xc6   : > { %s7475_s1 = scalar_lea.vmem %s7474_s15, 65536  ;;  %p7476_p6 = scmp.lt.s32.totalorder %s8118_s12, %s7474_s15 }
  0xc7   : > { %p7471_p12 = pnand %p7469_p10, %p8128_p11  ;;  %p7477_p8 = scmp.lt.s32.totalorder %s7475_s1, %s7468_s14 }
  0xc9   : > { %p7472_p7 = pneg %p7471_p12  ;;  %p7478_p4 = por %p7477_p8, %p7476_p6 }
  0xcb   : > { %p7479_p13 = pnand %p7478_p4, %p7472_p7 }
  0xcd   : > { %7482 = shalt.err (!%p7479_p13)
}
  0xce   : > { %s7819_s25 = smov 2048   ;;  %s7820_s29 = smov 1024  }
  0xcf   : > { %s9202_s23 = smov 64   ;;  %s7821_s3 = smov [#allocation4]  }
  0xd0   : > { %6718 = dma.hbm_to_vmem [thread:$0]  (!%p8114_p3), %s8111_s18, 32768, %s8118_s12, %s8122_s27, %s7819_s25, %s7820_s29, %s9202_s23  }
  0xd1   : > { %s407_s6 = sshll.u32 %s7821_s3, 4  ;;  %s7822_s11 = smov [#allocation9]   ;;  %s408_s6 = int_to_ptr.vmem [resolvable:$true] %s407_s6 }
  0xd2   : > { %s431_s8 = sshll.u32 %s7822_s11, 4  ;;  %s7483_s1 = scalar_lea.hbm %s9136_s0, 128  ;;  %s8153_s8 = int_to_ptr.vmem [resolvable:$true] %s431_s8 }
  0xd3   : > { %p7484_p6 = scmp.ne.s32.totalorder %s9136_s0, %s7483_s1  ;;  %p9203_p8 = scmp.ne.s32.totalorder %s9191_s26, 0 }
  0xd4   : > { %p7490_p0 = scmp.lt.u32.totalorder %s7483_s1, %s9136_s0 }
  0xd5   : > { %p7486_p7 = pnand %p7484_p6, %p9203_p8 }
  0xd7   : > { %p7487_p1 = pneg %p7486_p7 }
  0xd9   : > { %p7492_p2 = pnand %p7490_p0, %p7487_p1 }
  0xdb   : > { %7495 = shalt.err (!%p7492_p2)
}
  0xdc   : > { %s7496_s3 = scalar_lea.vmem %s408_s6, 128  ;;  %p7504_p12 = scmp.lt.s32.totalorder %s408_s6, %s408_s6 }
  0xdd   : > { %p7497_p5 = scmp.ne.s32.totalorder %s408_s6, %s7496_s3  ;;  %p7505_p4 = scmp.lt.s32.totalorder %s7496_s3, %s7496_s3 }
  0xdf   : > { %p7499_p9 = pnand %p7497_p5, %p9203_p8  ;;  %p7506_p13 = por %p7505_p4, %p7504_p12 }
  0xe1   : > { %p7500_p10 = pneg %p7499_p9 }
  0xe3   : > { %p7507_p3 = pnand %p7506_p13, %p7500_p10 }
  0xe5   : > { %7510 = shalt.err (!%p7507_p3)
}
  0xe6   : > { %p9204_p6 = scmp.ne.s32.totalorder %s9189_s28, 0  ;;  %s7511_s25 = scalar_lea.hbm %s9138_s2, 16 }
  0xe7   : > { %p7512_p7 = scmp.ne.s32.totalorder %s9138_s2, %s7511_s25  ;;  %p7518_p3 = scmp.lt.u32.totalorder %s7511_s25, %s9138_s2 }
  0xe8   : > { %6684 = dma.hbm_to_vmem [thread:$0]  (!%p9204_p6), %s9136_s0, 128, %s408_s6, [#allocation5]  }
  0xe9   : > { %p7514_p1 = pnand %p7512_p7, %p9203_p8 }
  0xeb   : > { %p7515_p0 = pneg %p7514_p1 }
  0xed   : > { %p7520_p2 = pnand %p7518_p3, %p7515_p0 }
  0xef   : > { %7523 = shalt.err (!%p7520_p2)
}
  0xf0   : > { %s7524_s6 = scalar_lea.vmem %s8153_s8, 16  ;;  %s7531_s15 = scalar_lea.vmem %s8153_s8, 32 }
  0xf1   : > { %p7525_p5 = scmp.ne.s32.totalorder %s8153_s8, %s7524_s6  ;;  %p7532_p12 = scmp.lt.s32.totalorder %s8153_s8, %s8153_s8 }
  0xf2   : > { %p7533_p4 = scmp.lt.s32.totalorder %s7531_s15, %s7524_s6 }
  0xf3   : > { %p7527_p9 = pnand %p7525_p5, %p9203_p8 }
  0xf4   : > { %p7534_p13 = por %p7533_p4, %p7532_p12 }
  0xf5   : > { %p7528_p10 = pneg %p7527_p9 }
  0xf7   : > { %p7535_p7 = pnand %p7534_p13, %p7528_p10 }
  0xf9   : > { %7538 = shalt.err (!%p7535_p7)
}
  0xfa   : > { %6690 = dma.hbm_to_vmem [thread:$0]  (!%p9204_p6), %s9138_s2, 16, %s8153_s8, [#allocation8]  }
  0xfb   : > { %s7823_s3 = smov [#allocation12]   ;;  %s7824_s13 = smov [#allocation15]  }
  0xfc   : > { %s455_s10 = sshll.u32 %s7823_s3, 4  ;;  %s480_s17 = sshll.u32 %s7824_s13, 4  ;;  %s456_s10 = int_to_ptr.vmem [resolvable:$true] %s455_s10  ;;  %s8197_s17 = int_to_ptr.vmem [resolvable:$true] %s480_s17 }
  0xfd   : > { %s7539_s29 = scalar_lea.hbm %s9140_s4, 16 }
  0xfe   : > { %p7540_p1 = scmp.ne.s32.totalorder %s9140_s4, %s7539_s29  ;;  %p7546_p2 = scmp.lt.u32.totalorder %s7539_s29, %s9140_s4 }
 0x100   : > { %p7542_p0 = pnand %p7540_p1, %p9203_p8 }
 0x102   : > { %p7543_p3 = pneg %p7542_p0 }
 0x104   : > { %p7548_p5 = pnand %p7546_p2, %p7543_p3 }
 0x106   : > { %7551 = shalt.err (!%p7548_p5)
}
 0x107   : > { %s7552_s6 = scalar_lea.vmem %s456_s10, 16  ;;  %s7559_s15 = scalar_lea.vmem %s456_s10, 32 }
 0x108   : > { %p7553_p9 = scmp.ne.s32.totalorder %s456_s10, %s7552_s6  ;;  %p7560_p4 = scmp.lt.s32.totalorder %s456_s10, %s456_s10 }
 0x109   : > { %p7561_p13 = scmp.lt.s32.totalorder %s7559_s15, %s7552_s6 }
 0x10a   : > { %p7555_p10 = pnand %p7553_p9, %p9203_p8 }
 0x10b   : > { %p7562_p7 = por %p7561_p13, %p7560_p4 }
 0x10c   : > { %p7556_p12 = pneg %p7555_p10 }
 0x10e   : > { %p7563_p11 = pnand %p7562_p7, %p7556_p12 }
 0x110   : > { %7566 = shalt.err (!%p7563_p11)
}
 0x111   : > { %6696 = dma.hbm_to_vmem [thread:$0]  (!%p9204_p6), %s9140_s4, 16, %s456_s10, [#allocation11]  }
 0x112   : > { %s7567_s12 = scalar_lea.hbm %s9143_s7, 128 }
 0x113   : > { %p7568_p1 = scmp.ne.s32.totalorder %s9143_s7, %s7567_s12  ;;  %p7574_p11 = scmp.lt.u32.totalorder %s7567_s12, %s9143_s7 }
 0x115   : > { %p7570_p0 = pnand %p7568_p1, %p9203_p8 }
 0x117   : > { %p7571_p3 = pneg %p7570_p0 }
 0x119   : > { %p7576_p2 = pnand %p7574_p11, %p7571_p3 }
 0x11b   : > { %7579 = shalt.err (!%p7576_p2)
}
 0x11c   : > { %s7580_s10 = scalar_lea.vmem %s8197_s17, 128  ;;  %p7588_p12 = scmp.lt.s32.totalorder %s8197_s17, %s8197_s17 }
 0x11d   : > { %p7581_p5 = scmp.ne.s32.totalorder %s8197_s17, %s7580_s10  ;;  %p7589_p4 = scmp.lt.s32.totalorder %s7580_s10, %s7580_s10 }
 0x11f   : > { %p7583_p9 = pnand %p7581_p5, %p9203_p8  ;;  %p7590_p13 = por %p7589_p4, %p7588_p12 }
 0x121   : > { %p7584_p10 = pneg %p7583_p9 }
 0x123   : > { %p7591_p7 = pnand %p7590_p13, %p7584_p10 }
 0x125   : > { %7594 = shalt.err (!%p7591_p7)
}
 0x126   : > { %6702 = dma.hbm_to_vmem [thread:$0]  (!%p9204_p6), %s9143_s7, 128, %s8197_s17, [#allocation14]  }
 0x127   : > { %s7825_s6 = smov [#allocation18]   ;;  %s7826_s1 = smov [#allocation25]  }
 0x128   : > { %s504_s15 = sshll.u32 %s7825_s6, 4  ;;  %s528_s18 = sshll.u32 %s7826_s1, 4  ;;  %s505_s15 = int_to_ptr.vmem [resolvable:$true] %s504_s15  ;;  %s8240_s18 = int_to_ptr.vmem [resolvable:$true] %s528_s18 }
 0x129   : > { %s9205_s12 = sld [smem:[#allocation45_spill]] }
 0x12f   : > { %s7595_s25 = scalar_lea.hbm %s9205_s12, 64 }
 0x130   : > { %p7596_p1 = scmp.ne.s32.totalorder %s9205_s12, %s7595_s25  ;;  %p7602_p11 = scmp.lt.u32.totalorder %s7595_s25, %s9205_s12 }
 0x132   : > { %p7598_p0 = pnand %p7596_p1, %p9203_p8 }
 0x134   : > { %p7599_p3 = pneg %p7598_p0 }
 0x136   : > { %p7604_p2 = pnand %p7602_p11, %p7599_p3 }
 0x138   : > { %7607 = shalt.err (!%p7604_p2)
}
 0x139   : > { %s7608_s10 = scalar_lea.vmem %s505_s15, 64  ;;  %p7616_p12 = scmp.lt.s32.totalorder %s505_s15, %s505_s15 }
 0x13a   : > { %p7609_p5 = scmp.ne.s32.totalorder %s505_s15, %s7608_s10  ;;  %p7617_p4 = scmp.lt.s32.totalorder %s7608_s10, %s7608_s10 }
 0x13c   : > { %p7611_p9 = pnand %p7609_p5, %p9203_p8  ;;  %p7618_p13 = por %p7617_p4, %p7616_p12 }
 0x13e   : > { %p7612_p10 = pneg %p7611_p9 }
 0x140   : > { %p7619_p7 = pnand %p7618_p13, %p7612_p10 }
 0x142   : > { %7622 = shalt.err (!%p7619_p7)
}
 0x143   : > { %6708 = dma.hbm_to_vmem [thread:$0]  (!%p9204_p6), %s9205_s12, 64, %s505_s15, [#allocation17]  }
 0x144   : > { %s9206_s3 = sld [smem:[#allocation50_spill]] }
 0x14a   : > { %s7623_s13 = scalar_lea.hbm %s9206_s3, 64 }
 0x14b   : > { %p7624_p1 = scmp.ne.s32.totalorder %s9206_s3, %s7623_s13  ;;  %p7630_p11 = scmp.lt.u32.totalorder %s7623_s13, %s9206_s3 }
 0x14d   : > { %p7626_p0 = pnand %p7624_p1, %p9203_p8 }
 0x14f   : > { %p7627_p3 = pneg %p7626_p0 }
 0x151   : > { %p7632_p2 = pnand %p7630_p11, %p7627_p3 }
 0x153   : > { %7635 = shalt.err (!%p7632_p2)
}
 0x154   : > { %s7636_s15 = scalar_lea.vmem %s8240_s18, 64  ;;  %p7644_p12 = scmp.lt.s32.totalorder %s8240_s18, %s8240_s18 }
 0x155   : > { %p7637_p5 = scmp.ne.s32.totalorder %s8240_s18, %s7636_s15  ;;  %p7645_p4 = scmp.lt.s32.totalorder %s7636_s15, %s7636_s15 }
 0x157   : > { %p7639_p9 = pnand %p7637_p5, %p9203_p8  ;;  %p7646_p13 = por %p7645_p4, %p7644_p12 }
 0x159   : > { %p7640_p10 = pneg %p7639_p9 }
 0x15b   : > { %p7647_p7 = pnand %p7646_p13, %p7640_p10 }
 0x15d   : > { %7650 = shalt.err (!%p7647_p7)
}
 0x15e   : > { %6714 = dma.hbm_to_vmem [thread:$0]  (!%p9204_p6), %s9206_s3, 64, %s8240_s18, [#allocation26]  }
 0x15f   : > { %s9207_s14 = sand.u32 1, %s7803_s20   ;;  %s4675_s8 = sshll.u32 %s7807_s21, 9 }
 0x160   : > { %s4620_s26 = sshll.u32 %s9207_s14, 5  ;;  %s9208_s13 = sld [smem:[#allocation47_spill]] }
 0x161   : > { %s564_s28 = scalar_lea.vmem [#allocation21], %s4620_s26  ;;  %p9209_p1 = scmp.ne.s32.totalorder %s9201_s30, 0 }
 0x162   : > { %s572_s29 = sshll.u32 %s564_s28, 4  ;;  %s573_s29 = int_to_ptr.vmem [resolvable:$true] %s572_s29 }
 0x166   : > { %s8289_s25 = scalar_lea.hbm %s9208_s13, %s4675_s8  ;;  %s7656_s15 = scalar_lea.hbm %s9208_s13, 1024 }
 0x167   : > { %s7651_s23 = scalar_lea.hbm %s8289_s25, 512  ;;  %p7657_p3 = scmp.lt.u32.totalorder %s8289_s25, %s9208_s13 }
 0x168   : > { %p7652_p8 = scmp.ne.s32.totalorder %s8289_s25, %s7651_s23  ;;  %p7658_p11 = scmp.lt.u32.totalorder %s7656_s15, %s7651_s23 }
 0x169   : > { %p7660_p5 = scmp.lt.u32.totalorder %s7651_s23, %s8289_s25 }
 0x16a   : > { %p7654_p0 = pnand %p7652_p8, %p9209_p1  ;;  %p7659_p2 = por %p7658_p11, %p7657_p3 }
 0x16c   : > { %p7655_p6 = pneg %p7654_p0  ;;  %p7661_p9 = por %p7660_p5, %p7659_p2 }
 0x16e   : > { %p7662_p10 = pnand %p7661_p9, %p7655_p6 }
 0x170   : > { %7665 = shalt.err (!%p7662_p10)
}
 0x171   : > { %s7666_s14 = scalar_lea.vmem %s573_s29, 512  ;;  %s7827_s26 = smov [#allocation21]  }
 0x172   : > { %p7667_p12 = scmp.ne.s32.totalorder %s573_s29, %s7666_s14  ;;  %s7671_s8 = sshll.u32 %s7827_s26, 4  ;;  %s7672_s8 = int_to_ptr.vmem [resolvable:$false] %s7671_s8 }
 0x173   : > { %s7673_s6 = scalar_lea.vmem %s7672_s8, 1024  ;;  %p7674_p7 = scmp.lt.s32.totalorder %s573_s29, %s7672_s8 }
 0x174   : > { %p7669_p4 = pnand %p7667_p12, %p9209_p1  ;;  %p7675_p8 = scmp.lt.s32.totalorder %s7673_s6, %s7666_s14 }
 0x176   : > { %p7670_p13 = pneg %p7669_p4  ;;  %p7676_p0 = por %p7675_p8, %p7674_p7 }
 0x178   : > { %p7677_p3 = pnand %p7676_p0, %p7670_p13 }
 0x17a   : > { %7680 = shalt.err (!%p7677_p3)
}
 0x17b   : > { %p9210_p11 = scmp.ne.s32.totalorder %s9200_s16, 0  ;;  %s4677_s1 = sshll.u32 %s7807_s21, 15 }
 0x17c   : > { %s583_s28 = scalar_lea.vmem [#allocation22], %s8105_s5  ;;  %s9211_s15 = sld [smem:[#allocation48_spill]] }
 0x17d   : > { %6721 = dma.hbm_to_vmem [thread:$0]  (!%p9210_p11), %s8289_s25, 512, %s573_s29, %s8122_s27  }
 0x17e   : > { %s591_s23 = sshll.u32 %s583_s28, 4  ;;  %s9212_s10 = sand.u32 1, %s7807_s21   ;;  %s8316_s23 = int_to_ptr.vmem [resolvable:$true] %s591_s23 }
 0x17f   : > { %s8320_s14 = scalar_lea.sflag [#allocation23], %s9212_s10 }
 0x182   : > { %s8314_s17 = scalar_lea.hbm %s9211_s15, %s4677_s1  ;;  %s7686_s25 = scalar_lea.hbm %s9211_s15, 65536 }
 0x183   : > { %s7681_s26 = scalar_lea.hbm %s8314_s17, 32768  ;;  %p7687_p9 = scmp.lt.u32.totalorder %s8314_s17, %s9211_s15 }
 0x184   : > { %p7682_p6 = scmp.ne.s32.totalorder %s8314_s17, %s7681_s26  ;;  %p7688_p10 = scmp.lt.u32.totalorder %s7686_s25, %s7681_s26 }
 0x185   : > { %p7690_p4 = scmp.lt.u32.totalorder %s7681_s26, %s8314_s17 }
 0x186   : > { %p7684_p2 = pnand %p7682_p6, %p9209_p1  ;;  %p7689_p12 = por %p7688_p10, %p7687_p9 }
 0x188   : > { %p7685_p5 = pneg %p7684_p2  ;;  %p7691_p13 = por %p7690_p4, %p7689_p12 }
 0x18a   : > { %p7692_p7 = pnand %p7691_p13, %p7685_p5 }
 0x18c   : > { %7695 = shalt.err (!%p7692_p7)
}
 0x18d   : > { %s7696_s21 = scalar_lea.vmem %s8316_s23, 32768  ;;  %s7828_s6 = smov [#allocation22]  }
 0x18e   : > { %p7697_p8 = scmp.ne.s32.totalorder %s8316_s23, %s7696_s21  ;;  %s7701_s1 = sshll.u32 %s7828_s6, 4  ;;  %s7702_s1 = int_to_ptr.vmem [resolvable:$false] %s7701_s1 }
 0x18f   : > { %s7703_s28 = scalar_lea.vmem %s7702_s1, 65536  ;;  %p7704_p6 = scmp.lt.s32.totalorder %s8316_s23, %s7702_s1 }
 0x190   : > { %p7699_p0 = pnand %p7697_p8, %p9209_p1  ;;  %p7705_p2 = scmp.lt.s32.totalorder %s7703_s28, %s7696_s21 }
 0x192   : > { %p7700_p3 = pneg %p7699_p0  ;;  %p7706_p9 = por %p7705_p2, %p7704_p6 }
 0x194   : > { %p7707_p10 = pnand %p7706_p9, %p7700_p3 }
 0x196   : > { %7710 = shalt.err (!%p7707_p10)
}
 0x197   : > { %s9213_s18 = smov 8   ;;  %s9214_s11 = smov 128  }
 0x198   : > { %6724 = dma.hbm_to_vmem [thread:$0]  (!%p9210_p11), %s8314_s17, 32768, %s8316_s23, %s8320_s14, %s9214_s11, %s9214_s11, %s9213_s18  }
 0x199   : > { %s9215_s30 = sld [smem:[#allocation38_spill]] }
 0x19f   : > { %p9216_p1 = scmp.ne.s32.totalorder %s9215_s30, 0 }
 0x1a0   : > { %p9217_p5 = scmp.eq.s32.totalorder (!%p9216_p1), %s7935_s24, 0 }
 0x1a1   : > { %603 = sbr.rel (%p9216_p1) target bundleno = 3230 (0xc9e), region = 80 }
 0x1a8   : > { %7754 = dma.done.wait (%p9217_p5), [#allocation5], 128   ;;  %p9218_p12 = pmov %p9217_p5 }
 0x1a9   : > { %p9219_p4 = pmov %p9217_p5 }
 0x1aa   : > { %7756 = vsyncadd (%p9218_p12), [#allocation5], 4294967168 }
 0x1ab   : > { %7758 = dma.done.wait (%p9219_p4), [#allocation8], 1040   ;;  %p9220_p13 = pmov %p9219_p4 }
 0x1ac   : > { %p9221_p7 = pmov %p9219_p4 }
 0x1ad   : > { %7760 = vsyncadd (%p9220_p13), [#allocation8], 4294966256 }
 0x1ae   : > { %7762 = dma.done.wait (%p9221_p7), [#allocation11], 1040   ;;  %p9222_p11 = pmov %p9219_p4 }
 0x1af   : > { %p9223_p8 = pmov %p9219_p4 }
 0x1b0   : > { %7764 = vsyncadd (%p9222_p11), [#allocation11], 4294966256 }
 0x1b1   : > { %7766 = dma.done.wait (%p9223_p8), [#allocation14], 160   ;;  %p9224_p0 = pmov %p9219_p4 }
 0x1b3   : > { %7768 = vsyncadd (%p9224_p0), [#allocation14], 4294967136  ;;  %p9225_p3 = pmov %p9224_p0 }
 0x1b4   : > { %p9226_p6 = pmov %p9224_p0 }
 0x1b5   : > { %7770 = dma.done.wait (%p9225_p3), [#allocation17], 320  }
 0x1b6   : > { %7772 = vsyncadd (%p9226_p6), [#allocation17], 4294966976  ;;  %s641_s16 = sand.u32 1, %s7935_s24   ;;  %s643_s23 = sand.u32 1, %s7799_s19  }
 0x1b7   : > { %s4637_s17 = sshll.u32 %s643_s23, 11  ;;  %s642_s10 = scalar_lea.sflag [#allocation20], %s641_s16 }
 0x1b8   : > { %s8371_s14 = scalar_lea.vmem [#allocation19], %s4637_s17  ;;  %p9227_p2 = scmp.ne.s32.totalorder %s9198_s22, 0 }
 0x1ba   : > { %7774 = dma.done.wait (%p9227_p2), %s642_s10, 33280  }
 0x1bb   : > { %7776 = vsyncadd (%p9227_p2), %s642_s10, 4294934016  ;;  %s4638_s26 = sshll.u32 %s643_s23, 5  ;;  %s660_s5 = scalar_lea.sflag [#allocation23], %s641_s16 }
 0x1bc   : > { %s8377_s27 = scalar_lea.vmem [#allocation21], %s4638_s26  ;;  %s8379_s25 = scalar_lea.vmem [#allocation22], %s4637_s17 }
 0x1bd   : > { %7778 = dma.done.wait (%p9227_p2), %s660_s5, 32768  }
 0x1be   : > { %7780 = vsyncadd (%p9227_p2), %s660_s5, 4294934528  ;;  %p9228_p9 = pmov %p9224_p0 }
 0x1bf   : > { %p9229_p10 = pmov %p9224_p0 }
 0x1c0   : > { %7782 = dma.done.wait (%p9228_p9), [#allocation23], 2048  }
 0x1c1   : > { %7784 = vsyncadd (%p9229_p10), [#allocation23], 4294965248  ;;  %p9230_p1 = pmov %p9224_p0 }
 0x1c2   : > { %p9231_p5 = pmov %p9224_p0 }
 0x1c3   : > { %7786 = dma.done.wait (%p9230_p1), [#allocation26], 64  }
 0x1c4   : > { %7788 = vsyncadd (%p9231_p5), [#allocation26], 4294967232  ;;  %p9232_p12 = scmp.ne.s32.totalorder %s7935_s24, 0 }
 0x1c5   : > { %v4679_v0 = vld [vmem:[#allocation7] sm:$0xff] (!%p9232_p12)   ;;  %v7829_v1 = vmov (!%p9232_p12), 0.0|0.0   ;;  %vm7830_vm0 = vmmov (!%p9232_p12), 0   ;;  %v7831_v2 = vmov (!%p9232_p12), 0.0   ;;  %v4774_v3 = vld [vmem:[#allocation7 + $0x8] sm:$0xff] (!%p9232_p12)   ;;  %v4775_v4 = vld [vmem:[#allocation7 + $0x10] sm:$0xff] (!%p9232_p12)  }
 0x1c6   : > { %729 = sbr.rel (%p9232_p12) target bundleno = 2185 (0x889), region = 140  ;;  %4951 = vmatprep.subr.bf16.mxu0 (!%p9232_p12), %v7829_v1  ;;  %4878 = vmatprep.mubr.msk.f32.mxu0 (!%p9232_p12), %vm7830_vm0, %v7831_v2  ;;  %v4776_v5 = vld [vmem:[#allocation7 + $0x18] sm:$0xff] (!%p9232_p12)   ;;  %v4777_v6 = vld [vmem:[#allocation7 + $0x20] sm:$0xff] (!%p9232_p12)   ;;  %v4778_v7 = vld [vmem:[#allocation7 + $0x28] sm:$0xff] (!%p9232_p12)   ;;  %s9233_s8 = sld [smem:[#allocation42_spill]] (!%p9232_p12)  ;;  %vm1109_vm5 = vcmask (!%p9232_p12), 130048  }
 0x1c7   : > { %4953 = vmatpush3.bf16.msra.mxu0 (!%p9232_p12), %v4679_v0  ;;  %4975 = vmatprep.subr.bf16.mxu1 (!%p9232_p12), %v7829_v1  ;;  %v4779_v8 = vld [vmem:[#allocation7 + $0x30] sm:$0xff] (!%p9232_p12)   ;;  %v4780_v9 = vld [vmem:[#allocation7 + $0x38] sm:$0xff] (!%p9232_p12)   ;;  %v4711_v11 = vld [vmem:[#allocation10] sm:$0xff] (!%p9232_p12)   ;;  %s7832_s29 = smov (!%p9232_p12), 112  }
 0x1c8   : > { %4954 = vmatprep.subr.bf16.mxu0 (!%p9232_p12), %v7829_v1  ;;  %4913 = vmatprep.mubr.msk.f32.mxu1 (!%p9232_p12), %vm7830_vm0, %v7831_v2  ;;  %v8408_v10 = vld [vmem:[#allocation4] sm:$0xff] (!%p9232_p12)  ;;  %v4781_v12 = vld [vmem:[#allocation10 + $0x8] sm:$0xff] (!%p9232_p12)   ;;  %v4784_v15 = vld [vmem:[#allocation10 + $0x20] sm:$0xff] (!%p9232_p12)  }
 0x1c9   : > { %4977 = vmatpush3.bf16.msra.mxu1 (!%p9232_p12), %v4711_v11  ;;  %v4782_v13 = vld [vmem:[#allocation10 + $0x10] sm:$0xff] (!%p9232_p12)   ;;  %v4783_v14 = vld [vmem:[#allocation10 + $0x18] sm:$0xff] (!%p9232_p12)   ;;  %v4785_v16 = vld [vmem:[#allocation10 + $0x28] sm:$0xff] (!%p9232_p12)  }
 0x1ca   : > { %4978 = vmatprep.subr.bf16.mxu1 (!%p9232_p12), %v7829_v1  ;;  %v4786_v17 = vld [vmem:[#allocation10 + $0x30] sm:$0xff] (!%p9232_p12)   ;;  %v4787_v18 = vld [vmem:[#allocation10 + $0x38] sm:$0xff] (!%p9232_p12)   ;;  %v4644_v46 = vld [vmem:[#allocation12] ss:$0 sm:$0xff] (!%p9232_p12) }
 0x1cb   : > { %4956 = vmatpush3.bf16.msra.mxu0 (!%p9232_p12), %v4774_v3  ;;  %v4643_v19 = vld [vmem:[#allocation9] ss:$0 sm:$0xff] (!%p9232_p12) }
 0x1cc   : > { %4957 = vmatprep.subr.bf16.mxu0 (!%p9232_p12), %v7829_v1  ;;  %v4743_v38 = vld [vmem:[%s9233_s8] sm:$0xff] (!%p9232_p12)   ;;  %v4788_v39 = vld [vmem:[%s9233_s8 + $0x8] sm:$0xff] (!%p9232_p12)   ;;  %v4789_v40 = vld [vmem:[%s9233_s8 + $0x10] sm:$0xff] (!%p9232_p12)  }
 0x1cd   : > { %4980 = vmatpush3.bf16.msra.mxu1 %v4781_v12  ;;  %v4790_v41 = vld [vmem:[%s9233_s8 + $0x18] sm:$0xff]   ;;  %v4791_v42 = vld [vmem:[%s9233_s8 + $0x20] sm:$0xff]   ;;  %v4792_v43 = vld [vmem:[%s9233_s8 + $0x28] sm:$0xff]  }
 0x1ce   : > { %4981 = vmatprep.subr.bf16.mxu1 %v7829_v1  ;;  %v4793_v44 = vld [vmem:[%s9233_s8 + $0x30] sm:$0xff]   ;;  %v4794_v45 = vld [vmem:[%s9233_s8 + $0x38] sm:$0xff]  }
 0x1cf   : > { %4959 = vmatpush3.bf16.msra.mxu0 %v4775_v4  ;;  %v4646_v4 = vld [vmem:[#allocation13 + $0x1] ss:$0 sm:$0xff]  ;;  %v1099_v12 = vld [vmem:[#allocation15] sm:$0xff] }
 0x1d0   : > { %4960 = vmatprep.subr.bf16.mxu0 %v7829_v1 }
 0x1d1   : > { %4983 = vmatpush3.bf16.msra.mxu1 %v4782_v13 }
 0x1d2   : > { %4984 = vmatprep.subr.bf16.mxu1 %v7829_v1 }
 0x1d3   : > { %4962 = vmatpush3.bf16.msra.mxu0 %v4776_v5 }
 0x1d4   : > { %4963 = vmatprep.subr.bf16.mxu0 %v7829_v1 }
 0x1d5   : > { %4986 = vmatpush3.bf16.msra.mxu1 %v4783_v14 }
 0x1d6   : > { %4987 = vmatprep.subr.bf16.mxu1 %v7829_v1 }
 0x1d7   : > { %4965 = vmatpush3.bf16.msra.mxu0 %v4777_v6 }
 0x1d8   : > { %4966 = vmatprep.subr.bf16.mxu0 %v7829_v1 }
 0x1d9   : > { %4989 = vmatpush3.bf16.msra.mxu1 %v4784_v15 }
 0x1da   : > { %4990 = vmatprep.subr.bf16.mxu1 %v7829_v1 }
 0x1db   : > { %4968 = vmatpush3.bf16.msra.mxu0 %v4778_v7 }
 0x1dc   : > { %4969 = vmatprep.subr.bf16.mxu0 %v7829_v1 }
 0x1dd   : > { %4992 = vmatpush3.bf16.msra.mxu1 %v4785_v16 }
 0x1de   : > { %4993 = vmatprep.subr.bf16.mxu1 %v7829_v1 }
 0x1df   : > { %4971 = vmatpush3.bf16.msra.mxu0 %v4779_v8 }
 0x1e0   : > { %4972 = vmatprep.subr.bf16.mxu0 %v7829_v1 }
 0x1e1   : > { %4995 = vmatpush3.bf16.msra.mxu1 %v4786_v17 }
 0x1e2   : > { %4996 = vmatprep.subr.bf16.mxu1 %v7829_v1 }
 0x1e3   : > { %4974 = vmatpush3.bf16.msra.mxu0 %v4780_v9 }
 0x1e4   : > { %4999 = vmatprep.subr.bf16.mxu0 %v7829_v1 }
 0x1e5   : > { %4998 = vmatpush3.bf16.msra.mxu1 %v4787_v18 }
 0x1e6   : > { %4879 = vmatmul.mubr.f32.vlgmr.msra.gmra.mrb[0].mxu0 %v8408_v10 }
 0x1e7   : > { %4948 = vmatprep.mubr.msk.f32.mxu0 %vm7830_vm0, %v7831_v2  ;;  %5001 = vmatpush3.bf16.msra.mxu0 %v4743_v38  ;;  %v6825_v38 = vld [vmem:[#allocation24 + $0x64] ss:$8 sps:$4 sm:$0xff]  }
 0x1e8   : > { %5002 = vmatprep.subr.bf16.mxu0 %v7829_v1 }
 0x1eb   : > { %5004 = vmatpush3.bf16.msra.mxu0 %v4788_v39  ;;  %v6827_v39 = vld [vmem:[#allocation24 + $0x60] ss:$8 sps:$4 sm:$0xff]  }
 0x1ec   : > { %5005 = vmatprep.subr.bf16.mxu0 %v7829_v1 }
 0x1ef   : > { %5007 = vmatpush3.bf16.msra.mxu0 %v4789_v40  ;;  %v6828_v40 = vld [vmem:[#allocation24 + $0x74] ss:$8 sps:$4 sm:$0xff]  }
 0x1f0   : > { %5008 = vmatprep.subr.bf16.mxu0 %v7829_v1 }
 0x1f3   : > { %5010 = vmatpush3.bf16.msra.mxu0 %v4790_v41  ;;  %v6830_v41 = vld [vmem:[#allocation24 + $0x70] ss:$8 sps:$4 sm:$0xff]  }
 0x1f4   : > { %5011 = vmatprep.subr.bf16.mxu0 %v7829_v1 }
 0x1f7   : > { %5013 = vmatpush3.bf16.msra.mxu0 %v4791_v42  ;;  %v1203_v42 = vlaneseq }
 0x1f8   : > { %5014 = vmatprep.subr.bf16.mxu0 %v7829_v1 }
 0x1fb   : > { %5016 = vmatpush3.bf16.msra.mxu0 %v4792_v43  ;;  %v1204_v43 = vshrl.u32 %v1203_v42, 7 }
 0x1fc   : > { %5017 = vmatprep.subr.bf16.mxu0 %v7829_v1 }
 0x1ff   : > { %5019 = vmatpush3.bf16.msra.mxu0 %v4793_v44  ;;  %v1205_v44 = vsub.s32 0, %v1204_v43 }
 0x200   : > { %5020 = vmatprep.subr.bf16.mxu0 %v7829_v1  ;;  %v4645_v1 = vld [vmem:[#allocation13] ss:$0 sm:$0xff] }
 0x203   : > { %5022 = vmatpush3.bf16.msra.mxu0 %v4794_v45  ;;  %v1201_v45 = vld [vmem:[#allocation18] ss:$2 sm:$0x3] }
 0x2b9   : > { %v836_v20 = vpop.f32.mrb[0].mxu0 }
 0x2ba   : > { %v837_v21 = vadd.f32 %v4643_v19, %v836_v20  ;;  %v4880_v22 = vpop.f32.mrb[1].mxu0 }
 0x2bb   : > { %v6804_v22 = vld [vmem:[#allocation16 + $0x4] ss:$8 sps:$4 sm:$0xff]  }
 0x2bc   : > { %v843_v23 = vand.u32 2147483647, %v837_v21  ;;  %v840_v34 = vmax.f32 %v837_v21, 0.0  ;;  %vm841_vm2 = vcmp.ne.f32.partialorder %v837_v21, %v837_v21  ;;  %5024 = vmatprep.subr.bf16.mxu1 %v6804_v22 }
 0x2be   : > { %v844_v24 = vsub.f32 0.0, %v843_v23  ;;  %v6806_v23 = vld [vmem:[#allocation16] ss:$8 sps:$4 sm:$0xff]  }
 0x2c0   : > { %v845_v25 = vmul.f32 1.442695, %v844_v24 }
 0x2c2   : > { %6831 = vpow2.f32 %v845_v25 }
 0x2cc   : > { %v6832_v26 = vpop.eup %6831 }
 0x2cd   : > { %v847_v27 = vadd.f32 1.0, %v6832_v26  ;;  %v850_v28 = vmul.f32 -0.5, %v6832_v26  ;;  %v853_v30 = vand.u32 2147483647, %v6832_v26 }
 0x2cf   : > { %6833 = vlog2.f32 %v847_v27  ;;  %v851_v29 = vadd.f32 1.0, %v850_v28  ;;  %vm854_vm1 = vcmp.lt.f32.partialorder %v853_v30, 0.0004427343  ;;  %v6807_v27 = vld [vmem:[#allocation24 + $0x4] ss:$8 sps:$4 sm:$0xff]  }
 0x2d0   : > { %v6809_v28 = vld [vmem:[#allocation24] ss:$8 sps:$4 sm:$0xff]   ;;  %v6812_v30 = vld [vmem:[#allocation24 + $0x10] ss:$8 sps:$4 sm:$0xff]  }
 0x2d1   : > { %v852_v33 = vmul.f32 %v6832_v26, %v851_v29  ;;  %v6810_v29 = vld [vmem:[#allocation24 + $0x14] ss:$8 sps:$4 sm:$0xff]  }
 0x2d9   : > { %v6834_v31 = vpop.eup %6833 }
 0x2da   : > { %v849_v32 = vmul.f32 0.6931472, %v6834_v31  ;;  %v6813_v31 = vld [vmem:[#allocation24 + $0x24] ss:$8 sps:$4 sm:$0xff]  }
 0x2dc   : > { %v855_v35 = vsel %vm854_vm1, %v852_v33, %v849_v32  ;;  %v6815_v32 = vld [vmem:[#allocation24 + $0x20] ss:$8 sps:$4 sm:$0xff]   ;;  %v6816_v33 = vld [vmem:[#allocation24 + $0x34] ss:$8 sps:$4 sm:$0xff]  }
 0x2dd   : > { %v856_v36 = vadd.f32 %v855_v35, %v840_v34  ;;  %v6818_v34 = vld [vmem:[#allocation24 + $0x30] ss:$8 sps:$4 sm:$0xff]   ;;  %v6819_v35 = vld [vmem:[#allocation24 + $0x44] ss:$8 sps:$4 sm:$0xff]  }
 0x2df   : > { %v857_v37 = vsel %vm841_vm2, %v837_v21, %v856_v36  ;;  %v6821_v36 = vld [vmem:[#allocation24 + $0x40] ss:$8 sps:$4 sm:$0xff]  }
 0x2e0   : > { %4914 = vmatmul.mubr.f32.vlgmr.msra.gmra.mrb[0].mxu1 %v857_v37  ;;  %v6824_v37 = vld [vmem:[#allocation24 + $0x50] ss:$8 sps:$4 sm:$0xff]  }
 0x2e1   : > { %1194 = vmatprep.mubr.f32.mxu1 %v7831_v2  ;;  %5026 = vmatpush1.bf16.msra.mxu1 %v6806_v23 }
 0x2e2   : > { %5028 = vmatprep.subr.bf16.mxu1 %v6807_v27 }
 0x3b3   : > { %v963_v47 = vpop.f32.mrb[0].mxu1 }
 0x3b4   : > { %v964_v48 = vadd.f32 %v4644_v46, %v963_v47  ;;  %v4915_v49 = vpop.f32.mrb[1].mxu1  ;;  %v1209_v46 = vsub.s32 1, %v1204_v43  ;;  %v1216_v47 = vld [vmem:[#allocation18 + $0x1] ss:$2 sm:$0x3] }
 0x3b6   : > { %v970_v50 = vand.u32 2147483647, %v964_v48  ;;  %v967_v61 = vmax.f32 %v964_v48, 0.0  ;;  %vm968_vm4 = vcmp.ne.f32.partialorder %v964_v48, %v964_v48  ;;  %v1210_v49 = vrot.slane %v1201_v45, %v1209_v46 }
 0x3b8   : > { %v971_v51 = vsub.f32 0.0, %v970_v50  ;;  %v1221_v50 = vrot.slane %v1216_v47, %v1205_v44 }
 0x3ba   : > { %v972_v52 = vmul.f32 1.442695, %v971_v51 }
 0x3bc   : > { %6835 = vpow2.f32 %v972_v52  ;;  %v1225_v52 = vrot.slane %v1216_v47, %v1209_v46 }
 0x3c6   : > { %v6836_v53 = vpop.eup %6835 }
 0x3c7   : > { %v974_v54 = vadd.f32 1.0, %v6836_v53  ;;  %v977_v55 = vmul.f32 -0.5, %v6836_v53  ;;  %v980_v57 = vand.u32 2147483647, %v6836_v53 }
 0x3c9   : > { %6837 = vlog2.f32 %v974_v54  ;;  %v978_v56 = vadd.f32 1.0, %v977_v55  ;;  %vm981_vm3 = vcmp.lt.f32.partialorder %v980_v57, 0.0004427343 }
 0x3cb   : > { %v979_v60 = vmul.f32 %v6836_v53, %v978_v56 }
 0x3d3   : > { %v6838_v58 = vpop.eup %6837 }
 0x3d4   : > { %v976_v59 = vmul.f32 0.6931472, %v6838_v58 }
 0x3d6   : > { %v982_v62 = vsel %vm981_vm3, %v979_v60, %v976_v59 }
 0x3d7   : > { %v983_v63 = vadd.f32 %v982_v62, %v967_v61 }
 0x3d9   : > { %v984_v0 = vsel %vm968_vm4, %v964_v48, %v983_v63  ;;  %v1206_v48 = vrot.slane %v1201_v45, %v1205_v44 }
 0x3da   : > { %4949 = vmatmul.mubr.f32.vlgmr.msra.gmra.mrb[2].mxu0 %v984_v0 }
 0x4ad   : > { %v1083_v3 = vpop.f32.mrb[2].mxu0 }
 0x4ae   : > { %v1092_v5 = vmul.f32 %v4645_v1, %v1083_v3  ;;  %v4950_v6 = vpop.f32.mrb[3].mxu0 }
 0x4b0   : > { %v1098_v7 = vadd.f32 %v4646_v4, %v1092_v5 }
 0x4b2   : > { %v1100_v8 = vmul.f32 0.5, %v1098_v7 }
 0x4b4   : > { %v1101_v9 = vmul.f32 1.442695, %v1100_v8 }
 0x4b6   : > { %6839 = vpow2.f32 %v1101_v9 }
 0x4c0   : > { %v6840_v11 = vpop.eup %6839 }
 0x4c1   : > { %1104 = vrot.lane.b32.xlu0 %v6840_v11, %s7832_s29 }
 0x533   : > { %v1105_v13 = vpop.permute.xlu0 %1104 }
 0x534   : > { %v1107_v14 = vmul.f32 %v1105_v13, %v1099_v12 }
 0x536   : > { %v1108_v15 = vadd.f32 %v1107_v14, %v1098_v7 }
 0x538   : > { %v1110_v16 = vsel %vm1109_vm5, %v1108_v15, -inf }
 0x539   : > { %1111 = vmax.xlane.f32.xlu0 %v1110_v16 }
 0x5c6   : > { %v1112_v17 = vpop.xlane.xlu0 %1111 }
 0x5c7   : > { %v1113_v18 = vsub.f32 %v1108_v15, %v1112_v17 }
 0x5c9   : > { %v1114_v19 = vmul.f32 1.442695, %v1113_v18 }
 0x5cb   : > { %6841 = vpow2.f32 %v1114_v19 }
 0x5d5   : > { %v6842_v20 = vpop.eup %6841 }
 0x5d6   : > { %v1116_v21 = vsel %vm1109_vm5, %v6842_v20, 0.0 }
 0x5d7   : > { %1117 = vadd.xlane.f32.xlu1 %v1116_v21 }
 0x664   : > { %v1118_v24 = vpop.xlane.xlu1 %1117 }
 0x665   : > { %6843 = vrcp.f32 %v1118_v24 }
 0x66f   : > { %v6844_v25 = vpop.eup %6843 }
 0x670   : > { %v1120_v26 = vmul.f32 %v6844_v25, %v6842_v20 }
 0x672   : > { %4647 = vmatmul.mubr.msk.f32.vlgmr.msra.gmra.mrb[2].mxu1 %vm1109_vm5, %v1120_v26 }
 0x673   : > { %1359 = vmatprep.mubr.f32.mxu1 %v7831_v2  ;;  %5030 = vmatpush1.bf16.msra.mxu1 %v6809_v28  ;;  %v6822_v2 = vld [vmem:[#allocation24 + $0x54] ss:$8 sps:$4 sm:$0xff]  }
 0x674   : > { %5032 = vmatprep.subr.bf16.mxu1 %v6810_v29 }
 0x677   : > { %5034 = vmatpush1.bf16.msra.mxu1 %v6812_v30 }
 0x678   : > { %5036 = vmatprep.subr.bf16.mxu1 %v6813_v31 }
 0x67b   : > { %5038 = vmatpush1.bf16.msra.mxu1 %v6815_v32 }
 0x67c   : > { %5040 = vmatprep.subr.bf16.mxu1 %v6816_v33 }
 0x67f   : > { %5042 = vmatpush1.bf16.msra.mxu1 %v6818_v34 }
 0x680   : > { %5044 = vmatprep.subr.bf16.mxu1 %v6819_v35 }
 0x683   : > { %5046 = vmatpush1.bf16.msra.mxu1 %v6821_v36 }
 0x684   : > { %5048 = vmatprep.subr.bf16.mxu1 %v6822_v2 }
 0x687   : > { %5050 = vmatpush1.bf16.msra.mxu1 %v6824_v37 }
 0x688   : > { %5052 = vmatprep.subr.bf16.mxu1 %v6825_v38 }
 0x68b   : > { %5054 = vmatpush1.bf16.msra.mxu1 %v6827_v39 }
 0x68c   : > { %5056 = vmatprep.subr.bf16.mxu1 %v6828_v40 }
 0x68f   : > { %5058 = vmatpush1.bf16.msra.mxu1 %v6830_v41 }
 0x692   : > { %1360 = vmatmul.mubr.f32.vlgmr.msra.gmra.mrb[4].mxu1 %v8408_v10 }
 0x745   : > { %v1196_v51 = vpop.f32.mrb[2].mxu1 }
 0x746   : > { %v1213_v53 = vmul.f32 %v1206_v48, %v1196_v51  ;;  %v1198_v54 = vpop.f32.mrb[3].mxu1 }
 0x747   : > { %v1214_v55 = vmul.f32 %v1210_v49, %v1198_v54 }
 0x748   : > { %v1228_v56 = vadd.f32 %v1221_v50, %v1213_v53 }
 0x749   : > { %v1229_v57 = vadd.f32 %v1225_v52, %v1214_v55 }
 0x74b   : > { %v1230_v58 = vmax.f32 %v1228_v56, %v1229_v57 }
 0x74d   : > { %1231 = vmax.xlane.f32.xlu1 %v1230_v58 }
 0x765   : > { %v1361_v3 = vpop.f32.mrb[4].mxu1 }
 0x766   : > { %1366 = vst [vmem:[#allocation3] sm:$0xff] %v1361_v3  ;;  %v1363_v4 = vpop.f32.mrb[5].mxu1 }
 0x767   : > { %1367 = vst [vmem:[#allocation3 + $0x8] sm:$0xff] %v1363_v4 }
 0x7da   : > { %v1232_v59 = vpop.xlane.xlu1 %1231 }
 0x7db   : > { %v1233_v10 = vsub.f32 %v1228_v56, %v1232_v59  ;;  %v1234_v60 = vsub.f32 %v1229_v57, %v1232_v59 }
 0x7dd   : > { %v1235_v61 = vmul.f32 1.442695, %v1233_v10  ;;  %v1237_v62 = vmul.f32 1.442695, %v1234_v60 }
 0x7df   : > { %6845 = vpow2.f32 %v1235_v61 }
 0x7e0   : > { %6847 = vpow2.f32 %v1237_v62 }
 0x7e9   : > { %v6846_v63 = vpop.eup %6845 }
 0x7ea   : > { %v6848_v0 = vpop.eup %6847 }
 0x7eb   : > { %v1239_v1 = vadd.f32 %v6848_v0, %v6846_v63 }
 0x7ed   : > { %1240 = vadd.xlane.f32.xlu1 %v1239_v1 }
 0x87a   : > { %v1241_v5 = vpop.xlane.xlu1 %1240 }
 0x87b   : > { %6849 = vrcp.f32 %v1241_v5 }
 0x885   : > { %v6850_v6 = vpop.eup %6849 }
 0x886   : > { %v1243_v7 = vmul.f32 %v6850_v6, %v6846_v63  ;;  %v1244_v8 = vmul.f32 %v6850_v6, %v6848_v0 }
 0x888   : > { %1245 = vst [vmem:[#allocation2] sm:$0xff] %v1243_v7  ;;  %1246 = vst [vmem:[#allocation2 + $0x8] sm:$0xff] %v1244_v8 }
 0x889 PF: > { %v1370_v9 = vld [vmem:[%s8371_s14] sm:$0xff]  ;;  %v1371_v8 = vld [vmem:[%s8371_s14 + $0x8] sm:$0xff]  ;;  %p4667_p4 = scmp.ne.s32.totalorder %s7935_s24, 1 }
 0x88a   : > { %v1378_v11 = vld [vmem:[%s8371_s14 + $0x40] sm:$0xff] }
 0x88b   : > { %v1386_v12 = vld [vmem:[%s8371_s14 + $0x80] sm:$0xff]  ;;  %v6115_v13 = vcombine.high %v1370_v9, %v1378_v11  ;;  %v6116_v14 = vcombine.low %v1370_v9, %v1378_v11  ;;  %v1379_v9 = vld [vmem:[%s8371_s14 + $0x48] sm:$0xff] }
 0x88c   : > { %v1394_v15 = vld [vmem:[%s8371_s14 + $0xc0] sm:$0xff] }
 0x88d   : > { %v6117_v16 = vcombine.high %v1386_v12, %v1394_v15  ;;  %v1402_v17 = vld [vmem:[%s8371_s14 + $0x100] sm:$0xff]  ;;  %5060 = vmatprep.subr.bf16.mxu1 %v6115_v13  ;;  %v6118_v19 = vcombine.low %v1386_v12, %v1394_v15  ;;  %v1387_v13 = vld [vmem:[%s8371_s14 + $0x88] sm:$0xff]  ;;  %v6147_v15 = vcombine.high %v1371_v8, %v1379_v9 }
 0x88e   : > { %v1410_v18 = vld [vmem:[%s8371_s14 + $0x140] sm:$0xff]  ;;  %5062 = vmatpush1.bf16.msra.mxu1 %v6116_v14  ;;  %v1395_v14 = vld [vmem:[%s8371_s14 + $0xc8] sm:$0xff] }
 0x88f   : > { %5064 = vmatprep.subr.bf16.mxu1 %v6117_v16  ;;  %v6119_v20 = vcombine.high %v1402_v17, %v1410_v18  ;;  %v1418_v21 = vld [vmem:[%s8371_s14 + $0x180] sm:$0xff]  ;;  %v6120_v23 = vcombine.low %v1402_v17, %v1410_v18  ;;  %v8497_v16 = vld [vmem:[#allocation2] sm:$0xff]  ;;  %v6148_v17 = vcombine.low %v1371_v8, %v1379_v9  ;;  %v1403_v18 = vld [vmem:[%s8371_s14 + $0x108] sm:$0xff] }
 0x890   : > { %v1426_v22 = vld [vmem:[%s8371_s14 + $0x1c0] sm:$0xff] }
 0x891   : > { %v6121_v24 = vcombine.high %v1418_v21, %v1426_v22  ;;  %v1434_v25 = vld [vmem:[%s8371_s14 + $0x200] sm:$0xff]  ;;  %v6122_v28 = vcombine.low %v1418_v21, %v1426_v22  ;;  %v6150_v21 = vcombine.low %v1387_v13, %v1395_v14  ;;  %v1419_v22 = vld [vmem:[%s8371_s14 + $0x188] sm:$0xff] }
 0x892   : > { %5066 = vmatpush1.bf16.msra.mxu1 %v6118_v19  ;;  %v1442_v26 = vld [vmem:[%s8371_s14 + $0x240] sm:$0xff]  ;;  %v1411_v19 = vld [vmem:[%s8371_s14 + $0x148] sm:$0xff] }
 0x893   : > { %5068 = vmatprep.subr.bf16.mxu1 %v6119_v20  ;;  %v8468_v27 = vld [vmem:[#allocation2 + $0x8] sm:$0xff]  ;;  %v6123_v29 = vcombine.high %v1434_v25, %v1442_v26  ;;  %v6124_v32 = vcombine.low %v1434_v25, %v1442_v26  ;;  %v6149_v20 = vcombine.high %v1387_v13, %v1395_v14  ;;  %v6152_v25 = vcombine.low %v1403_v18, %v1411_v19  ;;  %v1435_v26 = vld [vmem:[%s8371_s14 + $0x208] sm:$0xff]  ;;  %v1372_v13 = vld [vmem:[%s8371_s14 + $0x10] sm:$0xff] }
 0x894   : > { %2202 = vmatprep.mubr.f32.mxu1 %v8468_v27  ;;  %v1450_v30 = vld [vmem:[%s8371_s14 + $0x280] sm:$0xff]  ;;  %v1380_v14 = vld [vmem:[%s8371_s14 + $0x50] sm:$0xff] }
 0x895   : > { %v1458_v31 = vld [vmem:[%s8371_s14 + $0x2c0] sm:$0xff] }
 0x896   : > { %5070 = vmatpush1.bf16.msra.mxu1 %v6120_v23  ;;  %v6125_v33 = vcombine.high %v1450_v30, %v1458_v31  ;;  %v1466_v34 = vld [vmem:[%s8371_s14 + $0x300] sm:$0xff]  ;;  %v6126_v36 = vcombine.low %v1450_v30, %v1458_v31  ;;  %v1427_v23 = vld [vmem:[%s8371_s14 + $0x1c8] sm:$0xff] }
 0x897   : > { %5072 = vmatprep.subr.bf16.mxu1 %v6121_v24  ;;  %v1474_v35 = vld [vmem:[%s8371_s14 + $0x340] sm:$0xff]  ;;  %v6151_v24 = vcombine.high %v1403_v18, %v1411_v19  ;;  %v6154_v30 = vcombine.low %v1419_v22, %v1427_v23  ;;  %v1451_v31 = vld [vmem:[%s8371_s14 + $0x288] sm:$0xff]  ;;  %v6856_v18 = vld [vmem:[%s8379_s25 + $0x10] ss:$8 sps:$4 sm:$0xff]  }
 0x898   : > { %v6127_v2 = vcombine.high %v1466_v34, %v1474_v35  ;;  %v1482_v37 = vld [vmem:[%s8371_s14 + $0x380] sm:$0xff]  ;;  %v6128_v39 = vcombine.low %v1466_v34, %v1474_v35  ;;  %v1467_v35 = vld [vmem:[%s8371_s14 + $0x308] sm:$0xff] }
 0x899   : > { %v1490_v38 = vld [vmem:[%s8371_s14 + $0x3c0] sm:$0xff] }
 0x89a   : > { %5074 = vmatpush1.bf16.msra.mxu1 %v6122_v28  ;;  %v6129_v40 = vcombine.high %v1482_v37, %v1490_v38  ;;  %v1498_v41 = vld [vmem:[%s8371_s14 + $0x400] sm:$0xff]  ;;  %v6130_v43 = vcombine.low %v1482_v37, %v1490_v38  ;;  %v1443_v28 = vld [vmem:[%s8371_s14 + $0x248] sm:$0xff] }
 0x89b   : > { %5076 = vmatprep.subr.bf16.mxu1 %v6123_v29  ;;  %v1506_v42 = vld [vmem:[%s8371_s14 + $0x440] sm:$0xff]  ;;  %v6153_v29 = vcombine.high %v1419_v22, %v1427_v23  ;;  %v6156_v34 = vcombine.low %v1435_v26, %v1443_v28  ;;  %v1483_v38 = vld [vmem:[%s8371_s14 + $0x388] sm:$0xff]  ;;  %v6179_v22 = vcombine.high %v1372_v13, %v1380_v14 }
 0x89c   : > { %v1514_v44 = vld [vmem:[%s8371_s14 + $0x480] sm:$0xff]  ;;  %v6131_v46 = vcombine.high %v1498_v41, %v1506_v42  ;;  %v6132_v47 = vcombine.low %v1498_v41, %v1506_v42  ;;  %v1499_v42 = vld [vmem:[%s8371_s14 + $0x408] sm:$0xff] }
 0x89d   : > { %v1522_v45 = vld [vmem:[%s8371_s14 + $0x4c0] sm:$0xff] }
 0x89e   : > { %5078 = vmatpush1.bf16.msra.mxu1 %v6124_v32  ;;  %v1530_v48 = vld [vmem:[%s8371_s14 + $0x500] sm:$0xff]  ;;  %v6133_v50 = vcombine.high %v1514_v44, %v1522_v45  ;;  %v6134_v51 = vcombine.low %v1514_v44, %v1522_v45  ;;  %v1459_v32 = vld [vmem:[%s8371_s14 + $0x2c8] sm:$0xff] }
 0x89f   : > { %5080 = vmatprep.subr.bf16.mxu1 %v6125_v33  ;;  %v1538_v49 = vld [vmem:[%s8371_s14 + $0x540] sm:$0xff]  ;;  %v6155_v33 = vcombine.high %v1435_v26, %v1443_v28  ;;  %v6158_v37 = vcombine.low %v1451_v31, %v1459_v32  ;;  %v1404_v26 = vld [vmem:[%s8371_s14 + $0x110] sm:$0xff] }
 0x8a0   : > { %v1546_v52 = vld [vmem:[%s8371_s14 + $0x580] sm:$0xff]  ;;  %v6135_v54 = vcombine.high %v1530_v48, %v1538_v49  ;;  %v6136_v55 = vcombine.low %v1530_v48, %v1538_v49  ;;  %v1412_v28 = vld [vmem:[%s8371_s14 + $0x150] sm:$0xff] }
 0x8a1   : > { %v1554_v53 = vld [vmem:[%s8371_s14 + $0x5c0] sm:$0xff] }
 0x8a2   : > { %5082 = vmatpush1.bf16.msra.mxu1 %v6126_v36  ;;  %v1562_v56 = vld [vmem:[%s8371_s14 + $0x600] sm:$0xff]  ;;  %v6137_v58 = vcombine.high %v1546_v52, %v1554_v53  ;;  %v6138_v59 = vcombine.low %v1546_v52, %v1554_v53  ;;  %v1475_v36 = vld [vmem:[%s8371_s14 + $0x348] sm:$0xff] }
 0x8a3   : > { %5084 = vmatprep.subr.bf16.mxu1 %v6127_v2  ;;  %v1570_v57 = vld [vmem:[%s8371_s14 + $0x640] sm:$0xff]  ;;  %v6157_v2 = vcombine.high %v1451_v31, %v1459_v32  ;;  %v6160_v41 = vcombine.low %v1467_v35, %v1475_v36  ;;  %v6862_v31 = vld [vmem:[%s8379_s25 + $0x30] ss:$8 sps:$4 sm:$0xff]  }
 0x8a4   : > { %v1578_v10 = vld [vmem:[%s8371_s14 + $0x680] sm:$0xff]  ;;  %v6139_v61 = vcombine.high %v1562_v56, %v1570_v57  ;;  %v6140_v62 = vcombine.low %v1562_v56, %v1570_v57 }
 0x8a5   : > { %v1586_v60 = vld [vmem:[%s8371_s14 + $0x6c0] sm:$0xff] }
 0x8a6   : > { %5086 = vmatpush1.bf16.msra.mxu1 %v6128_v39  ;;  %v1594_v63 = vld [vmem:[%s8371_s14 + $0x700] sm:$0xff]  ;;  %v6141_v1 = vcombine.high %v1578_v10, %v1586_v60  ;;  %v6142_v3 = vcombine.low %v1578_v10, %v1586_v60  ;;  %v1491_v39 = vld [vmem:[%s8371_s14 + $0x3c8] sm:$0xff] }
 0x8a7   : > { %5088 = vmatprep.subr.bf16.mxu1 %v6129_v40  ;;  %v1602_v0 = vld [vmem:[%s8371_s14 + $0x740] sm:$0xff]  ;;  %v6159_v40 = vcombine.high %v1467_v35, %v1475_v36  ;;  %v6161_v44 = vcombine.high %v1483_v38, %v1491_v39  ;;  %v6162_v45 = vcombine.low %v1483_v38, %v1491_v39  ;;  %v1420_v35 = vld [vmem:[%s8371_s14 + $0x190] sm:$0xff] }
 0x8a8   : > { %v1610_v4 = vld [vmem:[%s8371_s14 + $0x780] sm:$0xff]  ;;  %v6143_v6 = vcombine.high %v1594_v63, %v1602_v0  ;;  %v6144_v7 = vcombine.low %v1594_v63, %v1602_v0  ;;  %v1428_v36 = vld [vmem:[%s8371_s14 + $0x1d0] sm:$0xff] }
 0x8a9   : > { %v1618_v5 = vld [vmem:[%s8371_s14 + $0x7c0] sm:$0xff]  ;;  %v6185_v38 = vcombine.high %v1420_v35, %v1428_v36  ;;  %v1436_v39 = vld [vmem:[%s8371_s14 + $0x210] sm:$0xff] }
 0x8aa   : > { %5090 = vmatpush1.bf16.msra.mxu1 %v6130_v43  ;;  %v6145_v11 = vcombine.high %v1610_v4, %v1618_v5  ;;  %v6146_v12 = vcombine.low %v1610_v4, %v1618_v5  ;;  %v1507_v43 = vld [vmem:[%s8371_s14 + $0x448] sm:$0xff] }
 0x8ab   : > { %5092 = vmatprep.subr.bf16.mxu1 %v6131_v46  ;;  %v1515_v46 = vld [vmem:[%s8371_s14 + $0x488] sm:$0xff]  ;;  %v6163_v48 = vcombine.high %v1499_v42, %v1507_v43  ;;  %v6164_v49 = vcombine.low %v1499_v42, %v1507_v43  ;;  %v6186_v42 = vcombine.low %v1420_v35, %v1428_v36 }
 0x8ac   : > { %v6851_v9 = vld [vmem:[%s8379_s25 + $0x4] ss:$8 sps:$4 sm:$0xff]  }
 0x8ad   : > { %5572 = vmatprep.subr.bf16.mxu0 %v6851_v9  ;;  %v6857_v23 = vld [vmem:[%s8379_s25 + $0x24] ss:$8 sps:$4 sm:$0xff]  }
 0x8ae   : > { %5094 = vmatpush1.bf16.msra.mxu1 %v6132_v47  ;;  %v1523_v47 = vld [vmem:[%s8371_s14 + $0x4c8] sm:$0xff] }
 0x8af   : > { %5096 = vmatprep.subr.bf16.mxu1 %v6133_v50  ;;  %v1531_v50 = vld [vmem:[%s8371_s14 + $0x508] sm:$0xff]  ;;  %v6165_v52 = vcombine.high %v1515_v46, %v1523_v47  ;;  %v6166_v53 = vcombine.low %v1515_v46, %v1523_v47  ;;  %v1460_v46 = vld [vmem:[%s8371_s14 + $0x2d0] sm:$0xff] }
 0x8b0   : > { %v6871_v47 = vld [vmem:[%s8379_s25 + $0x60] ss:$8 sps:$4 sm:$0xff]  }
 0x8b2   : > { %5098 = vmatpush1.bf16.msra.mxu1 %v6134_v51  ;;  %v1539_v51 = vld [vmem:[%s8371_s14 + $0x548] sm:$0xff] }
 0x8b3   : > { %5100 = vmatprep.subr.bf16.mxu1 %v6135_v54  ;;  %v1547_v54 = vld [vmem:[%s8371_s14 + $0x588] sm:$0xff]  ;;  %v6167_v56 = vcombine.high %v1531_v50, %v1539_v51  ;;  %v6168_v57 = vcombine.low %v1531_v50, %v1539_v51  ;;  %v6872_v50 = vld [vmem:[%s8379_s25 + $0x74] ss:$8 sps:$4 sm:$0xff]  }
 0x8b4   : > { %v1468_v51 = vld [vmem:[%s8371_s14 + $0x310] sm:$0xff] }
 0x8b6   : > { %5102 = vmatpush1.bf16.msra.mxu1 %v6136_v55  ;;  %v1555_v55 = vld [vmem:[%s8371_s14 + $0x5c8] sm:$0xff] }
 0x8b7   : > { %5104 = vmatprep.subr.bf16.mxu1 %v6137_v58  ;;  %v1563_v58 = vld [vmem:[%s8371_s14 + $0x608] sm:$0xff]  ;;  %v6169_v10 = vcombine.high %v1547_v54, %v1555_v55  ;;  %v6170_v60 = vcombine.low %v1547_v54, %v1555_v55 }
 0x8ba   : > { %5106 = vmatpush1.bf16.msra.mxu1 %v6138_v59  ;;  %v1571_v59 = vld [vmem:[%s8371_s14 + $0x648] sm:$0xff] }
 0x8bb   : > { %5108 = vmatprep.subr.bf16.mxu1 %v6139_v61  ;;  %v1579_v61 = vld [vmem:[%s8371_s14 + $0x688] sm:$0xff]  ;;  %v6171_v63 = vcombine.high %v1563_v58, %v1571_v59  ;;  %v6172_v0 = vcombine.low %v1563_v58, %v1571_v59  ;;  %v1492_v58 = vld [vmem:[%s8371_s14 + $0x3d0] sm:$0xff] }
 0x8bc   : > { %v6877_v59 = vld [vmem:[%s8379_s25 + $0x80] ss:$8 sps:$4 sm:$0xff]  }
 0x8be   : > { %5110 = vmatpush1.bf16.msra.mxu1 %v6140_v62  ;;  %v1587_v62 = vld [vmem:[%s8371_s14 + $0x6c8] sm:$0xff] }
 0x8bf   : > { %5112 = vmatprep.subr.bf16.mxu1 %v6141_v1  ;;  %v1595_v1 = vld [vmem:[%s8371_s14 + $0x708] sm:$0xff]  ;;  %v6173_v4 = vcombine.high %v1579_v61, %v1587_v62  ;;  %v6174_v5 = vcombine.low %v1579_v61, %v1587_v62  ;;  %v6878_v61 = vld [vmem:[%s8379_s25 + $0x94] ss:$8 sps:$4 sm:$0xff]  }
 0x8c0   : > { %v1500_v62 = vld [vmem:[%s8371_s14 + $0x410] sm:$0xff] }
 0x8c2   : > { %5114 = vmatpush1.bf16.msra.mxu1 %v6142_v3  ;;  %v1603_v3 = vld [vmem:[%s8371_s14 + $0x748] sm:$0xff] }
 0x8c3   : > { %5116 = vmatprep.subr.bf16.mxu1 %v6143_v6  ;;  %v1611_v6 = vld [vmem:[%s8371_s14 + $0x788] sm:$0xff]  ;;  %v6175_v8 = vcombine.high %v1595_v1, %v1603_v3 }
 0x8c6   : > { %5118 = vmatpush1.bf16.msra.mxu1 %v6144_v7  ;;  %v1619_v7 = vld [vmem:[%s8371_s14 + $0x7c8] sm:$0xff] }
 0x8c7   : > { %5120 = vmatprep.subr.bf16.mxu1 %v6145_v11  ;;  %v6853_v11 = vld [vmem:[%s8379_s25] ss:$8 sps:$4 sm:$0xff]   ;;  %v6178_v19 = vcombine.low %v1611_v6, %v1619_v7 }
 0x8c8   : > { %5574 = vmatpush1.bf16.msra.mxu0 %v6853_v11  ;;  %v6884_v11 = vld [vmem:[%s8379_s25 + $0xb4] ss:$8 sps:$4 sm:$0xff]  }
 0x8ca   : > { %5122 = vmatpush1.bf16.msra.mxu1 %v6146_v12  ;;  %v6176_v12 = vcombine.low %v1595_v1, %v1603_v3 }
 0x8cb   : > { %5124 = vmatprep.subr.bf16.mxu1 %v6147_v15  ;;  %v6177_v15 = vcombine.high %v1611_v6, %v1619_v7  ;;  %v1524_v6 = vld [vmem:[%s8371_s14 + $0x4d0] sm:$0xff]  ;;  %v6883_v7 = vld [vmem:[%s8379_s25 + $0xa0] ss:$8 sps:$4 sm:$0xff]  }
 0x8cd   : > { %2203 = vmatmul.mubr.f32.vlgmr.msra.gmra.mrb[0].mxu1 %v8497_v16 }
 0x8ce   : > { %5126 = vmatpush1.bf16.msra.mxu1 %v6148_v17  ;;  %2273 = vmatprep.mubr.f32.mxu1 %v8468_v27  ;;  %v6854_v17 = vld [vmem:[%s8379_s25 + $0x14] ss:$8 sps:$4 sm:$0xff]  }
 0x8cf   : > { %5128 = vmatprep.subr.bf16.mxu1 %v6149_v20  ;;  %5576 = vmatprep.subr.bf16.mxu0 %v6854_v17  ;;  %v1388_v20 = vld [vmem:[%s8371_s14 + $0x90] sm:$0xff] }
 0x8d0   : > { %5578 = vmatpush1.bf16.msra.mxu0 %v6856_v18  ;;  %v6887_v18 = vld [vmem:[%s8379_s25 + $0xc4] ss:$8 sps:$4 sm:$0xff]  }
 0x8d1   : > { %5580 = vmatprep.subr.bf16.mxu0 %v6857_v23 }
 0x8d2   : > { %5130 = vmatpush1.bf16.msra.mxu1 %v6150_v21  ;;  %v1396_v21 = vld [vmem:[%s8371_s14 + $0xd0] sm:$0xff] }
 0x8d3   : > { %5132 = vmatprep.subr.bf16.mxu1 %v6151_v24  ;;  %v6859_v24 = vld [vmem:[%s8379_s25 + $0x20] ss:$8 sps:$4 sm:$0xff]   ;;  %v6182_v32 = vcombine.low %v1388_v20, %v1396_v21 }
 0x8d4   : > { %5582 = vmatpush1.bf16.msra.mxu0 %v6859_v24  ;;  %v6890_v24 = vld [vmem:[%s8379_s25 + $0xd4] ss:$8 sps:$4 sm:$0xff]  }
 0x8d6   : > { %5134 = vmatpush1.bf16.msra.mxu1 %v6152_v25  ;;  %v6180_v25 = vcombine.low %v1372_v13, %v1380_v14  ;;  %v1540_v13 = vld [vmem:[%s8371_s14 + $0x550] sm:$0xff] }
 0x8d7   : > { %5136 = vmatprep.subr.bf16.mxu1 %v6153_v29  ;;  %v6181_v29 = vcombine.high %v1388_v20, %v1396_v21  ;;  %v6886_v14 = vld [vmem:[%s8379_s25 + $0xb0] ss:$8 sps:$4 sm:$0xff]   ;;  %v6889_v21 = vld [vmem:[%s8379_s25 + $0xc0] ss:$8 sps:$4 sm:$0xff]  }
 0x8d8   : > { %v1556_v20 = vld [vmem:[%s8371_s14 + $0x5d0] sm:$0xff] }
 0x8da   : > { %5138 = vmatpush1.bf16.msra.mxu1 %v6154_v30  ;;  %v6860_v30 = vld [vmem:[%s8379_s25 + $0x34] ss:$8 sps:$4 sm:$0xff]  }
 0x8db   : > { %5140 = vmatprep.subr.bf16.mxu1 %v6155_v33  ;;  %5584 = vmatprep.subr.bf16.mxu0 %v6860_v30  ;;  %v6183_v33 = vcombine.high %v1404_v26, %v1412_v28 }
 0x8dc   : > { %5586 = vmatpush1.bf16.msra.mxu0 %v6862_v31  ;;  %v6893_v31 = vld [vmem:[%s8379_s25 + $0xe4] ss:$8 sps:$4 sm:$0xff]  }
 0x8de   : > { %5142 = vmatpush1.bf16.msra.mxu1 %v6156_v34  ;;  %v6863_v34 = vld [vmem:[%s8379_s25 + $0x44] ss:$8 sps:$4 sm:$0xff]  }
 0x8df   : > { %5144 = vmatprep.subr.bf16.mxu1 %v6157_v2  ;;  %v6865_v2 = vld [vmem:[%s8379_s25 + $0x40] ss:$8 sps:$4 sm:$0xff]   ;;  %5588 = vmatprep.subr.bf16.mxu0 %v6863_v34 }
 0x8e0   : > { %5590 = vmatpush1.bf16.msra.mxu0 %v6865_v2  ;;  %v6895_v34 = vld [vmem:[%s8379_s25 + $0xe0] ss:$8 sps:$4 sm:$0xff]   ;;  %v6896_v2 = vld [vmem:[%s8379_s25 + $0xf4] ss:$8 sps:$4 sm:$0xff]  }
 0x8e2   : > { %5146 = vmatpush1.bf16.msra.mxu1 %v6158_v37  ;;  %v6184_v37 = vcombine.low %v1404_v26, %v1412_v28  ;;  %v1572_v26 = vld [vmem:[%s8371_s14 + $0x650] sm:$0xff] }
 0x8e3   : > { %5148 = vmatprep.subr.bf16.mxu1 %v6159_v40  ;;  %v1444_v40 = vld [vmem:[%s8371_s14 + $0x250] sm:$0xff] }
 0x8e4   : > { %v6187_v43 = vcombine.high %v1436_v39, %v1444_v40  ;;  %v6892_v28 = vld [vmem:[%s8379_s25 + $0xd0] ss:$8 sps:$4 sm:$0xff]  }
 0x8e6   : > { %5150 = vmatpush1.bf16.msra.mxu1 %v6160_v41  ;;  %v6868_v41 = vld [vmem:[%s8379_s25 + $0x50] ss:$8 sps:$4 sm:$0xff]  }
 0x8e7   : > { %5152 = vmatprep.subr.bf16.mxu1 %v6161_v44  ;;  %v6869_v44 = vld [vmem:[%s8379_s25 + $0x64] ss:$8 sps:$4 sm:$0xff]  }
 0x8ea   : > { %5154 = vmatpush1.bf16.msra.mxu1 %v6162_v45  ;;  %v1452_v45 = vld [vmem:[%s8371_s14 + $0x290] sm:$0xff] }
 0x8eb   : > { %5156 = vmatprep.subr.bf16.mxu1 %v6163_v48  ;;  %v6188_v48 = vcombine.low %v1436_v39, %v1444_v40  ;;  %v6190_v54 = vcombine.low %v1452_v45, %v1460_v46 }
 0x8ee   : > { %5158 = vmatpush1.bf16.msra.mxu1 %v6164_v49  ;;  %v6189_v49 = vcombine.high %v1452_v45, %v1460_v46  ;;  %v1373_v46 = vld [vmem:[%s8371_s14 + $0x18] sm:$0xff] }
 0x8ef   : > { %5160 = vmatprep.subr.bf16.mxu1 %v6165_v52  ;;  %v1476_v52 = vld [vmem:[%s8371_s14 + $0x350] sm:$0xff] }
 0x8f0   : > { %v6191_v55 = vcombine.high %v1468_v51, %v1476_v52 }
 0x8f2   : > { %5162 = vmatpush1.bf16.msra.mxu1 %v6166_v53  ;;  %v6874_v53 = vld [vmem:[%s8379_s25 + $0x70] ss:$8 sps:$4 sm:$0xff]  }
 0x8f3   : > { %5164 = vmatprep.subr.bf16.mxu1 %v6167_v56  ;;  %v6875_v56 = vld [vmem:[%s8379_s25 + $0x84] ss:$8 sps:$4 sm:$0xff]  }
 0x8f6   : > { %5166 = vmatpush1.bf16.msra.mxu1 %v6168_v57  ;;  %v1484_v57 = vld [vmem:[%s8371_s14 + $0x390] sm:$0xff] }
 0x8f7   : > { %5168 = vmatprep.subr.bf16.mxu1 %v6169_v10  ;;  %v6192_v10 = vcombine.low %v1468_v51, %v1476_v52  ;;  %v6194_v1 = vcombine.low %v1484_v57, %v1492_v58  ;;  %v1397_v51 = vld [vmem:[%s8371_s14 + $0xd8] sm:$0xff] }
 0x8fa   : > { %5170 = vmatpush1.bf16.msra.mxu1 %v6170_v60  ;;  %v6193_v60 = vcombine.high %v1484_v57, %v1492_v58  ;;  %v8603_v57 = vld [vmem:[#allocation2 + $0x8] sm:$0xff] }
 0x8fb   : > { %5172 = vmatprep.subr.bf16.mxu1 %v6171_v63  ;;  %v1508_v63 = vld [vmem:[%s8371_s14 + $0x450] sm:$0xff] }
 0x8fc   : > { %v6195_v3 = vcombine.high %v1500_v62, %v1508_v63 }
 0x8fe   : > { %5174 = vmatpush1.bf16.msra.mxu1 %v6172_v0  ;;  %v6880_v0 = vld [vmem:[%s8379_s25 + $0x90] ss:$8 sps:$4 sm:$0xff]  }
 0x8ff   : > { %5176 = vmatprep.subr.bf16.mxu1 %v6173_v4  ;;  %v6881_v4 = vld [vmem:[%s8379_s25 + $0xa4] ss:$8 sps:$4 sm:$0xff]  }
 0x902   : > { %5178 = vmatpush1.bf16.msra.mxu1 %v6174_v5  ;;  %v1516_v5 = vld [vmem:[%s8371_s14 + $0x490] sm:$0xff] }
 0x903   : > { %5180 = vmatprep.subr.bf16.mxu1 %v6175_v8  ;;  %v6196_v8 = vcombine.low %v1500_v62, %v1508_v63  ;;  %v6197_v9 = vcombine.high %v1516_v5, %v1524_v6  ;;  %v1437_v62 = vld [vmem:[%s8371_s14 + $0x218] sm:$0xff] }
 0x906   : > { %5182 = vmatpush1.bf16.msra.mxu1 %v6176_v12  ;;  %v1532_v12 = vld [vmem:[%s8371_s14 + $0x510] sm:$0xff] }
 0x907   : > { %5184 = vmatprep.subr.bf16.mxu1 %v6177_v15  ;;  %v6198_v15 = vcombine.low %v1516_v5, %v1524_v6  ;;  %v6199_v17 = vcombine.high %v1532_v12, %v1540_v13  ;;  %v1469_v6 = vld [vmem:[%s8371_s14 + $0x318] sm:$0xff] }
 0x90a   : > { %5186 = vmatpush1.bf16.msra.mxu1 %v6178_v19  ;;  %v1548_v19 = vld [vmem:[%s8371_s14 + $0x590] sm:$0xff] }
 0x90b   : > { %5188 = vmatprep.subr.bf16.mxu1 %v6179_v22  ;;  %v6200_v22 = vcombine.low %v1532_v12, %v1540_v13  ;;  %v6201_v23 = vcombine.high %v1548_v19, %v1556_v20  ;;  %v1493_v12 = vld [vmem:[%s8371_s14 + $0x3d8] sm:$0xff] }
 0x90d   : > { %2274 = vmatmul.mubr.f32.vlgmr.msra.gmra.mrb[2].mxu1 %v8497_v16 }
 0x90e   : > { %5190 = vmatpush1.bf16.msra.mxu1 %v6180_v25  ;;  %2344 = vmatprep.mubr.f32.mxu1 %v8468_v27  ;;  %v6866_v27 = vld [vmem:[%s8379_s25 + $0x54] ss:$8 sps:$4 sm:$0xff]  }
 0x90f   : > { %5192 = vmatprep.subr.bf16.mxu1 %v6181_v29  ;;  %5592 = vmatprep.subr.bf16.mxu0 %v6866_v27  ;;  %v1564_v25 = vld [vmem:[%s8371_s14 + $0x610] sm:$0xff]  ;;  %v6202_v29 = vcombine.low %v1548_v19, %v1556_v20  ;;  %v1517_v20 = vld [vmem:[%s8371_s14 + $0x498] sm:$0xff] }
 0x910   : > { %5594 = vmatpush1.bf16.msra.mxu0 %v6868_v41  ;;  %v6203_v30 = vcombine.high %v1564_v25, %v1572_v26  ;;  %v6204_v35 = vcombine.low %v1564_v25, %v1572_v26  ;;  %v6898_v27 = vld [vmem:[%s8379_s25 + $0xf0] ss:$8 sps:$4 sm:$0xff]   ;;  %v6899_v41 = vld [vmem:[%s8379_s25 + $0x104] ss:$8 sps:$4 sm:$0xff]  }
 0x911   : > { %5596 = vmatprep.subr.bf16.mxu0 %v6869_v44  ;;  %v1541_v25 = vld [vmem:[%s8371_s14 + $0x558] sm:$0xff] }
 0x912   : > { %5194 = vmatpush1.bf16.msra.mxu1 %v6182_v32  ;;  %v1580_v32 = vld [vmem:[%s8371_s14 + $0x690] sm:$0xff] }
 0x913   : > { %5196 = vmatprep.subr.bf16.mxu1 %v6183_v33  ;;  %v1588_v33 = vld [vmem:[%s8371_s14 + $0x6d0] sm:$0xff] }
 0x914   : > { %5598 = vmatpush1.bf16.msra.mxu0 %v6871_v47  ;;  %v6205_v36 = vcombine.high %v1580_v32, %v1588_v33  ;;  %v6206_v39 = vcombine.low %v1580_v32, %v1588_v33  ;;  %v1381_v47 = vld [vmem:[%s8371_s14 + $0x58] sm:$0xff] }
 0x915   : > { %5600 = vmatprep.subr.bf16.mxu0 %v6872_v50  ;;  %v1389_v50 = vld [vmem:[%s8371_s14 + $0x98] sm:$0xff]  ;;  %v6212_v52 = vcombine.low %v1373_v46, %v1381_v47 }
 0x916   : > { %5198 = vmatpush1.bf16.msra.mxu1 %v6184_v37  ;;  %v1596_v37 = vld [vmem:[%s8371_s14 + $0x710] sm:$0xff]  ;;  %v1565_v33 = vld [vmem:[%s8371_s14 + $0x618] sm:$0xff] }
 0x917   : > { %5200 = vmatprep.subr.bf16.mxu1 %v6185_v38  ;;  %v1604_v38 = vld [vmem:[%s8371_s14 + $0x750] sm:$0xff] }
 0x918   : > { %5602 = vmatpush1.bf16.msra.mxu0 %v6874_v53  ;;  %v6207_v40 = vcombine.high %v1596_v37, %v1604_v38  ;;  %v6208_v44 = vcombine.low %v1596_v37, %v1604_v38  ;;  %v6213_v53 = vcombine.high %v1389_v50, %v1397_v51  ;;  %v1589_v37 = vld [vmem:[%s8371_s14 + $0x6d8] sm:$0xff] }
 0x919   : > { %5604 = vmatprep.subr.bf16.mxu0 %v6875_v56  ;;  %v6214_v56 = vcombine.low %v1389_v50, %v1397_v51  ;;  %v1390_v51 = vld [vmem:[%s8371_s14 + $0xa0] sm:$0xff] }
 0x91a   : > { %5202 = vmatpush1.bf16.msra.mxu1 %v6186_v42  ;;  %v1612_v42 = vld [vmem:[%s8371_s14 + $0x790] sm:$0xff] }
 0x91b   : > { %5204 = vmatprep.subr.bf16.mxu1 %v6187_v43  ;;  %v1620_v43 = vld [vmem:[%s8371_s14 + $0x7d0] sm:$0xff] }
 0x91c   : > { %5606 = vmatpush1.bf16.msra.mxu0 %v6877_v59  ;;  %v6209_v45 = vcombine.high %v1612_v42, %v1620_v43  ;;  %v1421_v59 = vld [vmem:[%s8371_s14 + $0x198] sm:$0xff] }
 0x91d   : > { %5608 = vmatprep.subr.bf16.mxu0 %v6878_v61 }
 0x91e   : > { %5206 = vmatpush1.bf16.msra.mxu1 %v6188_v48  ;;  %v6210_v48 = vcombine.low %v1612_v42, %v1620_v43  ;;  %v1613_v43 = vld [vmem:[%s8371_s14 + $0x798] sm:$0xff] }
 0x91f   : > { %5208 = vmatprep.subr.bf16.mxu1 %v6189_v49  ;;  %v6211_v49 = vcombine.high %v1373_v46, %v1381_v47  ;;  %v1374_v47 = vld [vmem:[%s8371_s14 + $0x20] sm:$0xff] }
 0x920   : > { %5610 = vmatpush1.bf16.msra.mxu0 %v6880_v0 }
 0x921   : > { %5612 = vmatprep.subr.bf16.mxu0 %v6881_v4 }
 0x922   : > { %5210 = vmatpush1.bf16.msra.mxu1 %v6190_v54  ;;  %v1405_v54 = vld [vmem:[%s8371_s14 + $0x118] sm:$0xff] }
 0x923   : > { %5212 = vmatprep.subr.bf16.mxu1 %v6191_v55  ;;  %v1413_v55 = vld [vmem:[%s8371_s14 + $0x158] sm:$0xff] }
 0x924   : > { %5614 = vmatpush1.bf16.msra.mxu0 %v6883_v7  ;;  %v6215_v58 = vcombine.high %v1405_v54, %v1413_v55  ;;  %v1477_v7 = vld [vmem:[%s8371_s14 + $0x358] sm:$0xff] }
 0x925   : > { %5616 = vmatprep.subr.bf16.mxu0 %v6884_v11  ;;  %v1485_v11 = vld [vmem:[%s8371_s14 + $0x398] sm:$0xff]  ;;  %v6224_v13 = vcombine.low %v1469_v6, %v1477_v7 }
 0x926   : > { %5214 = vmatpush1.bf16.msra.mxu1 %v6192_v10  ;;  %v1429_v10 = vld [vmem:[%s8371_s14 + $0x1d8] sm:$0xff] }
 0x927   : > { %5216 = vmatprep.subr.bf16.mxu1 %v6193_v60  ;;  %v6216_v60 = vcombine.low %v1405_v54, %v1413_v55  ;;  %v6217_v61 = vcombine.high %v1421_v59, %v1429_v10  ;;  %v6218_v63 = vcombine.low %v1421_v59, %v1429_v10  ;;  %v1406_v55 = vld [vmem:[%s8371_s14 + $0x120] sm:$0xff] }
 0x928   : > { %5618 = vmatpush1.bf16.msra.mxu0 %v6886_v14  ;;  %v6225_v14 = vcombine.high %v1485_v11, %v1493_v12 }
 0x929   : > { %5620 = vmatprep.subr.bf16.mxu0 %v6887_v18  ;;  %v6226_v18 = vcombine.low %v1485_v11, %v1493_v12  ;;  %v8654_v11 = vld [vmem:[%s8377_s27] ss:$2 sm:$0xff] }
 0x92a   : > { %5218 = vmatpush1.bf16.msra.mxu1 %v6194_v1  ;;  %v1453_v1 = vld [vmem:[%s8371_s14 + $0x298] sm:$0xff] }
 0x92b   : > { %5220 = vmatprep.subr.bf16.mxu1 %v6195_v3  ;;  %v1461_v3 = vld [vmem:[%s8371_s14 + $0x2d8] sm:$0xff] }
 0x92c   : > { %5622 = vmatpush1.bf16.msra.mxu0 %v6889_v21  ;;  %v6221_v5 = vcombine.high %v1453_v1, %v1461_v3  ;;  %v1525_v21 = vld [vmem:[%s8371_s14 + $0x4d8] sm:$0xff] }
 0x92d   : > { %5624 = vmatprep.subr.bf16.mxu0 %v6890_v24  ;;  %v1533_v24 = vld [vmem:[%s8371_s14 + $0x518] sm:$0xff]  ;;  %v6230_v26 = vcombine.low %v1517_v20, %v1525_v21 }
 0x92e   : > { %5222 = vmatpush1.bf16.msra.mxu1 %v6196_v8  ;;  %v6222_v8 = vcombine.low %v1453_v1, %v1461_v3  ;;  %v1446_v1 = vld [vmem:[%s8371_s14 + $0x260] sm:$0xff] }
 0x92f   : > { %5224 = vmatprep.subr.bf16.mxu1 %v6197_v9  ;;  %v6223_v9 = vcombine.high %v1469_v6, %v1477_v7  ;;  %v1454_v6 = vld [vmem:[%s8371_s14 + $0x2a0] sm:$0xff] }
 0x930   : > { %5626 = vmatpush1.bf16.msra.mxu0 %v6892_v28  ;;  %v6231_v28 = vcombine.high %v1533_v24, %v1541_v25  ;;  %v1462_v7 = vld [vmem:[%s8371_s14 + $0x2e0] sm:$0xff] }
 0x931   : > { %5628 = vmatprep.subr.bf16.mxu0 %v6893_v31  ;;  %v6232_v31 = vcombine.low %v1533_v24, %v1541_v25  ;;  %v1486_v25 = vld [vmem:[%s8371_s14 + $0x3a0] sm:$0xff] }
 0x932   : > { %5226 = vmatpush1.bf16.msra.mxu1 %v6198_v15  ;;  %v1501_v15 = vld [vmem:[%s8371_s14 + $0x418] sm:$0xff] }
 0x933   : > { %5228 = vmatprep.subr.bf16.mxu1 %v6199_v17  ;;  %v1509_v17 = vld [vmem:[%s8371_s14 + $0x458] sm:$0xff] }
 0x934   : > { %5630 = vmatpush1.bf16.msra.mxu0 %v6895_v34  ;;  %v6227_v19 = vcombine.high %v1501_v15, %v1509_v17  ;;  %v1573_v34 = vld [vmem:[%s8371_s14 + $0x658] sm:$0xff] }
 0x935   : > { %5632 = vmatprep.subr.bf16.mxu0 %v6896_v2  ;;  %v1581_v2 = vld [vmem:[%s8371_s14 + $0x698] sm:$0xff]  ;;  %v6236_v38 = vcombine.low %v1565_v33, %v1573_v34 }
 0x936   : > { %5230 = vmatpush1.bf16.msra.mxu1 %v6200_v22  ;;  %v6228_v22 = vcombine.low %v1501_v15, %v1509_v17  ;;  %v1470_v15 = vld [vmem:[%s8371_s14 + $0x320] sm:$0xff] }
 0x937   : > { %5232 = vmatprep.subr.bf16.mxu1 %v6201_v23  ;;  %v6229_v23 = vcombine.high %v1517_v20, %v1525_v21  ;;  %v1478_v17 = vld [vmem:[%s8371_s14 + $0x360] sm:$0xff]  ;;  %v6254_v20 = vcombine.low %v1454_v6, %v1462_v7 }
 0x938   : > { %5634 = vmatpush1.bf16.msra.mxu0 %v6898_v27  ;;  %v6237_v27 = vcombine.high %v1581_v2, %v1589_v37 }
 0x939   : > { %5636 = vmatprep.subr.bf16.mxu0 %v6899_v41  ;;  %v6238_v41 = vcombine.low %v1581_v2, %v1589_v37 }
 0x93a   : > { %5234 = vmatpush1.bf16.msra.mxu1 %v6202_v29  ;;  %v1549_v29 = vld [vmem:[%s8371_s14 + $0x598] sm:$0xff] }
 0x93b   : > { %5236 = vmatprep.subr.bf16.mxu1 %v6203_v30  ;;  %v1557_v30 = vld [vmem:[%s8371_s14 + $0x5d8] sm:$0xff] }
 0x93c   : > { %v6233_v32 = vcombine.high %v1549_v29, %v1557_v30 }
 0x93e   : > { %5238 = vmatpush1.bf16.msra.mxu1 %v6204_v35  ;;  %v6234_v35 = vcombine.low %v1549_v29, %v1557_v30 }
 0x93f   : > { %5240 = vmatprep.subr.bf16.mxu1 %v6205_v36  ;;  %v6235_v36 = vcombine.high %v1565_v33, %v1573_v34 }
 0x942   : > { %5242 = vmatpush1.bf16.msra.mxu1 %v6206_v39  ;;  %v1597_v39 = vld [vmem:[%s8371_s14 + $0x718] sm:$0xff] }
 0x943   : > { %5244 = vmatprep.subr.bf16.mxu1 %v6207_v40  ;;  %v1605_v40 = vld [vmem:[%s8371_s14 + $0x758] sm:$0xff] }
 0x944   : > { %v6239_v42 = vcombine.high %v1597_v39, %v1605_v40 }
 0x946   : > { %5246 = vmatpush1.bf16.msra.mxu1 %v6208_v44  ;;  %v1621_v44 = vld [vmem:[%s8371_s14 + $0x7d8] sm:$0xff] }
 0x947   : > { %5248 = vmatprep.subr.bf16.mxu1 %v6209_v45  ;;  %v6240_v45 = vcombine.low %v1597_v39, %v1605_v40  ;;  %v6241_v46 = vcombine.high %v1613_v43, %v1621_v44  ;;  %v1518_v39 = vld [vmem:[%s8371_s14 + $0x4a0] sm:$0xff] }
 0x948   : > { %v1526_v40 = vld [vmem:[%s8371_s14 + $0x4e0] sm:$0xff] }
 0x94a   : > { %5250 = vmatpush1.bf16.msra.mxu1 %v6210_v48  ;;  %v1382_v48 = vld [vmem:[%s8371_s14 + $0x60] sm:$0xff] }
 0x94b   : > { %5252 = vmatprep.subr.bf16.mxu1 %v6211_v49  ;;  %v6242_v49 = vcombine.low %v1613_v43, %v1621_v44  ;;  %v6243_v50 = vcombine.high %v1374_v47, %v1382_v48  ;;  %v1534_v43 = vld [vmem:[%s8371_s14 + $0x520] sm:$0xff] }
 0x94c   : > { %v1542_v44 = vld [vmem:[%s8371_s14 + $0x560] sm:$0xff] }
 0x94d   : > { %2345 = vmatmul.mubr.f32.vlgmr.msra.gmra.mrb[4].mxu1 %v8497_v16  ;;  %v1445_v16 = vld [vmem:[%s8371_s14 + $0x258] sm:$0xff] }
 0x94e   : > { %5254 = vmatpush1.bf16.msra.mxu1 %v6212_v52  ;;  %2415 = vmatprep.mubr.f32.mxu1 %v8603_v57  ;;  %v6219_v0 = vcombine.high %v1437_v62, %v1445_v16  ;;  %v6220_v4 = vcombine.low %v1437_v62, %v1445_v16  ;;  %v1398_v52 = vld [vmem:[%s8371_s14 + $0xe0] sm:$0xff]  ;;  %v2711_v62 = vlaneseq }
 0x94f   : > { %5256 = vmatprep.subr.bf16.mxu1 %v6213_v53  ;;  %v6244_v53 = vcombine.low %v1374_v47, %v1382_v48  ;;  %v6245_v54 = vcombine.high %v1390_v51, %v1398_v52  ;;  %v6246_v59 = vcombine.low %v1390_v51, %v1398_v52  ;;  %v1550_v47 = vld [vmem:[%s8371_s14 + $0x5a0] sm:$0xff]  ;;  %v6264_v52 = vcombine.low %v1534_v43, %v1542_v44 }
 0x950   : > { %v8646_v3 = vshrl.u32 %v2711_v62, 7  ;;  %v1558_v48 = vld [vmem:[%s8371_s14 + $0x5e0] sm:$0xff] }
 0x952   : > { %5258 = vmatpush1.bf16.msra.mxu1 %v6214_v56  ;;  %v1414_v56 = vld [vmem:[%s8371_s14 + $0x160] sm:$0xff]  ;;  %v8657_v12 = vsub.s32 1, %v8646_v3 }
 0x953   : > { %5260 = vmatprep.subr.bf16.mxu1 %v6215_v58  ;;  %v8638_v58 = vld [vmem:[#allocation2] sm:$0xff]  ;;  %v6247_v10 = vcombine.high %v1406_v55, %v1414_v56  ;;  %v6248_v16 = vcombine.low %v1406_v55, %v1414_v56  ;;  %v1566_v55 = vld [vmem:[%s8371_s14 + $0x620] sm:$0xff] }
 0x954   : > { %v1574_v56 = vld [vmem:[%s8371_s14 + $0x660] sm:$0xff] }
 0x955   : > { %v6268_v62 = vcombine.low %v1566_v55, %v1574_v56 }
 0x956   : > { %5262 = vmatpush1.bf16.msra.mxu1 %v6216_v60  ;;  %v1422_v60 = vld [vmem:[%s8371_s14 + $0x1a0] sm:$0xff] }
 0x957   : > { %5264 = vmatprep.subr.bf16.mxu1 %v6217_v61  ;;  %v1430_v61 = vld [vmem:[%s8371_s14 + $0x1e0] sm:$0xff] }
 0x95a   : > { %5266 = vmatpush1.bf16.msra.mxu1 %v6218_v63  ;;  %v6249_v63 = vcombine.high %v1422_v60, %v1430_v61 }
 0x95b   : > { %5268 = vmatprep.subr.bf16.mxu1 %v6219_v0  ;;  %v1438_v0 = vld [vmem:[%s8371_s14 + $0x220] sm:$0xff] }
 0x95e   : > { %5270 = vmatpush1.bf16.msra.mxu1 %v6220_v4  ;;  %v6250_v4 = vcombine.low %v1422_v60, %v1430_v61  ;;  %v1582_v60 = vld [vmem:[%s8371_s14 + $0x6a0] sm:$0xff] }
 0x95f   : > { %5272 = vmatprep.subr.bf16.mxu1 %v6221_v5  ;;  %v6251_v5 = vcombine.high %v1438_v0, %v1446_v1  ;;  %v1590_v61 = vld [vmem:[%s8371_s14 + $0x6e0] sm:$0xff] }
 0x962   : > { %5274 = vmatpush1.bf16.msra.mxu1 %v6222_v8  ;;  %v8651_v8 = vsub.s32 0, %v8646_v3 }
 0x963   : > { %5276 = vmatprep.subr.bf16.mxu1 %v6223_v9  ;;  %v6252_v9 = vcombine.low %v1438_v0, %v1446_v1  ;;  %v1606_v0 = vld [vmem:[%s8371_s14 + $0x760] sm:$0xff] }
 0x966   : > { %5278 = vmatpush1.bf16.msra.mxu1 %v6224_v13  ;;  %v6253_v13 = vcombine.high %v1454_v6, %v1462_v7 }
 0x967   : > { %5280 = vmatprep.subr.bf16.mxu1 %v6225_v14  ;;  %v8660_v14 = vld [vmem:[%s8377_s27 + $0x1] ss:$2 sm:$0xff] }
 0x968   : > { %v2816_v21 = vrot.slane %v8660_v14, %v8651_v8  ;;  %v2820_v24 = vrot.slane %v8660_v14, %v8657_v12 }
 0x96a   : > { %5282 = vmatpush1.bf16.msra.mxu1 %v6226_v18  ;;  %v2714_v18 = vrot.slane %v8654_v11, %v8651_v8 }
 0x96b   : > { %5284 = vmatprep.subr.bf16.mxu1 %v6227_v19  ;;  %v2718_v19 = vrot.slane %v8654_v11, %v8657_v12 }
 0x96e   : > { %5286 = vmatpush1.bf16.msra.mxu1 %v6228_v22  ;;  %v6255_v22 = vcombine.high %v1470_v15, %v1478_v17 }
 0x96f   : > { %5288 = vmatprep.subr.bf16.mxu1 %v6229_v23 }
 0x972   : > { %5290 = vmatpush1.bf16.msra.mxu1 %v6230_v26  ;;  %v1494_v26 = vld [vmem:[%s8371_s14 + $0x3e0] sm:$0xff] }
 0x973   : > { %5292 = vmatprep.subr.bf16.mxu1 %v6231_v28  ;;  %v6257_v33 = vcombine.high %v1486_v25, %v1494_v26 }
 0x976   : > { %5294 = vmatpush1.bf16.msra.mxu1 %v6232_v31  ;;  %v6256_v31 = vcombine.low %v1470_v15, %v1478_v17  ;;  %v1622_v15 = vld [vmem:[%s8371_s14 + $0x7e0] sm:$0xff] }
 0x977   : > { %5296 = vmatprep.subr.bf16.mxu1 %v6233_v32 }
 0x97a   : > { %5298 = vmatpush1.bf16.msra.mxu1 %v6234_v35  ;;  %v1502_v35 = vld [vmem:[%s8371_s14 + $0x420] sm:$0xff] }
 0x97b   : > { %5300 = vmatprep.subr.bf16.mxu1 %v6235_v36  ;;  %v1510_v36 = vld [vmem:[%s8371_s14 + $0x460] sm:$0xff] }
 0x97e   : > { %5302 = vmatpush1.bf16.msra.mxu1 %v6236_v38  ;;  %v6258_v38 = vcombine.low %v1486_v25, %v1494_v26  ;;  %v6908_v26 = vld [vmem:[%s8379_s25 + $0x134] ss:$8 sps:$4 sm:$0xff]  }
 0x97f   : > { %5304 = vmatprep.subr.bf16.mxu1 %v6237_v27  ;;  %v6259_v27 = vcombine.high %v1502_v35, %v1510_v36 }
 0x982   : > { %5306 = vmatpush1.bf16.msra.mxu1 %v6238_v41  ;;  %v6260_v41 = vcombine.low %v1502_v35, %v1510_v36  ;;  %v1415_v35 = vld [vmem:[%s8371_s14 + $0x168] sm:$0xff] }
 0x983   : > { %5308 = vmatprep.subr.bf16.mxu1 %v6239_v42  ;;  %v6261_v42 = vcombine.high %v1518_v39, %v1526_v40 }
 0x986   : > { %5310 = vmatpush1.bf16.msra.mxu1 %v6240_v45  ;;  %v6262_v45 = vcombine.low %v1518_v39, %v1526_v40  ;;  %v1431_v39 = vld [vmem:[%s8371_s14 + $0x1e8] sm:$0xff] }
 0x987   : > { %5312 = vmatprep.subr.bf16.mxu1 %v6241_v46  ;;  %v6263_v46 = vcombine.high %v1534_v43, %v1542_v44  ;;  %v6917_v43 = vld [vmem:[%s8379_s25 + $0x164] ss:$8 sps:$4 sm:$0xff]  }
 0x988   : > { %v1439_v44 = vld [vmem:[%s8371_s14 + $0x228] sm:$0xff] }
 0x98a   : > { %5314 = vmatpush1.bf16.msra.mxu1 %v6242_v49 }
 0x98b   : > { %5316 = vmatprep.subr.bf16.mxu1 %v6243_v50 }
 0x98d   : > { %2416 = vmatmul.mubr.f32.vlgmr.msra.gmra.mrb[6].mxu1 %v8638_v58 }
 0x98e   : > { %5318 = vmatpush1.bf16.msra.mxu1 %v6244_v53  ;;  %2486 = vmatprep.mubr.f32.mxu1 %v8603_v57  ;;  %v6265_v53 = vcombine.high %v1550_v47, %v1558_v48 }
 0x98f   : > { %5320 = vmatprep.subr.bf16.mxu1 %v6245_v54 }
 0x992   : > { %5322 = vmatpush1.bf16.msra.mxu1 %v6246_v59  ;;  %v6266_v59 = vcombine.low %v1550_v47, %v1558_v48  ;;  %v6919_v47 = vld [vmem:[%s8379_s25 + $0x160] ss:$8 sps:$4 sm:$0xff]  }
 0x993   : > { %5324 = vmatprep.subr.bf16.mxu1 %v6247_v10  ;;  %v6267_v10 = vcombine.high %v1566_v55, %v1574_v56  ;;  %v8723_v55 = vsub.s32 3, %v8646_v3 }
 0x996   : > { %5326 = vmatpush1.bf16.msra.mxu1 %v6248_v16  ;;  %v6269_v16 = vcombine.high %v1582_v60, %v1590_v61 }
 0x997   : > { %5328 = vmatprep.subr.bf16.mxu1 %v6249_v63  ;;  %v1598_v63 = vld [vmem:[%s8371_s14 + $0x720] sm:$0xff] }
 0x998   : > { %v6271_v7 = vcombine.high %v1598_v63, %v1606_v0  ;;  %v6272_v17 = vcombine.low %v1598_v63, %v1606_v0  ;;  %v6925_v63 = vld [vmem:[%s8379_s25 + $0x180] ss:$8 sps:$4 sm:$0xff]  }
 0x99a   : > { %5330 = vmatpush1.bf16.msra.mxu1 %v6250_v4  ;;  %v6270_v4 = vcombine.low %v1582_v60, %v1590_v61  ;;  %v1479_v60 = vld [vmem:[%s8371_s14 + $0x368] sm:$0xff] }
 0x99b   : > { %5332 = vmatprep.subr.bf16.mxu1 %v6251_v5  ;;  %v6901_v5 = vld [vmem:[%s8379_s25 + $0x100] ss:$8 sps:$4 sm:$0xff]  }
 0x99e   : > { %5334 = vmatpush1.bf16.msra.mxu1 %v6252_v9  ;;  %v6902_v9 = vld [vmem:[%s8379_s25 + $0x114] ss:$8 sps:$4 sm:$0xff]  }
 0x99f   : > { %5336 = vmatprep.subr.bf16.mxu1 %v6253_v13  ;;  %v1614_v13 = vld [vmem:[%s8371_s14 + $0x7a0] sm:$0xff] }
 0x9a0   : > { %v2204_v23 = vpop.f32.mrb[0].mxu1 }
 0x9a1   : > { %v2791_v28 = vmul.f32 %v2714_v18, %v2204_v23  ;;  %v2206_v29 = vpop.f32.mrb[1].mxu1  ;;  %v6904_v18 = vld [vmem:[%s8379_s25 + $0x110] ss:$8 sps:$4 sm:$0xff]   ;;  %v6274_v23 = vcombine.low %v1614_v13, %v1622_v15 }
 0x9a2   : > { %v2792_v30 = vmul.f32 %v2718_v19, %v2206_v29  ;;  %5338 = vmatpush1.bf16.msra.mxu1 %v6254_v20  ;;  %v6273_v19 = vcombine.high %v1614_v13, %v1622_v15  ;;  %v6905_v20 = vld [vmem:[%s8379_s25 + $0x124] ss:$8 sps:$4 sm:$0xff]  }
 0x9a3   : > { %v2893_v32 = vadd.f32 %v2816_v21, %v2791_v28  ;;  %5340 = vmatprep.subr.bf16.mxu1 %v6255_v22  ;;  %v1375_v21 = vld [vmem:[%s8371_s14 + $0x28] sm:$0xff] }
 0x9a4   : > { %v2894_v34 = vadd.f32 %v2820_v24, %v2792_v30  ;;  %v1383_v22 = vld [vmem:[%s8371_s14 + $0x68] sm:$0xff] }
 0x9a5   : > { %v4651_v2 = vmul.f32 -1.442695, %v2893_v32  ;;  %v6907_v24 = vld [vmem:[%s8379_s25 + $0x120] ss:$8 sps:$4 sm:$0xff]   ;;  %v6275_v25 = vcombine.high %v1375_v21, %v1383_v22  ;;  %v6276_v30 = vcombine.low %v1375_v21, %v1383_v22  ;;  %v6929_v22 = vld [vmem:[%s8379_s25 + $0x1a4] ss:$8 sps:$4 sm:$0xff]  }
 0x9a6   : > { %v4652_v37 = vmul.f32 -1.442695, %v2894_v34  ;;  %5342 = vmatpush1.bf16.msra.mxu1 %v6256_v31  ;;  %v1391_v28 = vld [vmem:[%s8371_s14 + $0xa8] sm:$0xff]  ;;  %v6910_v31 = vld [vmem:[%s8379_s25 + $0x130] ss:$8 sps:$4 sm:$0xff]  }
 0x9a7   : > { %7235 = vpow2.f32 %v4651_v2  ;;  %5344 = vmatprep.subr.bf16.mxu1 %v6257_v33  ;;  %v1399_v29 = vld [vmem:[%s8371_s14 + $0xe8] sm:$0xff] }
 0x9a8   : > { %7237 = vpow2.f32 %v4652_v37  ;;  %v6277_v32 = vcombine.high %v1391_v28, %v1399_v29  ;;  %v6911_v33 = vld [vmem:[%s8379_s25 + $0x144] ss:$8 sps:$4 sm:$0xff]   ;;  %v6278_v36 = vcombine.low %v1391_v28, %v1399_v29  ;;  %v6913_v2 = vld [vmem:[%s8379_s25 + $0x140] ss:$8 sps:$4 sm:$0xff]  }
 0x9a9   : > { %v1407_v34 = vld [vmem:[%s8371_s14 + $0x128] sm:$0xff] }
 0x9aa   : > { %5346 = vmatpush1.bf16.msra.mxu1 %v6258_v38  ;;  %v6279_v37 = vcombine.high %v1407_v34, %v1415_v35  ;;  %v6914_v38 = vld [vmem:[%s8379_s25 + $0x154] ss:$8 sps:$4 sm:$0xff]   ;;  %v6280_v40 = vcombine.low %v1407_v34, %v1415_v35  ;;  %v1527_v34 = vld [vmem:[%s8371_s14 + $0x4e8] sm:$0xff] }
 0x9ab   : > { %5348 = vmatprep.subr.bf16.mxu1 %v6259_v27  ;;  %v1423_v27 = vld [vmem:[%s8371_s14 + $0x1a8] sm:$0xff] }
 0x9ae   : > { %5350 = vmatpush1.bf16.msra.mxu1 %v6260_v41  ;;  %v6916_v41 = vld [vmem:[%s8379_s25 + $0x150] ss:$8 sps:$4 sm:$0xff]  }
 0x9af   : > { %5352 = vmatprep.subr.bf16.mxu1 %v6261_v42  ;;  %v6281_v42 = vcombine.high %v1423_v27, %v1431_v39 }
 0x9b1   : > { %v7236_v49 = vpop.eup %7235 }
 0x9b2   : > { %v7238_v50 = vpop.eup %7237  ;;  %v2957_v51 = vadd.f32 1.0, %v7236_v49  ;;  %5354 = vmatpush1.bf16.msra.mxu1 %v6262_v45  ;;  %v1447_v45 = vld [vmem:[%s8371_s14 + $0x268] sm:$0xff]  ;;  %v6920_v49 = vld [vmem:[%s8379_s25 + $0x174] ss:$8 sps:$4 sm:$0xff]  }
 0x9b3   : > { %5356 = vmatprep.subr.bf16.mxu1 %v6263_v46  ;;  %v2958_v54 = vadd.f32 1.0, %v7238_v50  ;;  %v6282_v46 = vcombine.low %v1423_v27, %v1431_v39  ;;  %v6283_v48 = vcombine.high %v1439_v44, %v1447_v45  ;;  %v1455_v50 = vld [vmem:[%s8371_s14 + $0x2a8] sm:$0xff] }
 0x9b4   : > { %7239 = vrcp.f32 %v2957_v51  ;;  %v1463_v51 = vld [vmem:[%s8371_s14 + $0x2e8] sm:$0xff] }
 0x9b5   : > { %7241 = vrcp.f32 %v2958_v54  ;;  %v6922_v54 = vld [vmem:[%s8379_s25 + $0x170] ss:$8 sps:$4 sm:$0xff]   ;;  %v6285_v56 = vcombine.high %v1455_v50, %v1463_v51  ;;  %v1543_v27 = vld [vmem:[%s8371_s14 + $0x568] sm:$0xff] }
 0x9b6   : > { %5358 = vmatpush1.bf16.msra.mxu1 %v6264_v52  ;;  %v8719_v52 = vsub.s32 2, %v8646_v3 }
 0x9b7   : > { %5360 = vmatprep.subr.bf16.mxu1 %v6265_v53  ;;  %v6284_v53 = vcombine.low %v1439_v44, %v1447_v45  ;;  %v1559_v44 = vld [vmem:[%s8371_s14 + $0x5e8] sm:$0xff] }
 0x9b8   : > { %v2722_v61 = vrot.slane %v8654_v11, %v8719_v52  ;;  %v2824_v0 = vrot.slane %v8660_v14, %v8719_v52 }
 0x9ba   : > { %5362 = vmatpush1.bf16.msra.mxu1 %v6266_v59  ;;  %v6923_v59 = vld [vmem:[%s8379_s25 + $0x184] ss:$8 sps:$4 sm:$0xff]  }
 0x9bb   : > { %5364 = vmatprep.subr.bf16.mxu1 %v6267_v10  ;;  %v1471_v10 = vld [vmem:[%s8371_s14 + $0x328] sm:$0xff] }
 0x9be   : > { %v7240_v1 = vpop.eup %7239  ;;  %5366 = vmatpush1.bf16.msra.mxu1 %v6268_v62  ;;  %v2726_v62 = vrot.slane %v8654_v11, %v8723_v55 }
 0x9bf   : > { %v7242_v6 = vpop.eup %7241  ;;  %5368 = vmatprep.subr.bf16.mxu1 %v6269_v16  ;;  %v6286_v16 = vcombine.low %v1455_v50, %v1463_v51 }
 0x9c0   : > { %3839 = vmatprep.mubr.f32.mxu0 %v7242_v6  ;;  %v2828_v6 = vrot.slane %v8660_v14, %v8723_v55 }
 0x9c1   : > { %3840 = vmatmul.mubr.f32.vlgmr.msra.gmra.mrb[0].mxu0 %v7240_v1  ;;  %v6287_v1 = vcombine.high %v1471_v10, %v1479_v60 }
 0x9c2   : > { %5370 = vmatpush1.bf16.msra.mxu1 %v6270_v4  ;;  %5638 = vmatpush1.bf16.msra.mxu0 %v6901_v5  ;;  %v6926_v4 = vld [vmem:[%s8379_s25 + $0x194] ss:$8 sps:$4 sm:$0xff]  }
 0x9c3   : > { %5372 = vmatprep.subr.bf16.mxu1 %v6271_v7  ;;  %5640 = vmatprep.subr.bf16.mxu0 %v6902_v9  ;;  %v1487_v7 = vld [vmem:[%s8371_s14 + $0x3a8] sm:$0xff] }
 0x9c4   : > { %v1495_v9 = vld [vmem:[%s8371_s14 + $0x3e8] sm:$0xff] }
 0x9c5   : > { %v6289_v21 = vcombine.high %v1487_v7, %v1495_v9  ;;  %v6290_v29 = vcombine.low %v1487_v7, %v1495_v9 }
 0x9c6   : > { %5374 = vmatpush1.bf16.msra.mxu1 %v6272_v17  ;;  %5642 = vmatpush1.bf16.msra.mxu0 %v6904_v18  ;;  %v6288_v18 = vcombine.low %v1471_v10, %v1479_v60  ;;  %v6943_v10 = vld [vmem:[%s8379_s25 + $0x1e0] ss:$8 sps:$4 sm:$0xff]  }
 0x9c7   : > { %5376 = vmatprep.subr.bf16.mxu1 %v6273_v19  ;;  %5644 = vmatprep.subr.bf16.mxu0 %v6905_v20  ;;  %v6928_v19 = vld [vmem:[%s8379_s25 + $0x190] ss:$8 sps:$4 sm:$0xff]  }
 0x9ca   : > { %5378 = vmatpush1.bf16.msra.mxu1 %v6274_v23  ;;  %5646 = vmatpush1.bf16.msra.mxu0 %v6907_v24  ;;  %v1503_v24 = vld [vmem:[%s8371_s14 + $0x428] sm:$0xff] }
 0x9cb   : > { %5380 = vmatprep.subr.bf16.mxu1 %v6275_v25  ;;  %5648 = vmatprep.subr.bf16.mxu0 %v6908_v26  ;;  %v1511_v25 = vld [vmem:[%s8371_s14 + $0x468] sm:$0xff] }
 0x9cc   : > { %v6292_v35 = vcombine.low %v1503_v24, %v1511_v25 }
 0x9cd   : > { %2487 = vmatmul.mubr.f32.vlgmr.msra.gmra.mrb[8].mxu1 %v8638_v58 }
 0x9ce   : > { %5382 = vmatpush1.bf16.msra.mxu1 %v6276_v30  ;;  %5650 = vmatpush1.bf16.msra.mxu0 %v6910_v31  ;;  %v6931_v30 = vld [vmem:[%s8379_s25 + $0x1a0] ss:$8 sps:$4 sm:$0xff]   ;;  %v6291_v31 = vcombine.high %v1503_v24, %v1511_v25  ;;  %v6953_v24 = vld [vmem:[%s8379_s25 + $0x224] ss:$8 sps:$4 sm:$0xff]   ;;  %v1376_v25 = vld [vmem:[%s8371_s14 + $0x30] sm:$0xff] }
 0x9cf   : > { %5384 = vmatprep.subr.bf16.mxu1 %v6277_v32  ;;  %5652 = vmatprep.subr.bf16.mxu0 %v6911_v33  ;;  %v6932_v32 = vld [vmem:[%s8379_s25 + $0x1b4] ss:$8 sps:$4 sm:$0xff]   ;;  %v1519_v33 = vld [vmem:[%s8371_s14 + $0x4a8] sm:$0xff] }
 0x9d0   : > { %2557 = vmatprep.mubr.f32.mxu1 %v8603_v57  ;;  %v6294_v39 = vcombine.low %v1519_v33, %v1527_v34 }
 0x9d2   : > { %5386 = vmatpush1.bf16.msra.mxu1 %v6278_v36  ;;  %5654 = vmatpush1.bf16.msra.mxu0 %v6913_v2  ;;  %v6934_v36 = vld [vmem:[%s8379_s25 + $0x1b0] ss:$8 sps:$4 sm:$0xff]   ;;  %v6293_v2 = vcombine.high %v1519_v33, %v1527_v34 }
 0x9d3   : > { %5388 = vmatprep.subr.bf16.mxu1 %v6279_v37  ;;  %5656 = vmatprep.subr.bf16.mxu0 %v6914_v38  ;;  %v6935_v37 = vld [vmem:[%s8379_s25 + $0x1c4] ss:$8 sps:$4 sm:$0xff]   ;;  %v1400_v33 = vld [vmem:[%s8371_s14 + $0xf0] sm:$0xff] }
 0x9d4   : > { %v1535_v38 = vld [vmem:[%s8371_s14 + $0x528] sm:$0xff] }
 0x9d6   : > { %5390 = vmatpush1.bf16.msra.mxu1 %v6280_v40  ;;  %5658 = vmatpush1.bf16.msra.mxu0 %v6916_v41  ;;  %v6937_v40 = vld [vmem:[%s8379_s25 + $0x1c0] ss:$8 sps:$4 sm:$0xff]   ;;  %v6295_v41 = vcombine.high %v1535_v38, %v1543_v27 }
 0x9d7   : > { %5392 = vmatprep.subr.bf16.mxu1 %v6281_v42  ;;  %5660 = vmatprep.subr.bf16.mxu0 %v6917_v43  ;;  %v6938_v42 = vld [vmem:[%s8379_s25 + $0x1d4] ss:$8 sps:$4 sm:$0xff]   ;;  %v1551_v43 = vld [vmem:[%s8371_s14 + $0x5a8] sm:$0xff] }
 0x9d8   : > { %v6297_v51 = vcombine.high %v1551_v43, %v1559_v44 }
 0x9da   : > { %5394 = vmatpush1.bf16.msra.mxu1 %v6282_v46  ;;  %5662 = vmatpush1.bf16.msra.mxu0 %v6919_v47 }
 0x9db   : > { %5396 = vmatprep.subr.bf16.mxu1 %v6283_v48  ;;  %5664 = vmatprep.subr.bf16.mxu0 %v6920_v49  ;;  %v6296_v48 = vcombine.low %v1535_v38, %v1543_v27  ;;  %v6940_v49 = vld [vmem:[%s8379_s25 + $0x1d0] ss:$8 sps:$4 sm:$0xff]  }
 0x9dc   : > { %v1416_v38 = vld [vmem:[%s8371_s14 + $0x170] sm:$0xff] }
 0x9de   : > { %5398 = vmatpush1.bf16.msra.mxu1 %v6284_v53  ;;  %5666 = vmatpush1.bf16.msra.mxu0 %v6922_v54  ;;  %v6941_v53 = vld [vmem:[%s8379_s25 + $0x1e4] ss:$8 sps:$4 sm:$0xff]  }
 0x9df   : > { %5400 = vmatprep.subr.bf16.mxu1 %v6285_v56  ;;  %5668 = vmatprep.subr.bf16.mxu0 %v6923_v59  ;;  %v1567_v54 = vld [vmem:[%s8371_s14 + $0x628] sm:$0xff]  ;;  %v6298_v59 = vcombine.low %v1551_v43, %v1559_v44  ;;  %v1432_v43 = vld [vmem:[%s8371_s14 + $0x1f0] sm:$0xff] }
 0x9e0   : > { %v2275_v5 = vpop.f32.mrb[2].mxu1  ;;  %v1575_v56 = vld [vmem:[%s8371_s14 + $0x668] sm:$0xff]  ;;  %v6964_v44 = vld [vmem:[%s8379_s25 + $0x250] ss:$8 sps:$4 sm:$0xff]  }
 0x9e1   : > { %v2793_v13 = vmul.f32 %v2722_v61, %v2275_v5  ;;  %v2277_v15 = vpop.f32.mrb[3].mxu1  ;;  %v6299_v60 = vcombine.high %v1567_v54, %v1575_v56  ;;  %v6944_v61 = vld [vmem:[%s8379_s25 + $0x1f4] ss:$8 sps:$4 sm:$0xff]   ;;  %v1599_v5 = vld [vmem:[%s8371_s14 + $0x728] sm:$0xff] }
 0x9e2   : > { %v2794_v17 = vmul.f32 %v2726_v62, %v2277_v15  ;;  %5402 = vmatpush1.bf16.msra.mxu1 %v6286_v16  ;;  %5670 = vmatpush1.bf16.msra.mxu0 %v6925_v63  ;;  %v1583_v62 = vld [vmem:[%s8371_s14 + $0x6a8] sm:$0xff]  ;;  %v6300_v63 = vcombine.low %v1567_v54, %v1575_v56  ;;  %v1464_v54 = vld [vmem:[%s8371_s14 + $0x2f0] sm:$0xff]  ;;  %v8799_v56 = vsub.s32 4, %v8646_v3 }
 0x9e3   : > { %v2895_v20 = vadd.f32 %v2824_v0, %v2793_v13  ;;  %5404 = vmatprep.subr.bf16.mxu1 %v6287_v1  ;;  %5672 = vmatprep.subr.bf16.mxu0 %v6926_v4  ;;  %v1591_v16 = vld [vmem:[%s8371_s14 + $0x6e8] sm:$0xff]  ;;  %v6946_v0 = vld [vmem:[%s8379_s25 + $0x1f0] ss:$8 sps:$4 sm:$0xff]  }
 0x9e4   : > { %v2896_v23 = vadd.f32 %v2828_v6, %v2794_v17  ;;  %v6301_v1 = vcombine.high %v1583_v62, %v1591_v16  ;;  %v6947_v4 = vld [vmem:[%s8379_s25 + $0x204] ss:$8 sps:$4 sm:$0xff]   ;;  %v6302_v9 = vcombine.low %v1583_v62, %v1591_v16  ;;  %v6949_v13 = vld [vmem:[%s8379_s25 + $0x200] ss:$8 sps:$4 sm:$0xff]   ;;  %v1472_v16 = vld [vmem:[%s8371_s14 + $0x330] sm:$0xff] }
 0x9e5   : > { %v4653_v26 = vmul.f32 -1.442695, %v2895_v20  ;;  %v1607_v6 = vld [vmem:[%s8371_s14 + $0x768] sm:$0xff] }
 0x9e6   : > { %v4654_v28 = vmul.f32 -1.442695, %v2896_v23  ;;  %5406 = vmatpush1.bf16.msra.mxu1 %v6288_v18  ;;  %5674 = vmatpush1.bf16.msra.mxu0 %v6928_v19  ;;  %v6303_v17 = vcombine.high %v1599_v5, %v1607_v6  ;;  %v6950_v18 = vld [vmem:[%s8379_s25 + $0x214] ss:$8 sps:$4 sm:$0xff]   ;;  %v1615_v19 = vld [vmem:[%s8371_s14 + $0x7a8] sm:$0xff] }
 0x9e7   : > { %7243 = vpow2.f32 %v4653_v26  ;;  %5408 = vmatprep.subr.bf16.mxu1 %v6289_v21  ;;  %5676 = vmatprep.subr.bf16.mxu0 %v6929_v22  ;;  %v1623_v20 = vld [vmem:[%s8371_s14 + $0x7e8] sm:$0xff]  ;;  %v6304_v21 = vcombine.low %v1599_v5, %v1607_v6  ;;  %v6952_v22 = vld [vmem:[%s8379_s25 + $0x210] ss:$8 sps:$4 sm:$0xff]   ;;  %v2832_v6 = vrot.slane %v8660_v14, %v8799_v56 }
 0x9e8   : > { %7245 = vpow2.f32 %v4654_v28  ;;  %v6305_v23 = vcombine.high %v1615_v19, %v1623_v20  ;;  %v1384_v26 = vld [vmem:[%s8371_s14 + $0x70] sm:$0xff]  ;;  %v6306_v28 = vcombine.low %v1615_v19, %v1623_v20  ;;  %v6971_v62 = vld [vmem:[%s8379_s25 + $0x284] ss:$8 sps:$4 sm:$0xff]   ;;  %v6973_v5 = vld [vmem:[%s8379_s25 + $0x280] ss:$8 sps:$4 sm:$0xff]  }
 0x9e9   : > { %v6308_v34 = vcombine.low %v1376_v25, %v1384_v26 }
 0x9ea   : > { %5410 = vmatpush1.bf16.msra.mxu1 %v6290_v29  ;;  %5678 = vmatpush1.bf16.msra.mxu0 %v6931_v30  ;;  %v6955_v29 = vld [vmem:[%s8379_s25 + $0x220] ss:$8 sps:$4 sm:$0xff]   ;;  %v6307_v30 = vcombine.high %v1376_v25, %v1384_v26  ;;  %v6977_v25 = vld [vmem:[%s8379_s25 + $0x2a4] ss:$8 sps:$4 sm:$0xff]   ;;  %v1504_v26 = vld [vmem:[%s8371_s14 + $0x430] sm:$0xff] }
 0x9eb   : > { %5412 = vmatprep.subr.bf16.mxu1 %v6291_v31  ;;  %5680 = vmatprep.subr.bf16.mxu0 %v6932_v32  ;;  %v6956_v31 = vld [vmem:[%s8379_s25 + $0x234] ss:$8 sps:$4 sm:$0xff]  }
 0x9ec   : > { %v1392_v32 = vld [vmem:[%s8371_s14 + $0xb0] sm:$0xff] }
 0x9ed   : > { %v6310_v27 = vcombine.low %v1392_v32, %v1400_v33 }
 0x9ee   : > { %5414 = vmatpush1.bf16.msra.mxu1 %v6292_v35  ;;  %5682 = vmatpush1.bf16.msra.mxu0 %v6934_v36  ;;  %v6958_v35 = vld [vmem:[%s8379_s25 + $0x230] ss:$8 sps:$4 sm:$0xff]   ;;  %v6309_v36 = vcombine.high %v1392_v32, %v1400_v33  ;;  %v6979_v32 = vld [vmem:[%s8379_s25 + $0x2a0] ss:$8 sps:$4 sm:$0xff]  }
 0x9ef   : > { %5416 = vmatprep.subr.bf16.mxu1 %v6293_v2  ;;  %5684 = vmatprep.subr.bf16.mxu0 %v6935_v37  ;;  %v6959_v2 = vld [vmem:[%s8379_s25 + $0x244] ss:$8 sps:$4 sm:$0xff]   ;;  %v1408_v37 = vld [vmem:[%s8371_s14 + $0x130] sm:$0xff] }
 0x9f1   : > { %v7244_v45 = vpop.eup %7243 }
 0x9f2   : > { %v7246_v46 = vpop.eup %7245  ;;  %v2959_v47 = vadd.f32 1.0, %v7244_v45  ;;  %5418 = vmatpush1.bf16.msra.mxu1 %v6294_v39  ;;  %5686 = vmatpush1.bf16.msra.mxu0 %v6937_v40  ;;  %v6961_v39 = vld [vmem:[%s8379_s25 + $0x240] ss:$8 sps:$4 sm:$0xff]   ;;  %v6311_v40 = vcombine.high %v1408_v37, %v1416_v38 }
 0x9f3   : > { %v2960_v50 = vadd.f32 1.0, %v7246_v46  ;;  %5420 = vmatprep.subr.bf16.mxu1 %v6295_v41  ;;  %5688 = vmatprep.subr.bf16.mxu0 %v6938_v42  ;;  %v6962_v41 = vld [vmem:[%s8379_s25 + $0x254] ss:$8 sps:$4 sm:$0xff]   ;;  %v6965_v46 = vld [vmem:[%s8379_s25 + $0x264] ss:$8 sps:$4 sm:$0xff]  }
 0x9f4   : > { %7247 = vrcp.f32 %v2959_v47  ;;  %v1424_v42 = vld [vmem:[%s8371_s14 + $0x1b0] sm:$0xff] }
 0x9f5   : > { %7249 = vrcp.f32 %v2960_v50  ;;  %v6313_v45 = vcombine.high %v1424_v42, %v1432_v43  ;;  %v1440_v47 = vld [vmem:[%s8371_s14 + $0x230] sm:$0xff]  ;;  %v6967_v50 = vld [vmem:[%s8379_s25 + $0x260] ss:$8 sps:$4 sm:$0xff]  }
 0x9f6   : > { %5422 = vmatpush1.bf16.msra.mxu1 %v6296_v48  ;;  %5690 = vmatpush1.bf16.msra.mxu0 %v6940_v49  ;;  %v1448_v48 = vld [vmem:[%s8371_s14 + $0x270] sm:$0xff]  ;;  %v6314_v49 = vcombine.low %v1424_v42, %v1432_v43  ;;  %v6985_v42 = vld [vmem:[%s8379_s25 + $0x2c0] ss:$8 sps:$4 sm:$0xff]  }
 0x9f7   : > { %5424 = vmatprep.subr.bf16.mxu1 %v6297_v51  ;;  %5692 = vmatprep.subr.bf16.mxu0 %v6941_v53  ;;  %v6968_v51 = vld [vmem:[%s8379_s25 + $0x274] ss:$8 sps:$4 sm:$0xff]  }
 0x9f8   : > { %v1456_v53 = vld [vmem:[%s8371_s14 + $0x2b0] sm:$0xff] }
 0x9fa   : > { %5426 = vmatpush1.bf16.msra.mxu1 %v6298_v59  ;;  %5694 = vmatpush1.bf16.msra.mxu0 %v6943_v10  ;;  %v6316_v59 = vcombine.low %v1440_v47, %v1448_v48  ;;  %v6970_v10 = vld [vmem:[%s8379_s25 + $0x270] ss:$8 sps:$4 sm:$0xff]  }
 0x9fb   : > { %5428 = vmatprep.subr.bf16.mxu1 %v6299_v60  ;;  %5696 = vmatprep.subr.bf16.mxu0 %v6944_v61  ;;  %v8803_v60 = vsub.s32 5, %v8646_v3  ;;  %v6317_v61 = vcombine.high %v1456_v53, %v1464_v54 }
 0x9fe   : > { %v7248_v7 = vpop.eup %7247  ;;  %5430 = vmatpush1.bf16.msra.mxu1 %v6300_v63  ;;  %5698 = vmatpush1.bf16.msra.mxu0 %v6946_v0  ;;  %v1480_v63 = vld [vmem:[%s8371_s14 + $0x370] sm:$0xff]  ;;  %v2730_v0 = vrot.slane %v8654_v11, %v8799_v56 }
 0x9ff   : > { %v7250_v15 = vpop.eup %7249  ;;  %5432 = vmatprep.subr.bf16.mxu1 %v6301_v1  ;;  %5700 = vmatprep.subr.bf16.mxu0 %v6947_v4  ;;  %v2734_v1 = vrot.slane %v8654_v11, %v8803_v60  ;;  %v6318_v4 = vcombine.low %v1456_v53, %v1464_v54  ;;  %v6989_v53 = vld [vmem:[%s8379_s25 + $0x2e4] ss:$8 sps:$4 sm:$0xff]   ;;  %v1568_v54 = vld [vmem:[%s8371_s14 + $0x630] sm:$0xff] }
 0xa00   : > { %3910 = vmatprep.mubr.f32.mxu0 %v7250_v15  ;;  %v2836_v15 = vrot.slane %v8660_v14, %v8803_v60 }
 0xa01   : > { %3911 = vmatmul.mubr.f32.vlgmr.msra.gmra.mrb[0].mxu0 %v7248_v7  ;;  %v6319_v7 = vcombine.high %v1472_v16, %v1480_v63 }
 0xa02   : > { %5434 = vmatpush1.bf16.msra.mxu1 %v6302_v9  ;;  %5702 = vmatpush1.bf16.msra.mxu0 %v6949_v13  ;;  %v6974_v9 = vld [vmem:[%s8379_s25 + $0x294] ss:$8 sps:$4 sm:$0xff]  }
 0xa03   : > { %5436 = vmatprep.subr.bf16.mxu1 %v6303_v17  ;;  %5704 = vmatprep.subr.bf16.mxu0 %v6950_v18  ;;  %v1488_v17 = vld [vmem:[%s8371_s14 + $0x3b0] sm:$0xff] }
 0xa04   : > { %v1496_v18 = vld [vmem:[%s8371_s14 + $0x3f0] sm:$0xff] }
 0xa06   : > { %5438 = vmatpush1.bf16.msra.mxu1 %v6304_v21  ;;  %5706 = vmatpush1.bf16.msra.mxu0 %v6952_v22  ;;  %v6320_v21 = vcombine.low %v1472_v16, %v1480_v63  ;;  %v6976_v22 = vld [vmem:[%s8379_s25 + $0x290] ss:$8 sps:$4 sm:$0xff]   ;;  %v6992_v16 = vld [vmem:[%s8379_s25 + $0x2f4] ss:$8 sps:$4 sm:$0xff]  }
 0xa07   : > { %5440 = vmatprep.subr.bf16.mxu1 %v6305_v23  ;;  %5708 = vmatprep.subr.bf16.mxu0 %v6953_v24  ;;  %v6321_v24 = vcombine.high %v1488_v17, %v1496_v18  ;;  %v1584_v63 = vld [vmem:[%s8371_s14 + $0x6b0] sm:$0xff] }
 0xa0a   : > { %5442 = vmatpush1.bf16.msra.mxu1 %v6306_v28  ;;  %5710 = vmatpush1.bf16.msra.mxu0 %v6955_v29  ;;  %v1512_v28 = vld [vmem:[%s8371_s14 + $0x470] sm:$0xff] }
 0xa0b   : > { %5444 = vmatprep.subr.bf16.mxu1 %v6307_v30  ;;  %5712 = vmatprep.subr.bf16.mxu0 %v6956_v31  ;;  %v6322_v31 = vcombine.low %v1488_v17, %v1496_v18  ;;  %v6323_v33 = vcombine.high %v1504_v26, %v1512_v28  ;;  %v6997_v17 = vld [vmem:[%s8379_s25 + $0x300] ss:$8 sps:$4 sm:$0xff]  }
 0xa0d   : > { %2558 = vmatmul.mubr.f32.vlgmr.msra.gmra.mrb[10].mxu1 %v8638_v58  ;;  %v6312_v58 = vcombine.low %v1408_v37, %v1416_v38  ;;  %v6982_v37 = vld [vmem:[%s8379_s25 + $0x2b0] ss:$8 sps:$4 sm:$0xff]  }
 0xa0e   : > { %5446 = vmatpush1.bf16.msra.mxu1 %v6308_v34  ;;  %5714 = vmatpush1.bf16.msra.mxu0 %v6958_v35  ;;  %v6980_v34 = vld [vmem:[%s8379_s25 + $0x2b4] ss:$8 sps:$4 sm:$0xff]  }
 0xa0f   : > { %5448 = vmatprep.subr.bf16.mxu1 %v6309_v36  ;;  %5716 = vmatprep.subr.bf16.mxu0 %v6959_v2  ;;  %v1520_v35 = vld [vmem:[%s8371_s14 + $0x4b0] sm:$0xff]  ;;  %v6324_v2 = vcombine.low %v1504_v26, %v1512_v28  ;;  %v1385_v26 = vld [vmem:[%s8371_s14 + $0x78] sm:$0xff] }
 0xa10   : > { %2628 = vmatprep.mubr.f32.mxu1 %v8603_v57  ;;  %v6315_v57 = vcombine.high %v1440_v47, %v1448_v48  ;;  %v1528_v36 = vld [vmem:[%s8371_s14 + $0x4f0] sm:$0xff] }
 0xa11   : > { %v6325_v38 = vcombine.high %v1520_v35, %v1528_v36 }
 0xa12   : > { %5450 = vmatpush1.bf16.msra.mxu1 %v6310_v27  ;;  %5718 = vmatpush1.bf16.msra.mxu0 %v6961_v39  ;;  %v6983_v27 = vld [vmem:[%s8379_s25 + $0x2c4] ss:$8 sps:$4 sm:$0xff]   ;;  %v1536_v39 = vld [vmem:[%s8371_s14 + $0x530] sm:$0xff] }
 0xa13   : > { %5452 = vmatprep.subr.bf16.mxu1 %v6311_v40  ;;  %5720 = vmatprep.subr.bf16.mxu0 %v6962_v41  ;;  %v1544_v40 = vld [vmem:[%s8371_s14 + $0x570] sm:$0xff]  ;;  %v6326_v41 = vcombine.low %v1520_v35, %v1528_v36 }
 0xa14   : > { %v6327_v43 = vcombine.high %v1536_v39, %v1544_v40  ;;  %v7006_v35 = vld [vmem:[%s8379_s25 + $0x330] ss:$8 sps:$4 sm:$0xff]  }
 0xa16   : > { %5454 = vmatpush1.bf16.msra.mxu1 %v6312_v58  ;;  %5722 = vmatpush1.bf16.msra.mxu0 %v6964_v44  ;;  %v6986_v58 = vld [vmem:[%s8379_s25 + $0x2d4] ss:$8 sps:$4 sm:$0xff]  }
 0xa17   : > { %5456 = vmatprep.subr.bf16.mxu1 %v6313_v45  ;;  %5724 = vmatprep.subr.bf16.mxu0 %v6965_v46  ;;  %v1552_v44 = vld [vmem:[%s8371_s14 + $0x5b0] sm:$0xff] }
 0xa18   : > { %v1560_v45 = vld [vmem:[%s8371_s14 + $0x5f0] sm:$0xff] }
 0xa1a   : > { %5458 = vmatpush1.bf16.msra.mxu1 %v6314_v49  ;;  %5726 = vmatpush1.bf16.msra.mxu0 %v6967_v50  ;;  %v6328_v49 = vcombine.low %v1536_v39, %v1544_v40  ;;  %v6988_v50 = vld [vmem:[%s8379_s25 + $0x2d0] ss:$8 sps:$4 sm:$0xff]   ;;  %v7009_v40 = vld [vmem:[%s8379_s25 + $0x340] ss:$8 sps:$4 sm:$0xff]  }
 0xa1b   : > { %5460 = vmatprep.subr.bf16.mxu1 %v6315_v57  ;;  %5728 = vmatprep.subr.bf16.mxu0 %v6968_v51  ;;  %v6329_v51 = vcombine.high %v1552_v44, %v1560_v45 }
 0xa1e   : > { %5462 = vmatpush1.bf16.msra.mxu1 %v6316_v59  ;;  %5730 = vmatpush1.bf16.msra.mxu0 %v6970_v10  ;;  %v1576_v59 = vld [vmem:[%s8371_s14 + $0x670] sm:$0xff]  ;;  %v6330_v10 = vcombine.low %v1552_v44, %v1560_v45  ;;  %v7302_v44 = vld [vmem:[#allocation2 + $0x8] sm:$0xff] }
 0xa1f   : > { %5464 = vmatprep.subr.bf16.mxu1 %v6317_v61  ;;  %5732 = vmatprep.subr.bf16.mxu0 %v6971_v62  ;;  %v6991_v61 = vld [vmem:[%s8379_s25 + $0x2e0] ss:$8 sps:$4 sm:$0xff]   ;;  %v6331_v62 = vcombine.high %v1568_v54, %v1576_v59 }
 0xa20   : > { %v2346_v13 = vpop.f32.mrb[4].mxu1 }
 0xa21   : > { %v2795_v11 = vmul.f32 %v2730_v0, %v2346_v13  ;;  %v2348_v19 = vpop.f32.mrb[5].mxu1  ;;  %v1592_v0 = vld [vmem:[%s8371_s14 + $0x6f0] sm:$0xff] }
 0xa22   : > { %v2796_v20 = vmul.f32 %v2734_v1, %v2348_v19  ;;  %5466 = vmatpush1.bf16.msra.mxu1 %v6318_v4  ;;  %5734 = vmatpush1.bf16.msra.mxu0 %v6973_v5  ;;  %v6332_v1 = vcombine.low %v1568_v54, %v1576_v59  ;;  %v6994_v4 = vld [vmem:[%s8379_s25 + $0x2f0] ss:$8 sps:$4 sm:$0xff]   ;;  %v6333_v5 = vcombine.high %v1584_v63, %v1592_v0  ;;  %v6998_v19 = vld [vmem:[%s8379_s25 + $0x314] ss:$8 sps:$4 sm:$0xff]  }
 0xa23   : > { %v2897_v23 = vadd.f32 %v2832_v6, %v2795_v11  ;;  %5468 = vmatprep.subr.bf16.mxu1 %v6319_v7  ;;  %5736 = vmatprep.subr.bf16.mxu0 %v6974_v9  ;;  %v6995_v6 = vld [vmem:[%s8379_s25 + $0x304] ss:$8 sps:$4 sm:$0xff]   ;;  %v1600_v7 = vld [vmem:[%s8371_s14 + $0x730] sm:$0xff]  ;;  %v1457_v59 = vld [vmem:[%s8371_s14 + $0x2b8] sm:$0xff] }
 0xa24   : > { %v2898_v14 = vadd.f32 %v2836_v15, %v2796_v20  ;;  %v1608_v9 = vld [vmem:[%s8371_s14 + $0x770] sm:$0xff]  ;;  %v6334_v15 = vcombine.low %v1584_v63, %v1592_v0  ;;  %v8884_v63 = vsub.s32 7, %v8646_v3 }
 0xa25   : > { %v4655_v29 = vmul.f32 -1.442695, %v2897_v23  ;;  %v6335_v11 = vcombine.high %v1600_v7, %v1608_v9  ;;  %v1616_v20 = vld [vmem:[%s8371_s14 + $0x7b0] sm:$0xff] }
 0xa26   : > { %v4656_v30 = vmul.f32 -1.442695, %v2898_v14  ;;  %5470 = vmatpush1.bf16.msra.mxu1 %v6320_v21  ;;  %5738 = vmatpush1.bf16.msra.mxu0 %v6976_v22  ;;  %v1624_v21 = vld [vmem:[%s8371_s14 + $0x7f0] sm:$0xff]  ;;  %v6336_v22 = vcombine.low %v1600_v7, %v1608_v9  ;;  %v1377_v14 = vld [vmem:[%s8371_s14 + $0x38] sm:$0xff] }
 0xa27   : > { %7251 = vpow2.f32 %v4655_v29  ;;  %5472 = vmatprep.subr.bf16.mxu1 %v6321_v24  ;;  %5740 = vmatprep.subr.bf16.mxu0 %v6977_v25  ;;  %v7000_v23 = vld [vmem:[%s8379_s25 + $0x310] ss:$8 sps:$4 sm:$0xff]   ;;  %v6337_v24 = vcombine.high %v1616_v20, %v1624_v21  ;;  %v7001_v25 = vld [vmem:[%s8379_s25 + $0x324] ss:$8 sps:$4 sm:$0xff]   ;;  %v6338_v28 = vcombine.low %v1616_v20, %v1624_v21  ;;  %v7003_v29 = vld [vmem:[%s8379_s25 + $0x320] ss:$8 sps:$4 sm:$0xff]  }
 0xa28   : > { %7253 = vpow2.f32 %v4656_v30  ;;  %v6339_v30 = vcombine.high %v1377_v14, %v1385_v26  ;;  %v7016_v54 = vld [vmem:[%s8379_s25 + $0x374] ss:$8 sps:$4 sm:$0xff]  }
 0xa29   : > { %v1489_v21 = vld [vmem:[%s8371_s14 + $0x3b8] sm:$0xff] }
 0xa2a   : > { %5474 = vmatpush1.bf16.msra.mxu1 %v6322_v31  ;;  %5742 = vmatpush1.bf16.msra.mxu0 %v6979_v32  ;;  %v7004_v31 = vld [vmem:[%s8379_s25 + $0x334] ss:$8 sps:$4 sm:$0xff]  }
 0xa2b   : > { %5476 = vmatprep.subr.bf16.mxu1 %v6323_v33  ;;  %5744 = vmatprep.subr.bf16.mxu0 %v6980_v34  ;;  %v1393_v32 = vld [vmem:[%s8371_s14 + $0xb8] sm:$0xff]  ;;  %v6340_v34 = vcombine.low %v1377_v14, %v1385_v26 }
 0xa2c   : > { %v1401_v33 = vld [vmem:[%s8371_s14 + $0xf8] sm:$0xff] }
 0xa2d   : > { %v6341_v36 = vcombine.high %v1393_v32, %v1401_v33  ;;  %v6342_v39 = vcombine.low %v1393_v32, %v1401_v33  ;;  %v7024_v26 = vld [vmem:[%s8379_s25 + $0x390] ss:$8 sps:$4 sm:$0xff]  }
 0xa2e   : > { %5478 = vmatpush1.bf16.msra.mxu1 %v6324_v2  ;;  %5746 = vmatpush1.bf16.msra.mxu0 %v6982_v37  ;;  %v7007_v2 = vld [vmem:[%s8379_s25 + $0x344] ss:$8 sps:$4 sm:$0xff]   ;;  %v1409_v37 = vld [vmem:[%s8371_s14 + $0x138] sm:$0xff] }
 0xa2f   : > { %5480 = vmatprep.subr.bf16.mxu1 %v6325_v38  ;;  %5748 = vmatprep.subr.bf16.mxu0 %v6983_v27  ;;  %v1417_v38 = vld [vmem:[%s8371_s14 + $0x178] sm:$0xff] }
 0xa30   : > { %v8864_v27 = vld [vmem:[#allocation2] sm:$0xff]  ;;  %v6344_v45 = vcombine.low %v1409_v37, %v1417_v38 }
 0xa31   : > { %v7252_v46 = vpop.eup %7251  ;;  %v1505_v32 = vld [vmem:[%s8371_s14 + $0x438] sm:$0xff] }
 0xa32   : > { %v7254_v47 = vpop.eup %7253  ;;  %v2961_v48 = vadd.f32 1.0, %v7252_v46  ;;  %5482 = vmatpush1.bf16.msra.mxu1 %v6326_v41  ;;  %5750 = vmatpush1.bf16.msra.mxu0 %v6985_v42  ;;  %v6343_v41 = vcombine.high %v1409_v37, %v1417_v38  ;;  %v7010_v42 = vld [vmem:[%s8379_s25 + $0x354] ss:$8 sps:$4 sm:$0xff]   ;;  %v7012_v46 = vld [vmem:[%s8379_s25 + $0x350] ss:$8 sps:$4 sm:$0xff]  }
 0xa33   : > { %v2962_v57 = vadd.f32 1.0, %v7254_v47  ;;  %5484 = vmatprep.subr.bf16.mxu1 %v6327_v43  ;;  %5752 = vmatprep.subr.bf16.mxu0 %v6986_v58  ;;  %v1425_v43 = vld [vmem:[%s8371_s14 + $0x1b8] sm:$0xff] }
 0xa34   : > { %7255 = vrcp.f32 %v2961_v48  ;;  %v1433_v58 = vld [vmem:[%s8371_s14 + $0x1f8] sm:$0xff]  ;;  %v7013_v48 = vld [vmem:[%s8379_s25 + $0x364] ss:$8 sps:$4 sm:$0xff]  }
 0xa35   : > { %7257 = vrcp.f32 %v2962_v57  ;;  %v6345_v47 = vcombine.high %v1425_v43, %v1433_v58  ;;  %v6346_v57 = vcombine.low %v1425_v43, %v1433_v58  ;;  %v1513_v33 = vld [vmem:[%s8371_s14 + $0x478] sm:$0xff]  ;;  %v7031_v58 = vld [vmem:[%s8379_s25 + $0x3c4] ss:$8 sps:$4 sm:$0xff]  }
 0xa36   : > { %5486 = vmatpush1.bf16.msra.mxu1 %v6328_v49  ;;  %5754 = vmatpush1.bf16.msra.mxu0 %v6988_v50  ;;  %v1441_v49 = vld [vmem:[%s8371_s14 + $0x238] sm:$0xff]  ;;  %v6355_v37 = vcombine.high %v1505_v32, %v1513_v33 }
 0xa37   : > { %5488 = vmatprep.subr.bf16.mxu1 %v6329_v51  ;;  %5756 = vmatprep.subr.bf16.mxu0 %v6989_v53  ;;  %v1449_v50 = vld [vmem:[%s8371_s14 + $0x278] sm:$0xff]  ;;  %v7015_v51 = vld [vmem:[%s8379_s25 + $0x360] ss:$8 sps:$4 sm:$0xff]  }
 0xa38   : > { %v6347_v53 = vcombine.high %v1441_v49, %v1449_v50  ;;  %v7028_v38 = vld [vmem:[%s8379_s25 + $0x3b4] ss:$8 sps:$4 sm:$0xff]  }
 0xa3a   : > { %5490 = vmatpush1.bf16.msra.mxu1 %v6330_v10  ;;  %5758 = vmatpush1.bf16.msra.mxu0 %v6991_v61  ;;  %v1465_v10 = vld [vmem:[%s8371_s14 + $0x2f8] sm:$0xff]  ;;  %v8880_v61 = vsub.s32 6, %v8646_v3  ;;  %v7304_v3 = vld [vmem:[%s8377_s27 + $0x1] ss:$2 sm:$0xff] }
 0xa3b   : > { %5492 = vmatprep.subr.bf16.mxu1 %v6331_v62  ;;  %5760 = vmatprep.subr.bf16.mxu0 %v6992_v16  ;;  %v6348_v62 = vcombine.low %v1441_v49, %v1449_v50  ;;  %v7018_v16 = vld [vmem:[%s8379_s25 + $0x370] ss:$8 sps:$4 sm:$0xff]   ;;  %v6349_v0 = vcombine.high %v1457_v59, %v1465_v10  ;;  %v2844_v20 = vrot.slane %v7304_v3, %v8884_v63  ;;  %v7034_v49 = vld [vmem:[%s8379_s25 + $0x3d4] ss:$8 sps:$4 sm:$0xff]  }
 0xa3c   : > { %v1553_v50 = vld [vmem:[%s8371_s14 + $0x5b8] sm:$0xff] }
 0xa3e   : > { %v7256_v13 = vpop.eup %7255  ;;  %5494 = vmatpush1.bf16.msra.mxu1 %v6332_v1  ;;  %5762 = vmatpush1.bf16.msra.mxu0 %v6994_v4  ;;  %v7019_v1 = vld [vmem:[%s8379_s25 + $0x384] ss:$8 sps:$4 sm:$0xff]   ;;  %v1473_v4 = vld [vmem:[%s8371_s14 + $0x338] sm:$0xff] }
 0xa3f   : > { %v7258_v18 = vpop.eup %7257  ;;  %5496 = vmatprep.subr.bf16.mxu1 %v6333_v5  ;;  %5764 = vmatprep.subr.bf16.mxu0 %v6995_v6  ;;  %v1481_v5 = vld [vmem:[%s8371_s14 + $0x378] sm:$0xff]  ;;  %v7303_v6 = vld [vmem:[%s8377_s27] ss:$2 sm:$0xff] }
 0xa40   : > { %3981 = vmatprep.mubr.f32.mxu0 %v7258_v18  ;;  %v2738_v7 = vrot.slane %v7303_v6, %v8880_v61  ;;  %v2742_v9 = vrot.slane %v7303_v6, %v8884_v63  ;;  %v6351_v18 = vcombine.high %v1473_v4, %v1481_v5  ;;  %v6352_v14 = vcombine.low %v1473_v4, %v1481_v5  ;;  %v1577_v4 = vld [vmem:[%s8371_s14 + $0x678] sm:$0xff]  ;;  %v7039_v6 = vld [vmem:[%s8379_s25 + $0x3e0] ss:$8 sps:$4 sm:$0xff]  }
 0xa41   : > { %3982 = vmatmul.mubr.f32.vlgmr.msra.gmra.mrb[0].mxu0 %v7256_v13  ;;  %v6350_v13 = vcombine.low %v1457_v59, %v1465_v10  ;;  %v7036_v10 = vld [vmem:[%s8379_s25 + $0x3d0] ss:$8 sps:$4 sm:$0xff]  }
 0xa42   : > { %5498 = vmatpush1.bf16.msra.mxu1 %v6334_v15  ;;  %5766 = vmatpush1.bf16.msra.mxu0 %v6997_v17  ;;  %v7021_v15 = vld [vmem:[%s8379_s25 + $0x380] ss:$8 sps:$4 sm:$0xff]   ;;  %v2840_v17 = vrot.slane %v7304_v3, %v8880_v61 }
 0xa43   : > { %5500 = vmatprep.subr.bf16.mxu1 %v6335_v11  ;;  %5768 = vmatprep.subr.bf16.mxu0 %v6998_v19  ;;  %v7022_v11 = vld [vmem:[%s8379_s25 + $0x394] ss:$8 sps:$4 sm:$0xff]  }
 0xa46   : > { %5502 = vmatpush1.bf16.msra.mxu1 %v6336_v22  ;;  %5770 = vmatpush1.bf16.msra.mxu0 %v7000_v23  ;;  %v1497_v22 = vld [vmem:[%s8371_s14 + $0x3f8] sm:$0xff] }
 0xa47   : > { %5504 = vmatprep.subr.bf16.mxu1 %v6337_v24  ;;  %5772 = vmatprep.subr.bf16.mxu0 %v7001_v25 }
 0xa4a   : > { %5506 = vmatpush1.bf16.msra.mxu1 %v6338_v28  ;;  %5774 = vmatpush1.bf16.msra.mxu0 %v7003_v29  ;;  %v6353_v29 = vcombine.high %v1489_v21, %v1497_v22 }
 0xa4b   : > { %5508 = vmatprep.subr.bf16.mxu1 %v6339_v30  ;;  %5776 = vmatprep.subr.bf16.mxu0 %v7004_v31  ;;  %v7025_v30 = vld [vmem:[%s8379_s25 + $0x3a4] ss:$8 sps:$4 sm:$0xff]  }
 0xa4d   : > { %2629 = vmatmul.mubr.f32.vlgmr.msra.gmra.mrb[12].mxu1 %v8864_v27 }
 0xa4e   : > { %5510 = vmatpush1.bf16.msra.mxu1 %v6340_v34  ;;  %5778 = vmatpush1.bf16.msra.mxu0 %v7006_v35 }
 0xa4f   : > { %5512 = vmatprep.subr.bf16.mxu1 %v6341_v36  ;;  %5780 = vmatprep.subr.bf16.mxu0 %v7007_v2  ;;  %v6354_v36 = vcombine.low %v1489_v21, %v1497_v22  ;;  %v7027_v2 = vld [vmem:[%s8379_s25 + $0x3a0] ss:$8 sps:$4 sm:$0xff]  }
 0xa50   : > { %2699 = vmatprep.mubr.f32.mxu1 %v7302_v44  ;;  %v1537_v44 = vld [vmem:[%s8371_s14 + $0x538] sm:$0xff] }
 0xa52   : > { %5514 = vmatpush1.bf16.msra.mxu1 %v6342_v39  ;;  %5782 = vmatpush1.bf16.msra.mxu0 %v7009_v40  ;;  %v1521_v39 = vld [vmem:[%s8371_s14 + $0x4b8] sm:$0xff] }
 0xa53   : > { %5516 = vmatprep.subr.bf16.mxu1 %v6343_v41  ;;  %5784 = vmatprep.subr.bf16.mxu0 %v7010_v42  ;;  %v1529_v40 = vld [vmem:[%s8371_s14 + $0x4f8] sm:$0xff]  ;;  %v6356_v41 = vcombine.low %v1505_v32, %v1513_v33  ;;  %v7049_v32 = vld [vmem:[%s8379_s25 + $0x424] ss:$8 sps:$4 sm:$0xff]  }
 0xa54   : > { %v7030_v42 = vld [vmem:[%s8379_s25 + $0x3b0] ss:$8 sps:$4 sm:$0xff]   ;;  %v6357_v43 = vcombine.high %v1521_v39, %v1529_v40 }
 0xa56   : > { %5518 = vmatpush1.bf16.msra.mxu1 %v6344_v45  ;;  %5786 = vmatpush1.bf16.msra.mxu0 %v7012_v46  ;;  %v1545_v45 = vld [vmem:[%s8371_s14 + $0x578] sm:$0xff]  ;;  %v6358_v46 = vcombine.low %v1521_v39, %v1529_v40  ;;  %v7061_v40 = vld [vmem:[%s8379_s25 + $0x464] ss:$8 sps:$4 sm:$0xff]  }
 0xa57   : > { %5520 = vmatprep.subr.bf16.mxu1 %v6345_v47  ;;  %5788 = vmatprep.subr.bf16.mxu0 %v7013_v48  ;;  %v7033_v47 = vld [vmem:[%s8379_s25 + $0x3c0] ss:$8 sps:$4 sm:$0xff]   ;;  %v6359_v48 = vcombine.high %v1537_v44, %v1545_v45  ;;  %v6360_v59 = vcombine.low %v1537_v44, %v1545_v45  ;;  %v7060_v39 = vld [vmem:[%s8379_s25 + $0x450] ss:$8 sps:$4 sm:$0xff]  }
 0xa58   : > { %v8950_v44 = vld [vmem:[%s8377_s27 + $0x11] ss:$2 sm:$0xff] }
 0xa5a   : > { %5522 = vmatpush1.bf16.msra.mxu1 %v6346_v57  ;;  %5790 = vmatpush1.bf16.msra.mxu0 %v7015_v51  ;;  %v1561_v57 = vld [vmem:[%s8371_s14 + $0x5f8] sm:$0xff] }
 0xa5b   : > { %5524 = vmatprep.subr.bf16.mxu1 %v6347_v53  ;;  %5792 = vmatprep.subr.bf16.mxu0 %v7016_v54  ;;  %v6362_v5 = vcombine.low %v1553_v50, %v1561_v57 }
 0xa5e   : > { %5526 = vmatpush1.bf16.msra.mxu1 %v6348_v62  ;;  %5794 = vmatpush1.bf16.msra.mxu0 %v7018_v16  ;;  %v6361_v16 = vcombine.high %v1553_v50, %v1561_v57  ;;  %v2852_v57 = vrot.slane %v8950_v44, %v8657_v12 }
 0xa5f   : > { %5528 = vmatprep.subr.bf16.mxu1 %v6349_v0  ;;  %5796 = vmatprep.subr.bf16.mxu0 %v7019_v1  ;;  %v7037_v0 = vld [vmem:[%s8379_s25 + $0x3e4] ss:$8 sps:$4 sm:$0xff]   ;;  %v1569_v1 = vld [vmem:[%s8371_s14 + $0x638] sm:$0xff] }
 0xa60   : > { %v2417_v19 = vpop.f32.mrb[6].mxu1  ;;  %v6364_v3 = vcombine.low %v1569_v1, %v1577_v4 }
 0xa61   : > { %v2797_v23 = vmul.f32 %v2738_v7, %v2417_v19  ;;  %v2419_v24 = vpop.f32.mrb[7].mxu1  ;;  %v6363_v7 = vcombine.high %v1569_v1, %v1577_v4  ;;  %v1601_v19 = vld [vmem:[%s8371_s14 + $0x738] sm:$0xff]  ;;  %v7075_v4 = vld [vmem:[%s8379_s25 + $0x4a0] ss:$8 sps:$4 sm:$0xff]  }
 0xa62   : > { %v2798_v25 = vmul.f32 %v2742_v9, %v2419_v24  ;;  %5530 = vmatpush1.bf16.msra.mxu1 %v6350_v13  ;;  %5798 = vmatpush1.bf16.msra.mxu0 %v7021_v15  ;;  %v7040_v9 = vld [vmem:[%s8379_s25 + $0x3f4] ss:$8 sps:$4 sm:$0xff]  }
 0xa63   : > { %v2899_v28 = vadd.f32 %v2840_v17, %v2797_v23  ;;  %5532 = vmatprep.subr.bf16.mxu1 %v6351_v18  ;;  %5800 = vmatprep.subr.bf16.mxu0 %v7022_v11  ;;  %v1585_v13 = vld [vmem:[%s8371_s14 + $0x6b8] sm:$0xff]  ;;  %v7043_v11 = vld [vmem:[%s8379_s25 + $0x404] ss:$8 sps:$4 sm:$0xff]   ;;  %v7045_v23 = vld [vmem:[%s8379_s25 + $0x400] ss:$8 sps:$4 sm:$0xff]  }
 0xa64   : > { %v2900_v31 = vadd.f32 %v2844_v20, %v2798_v25  ;;  %v1593_v15 = vld [vmem:[%s8371_s14 + $0x6f8] sm:$0xff] }
 0xa65   : > { %v4657_v34 = vmul.f32 -1.442695, %v2899_v28  ;;  %v7042_v17 = vld [vmem:[%s8379_s25 + $0x3f0] ss:$8 sps:$4 sm:$0xff]   ;;  %v6365_v18 = vcombine.high %v1585_v13, %v1593_v15  ;;  %v6366_v22 = vcombine.low %v1585_v13, %v1593_v15  ;;  %v7082_v13 = vld [vmem:[%s8379_s25 + $0x4d4] ss:$8 sps:$4 sm:$0xff]  }
 0xa66   : > { %v4658_v35 = vmul.f32 -1.442695, %v2900_v31  ;;  %5534 = vmatpush1.bf16.msra.mxu1 %v6352_v14  ;;  %5802 = vmatpush1.bf16.msra.mxu0 %v7024_v26  ;;  %v1609_v20 = vld [vmem:[%s8371_s14 + $0x778] sm:$0xff] }
 0xa67   : > { %7259 = vpow2.f32 %v4657_v34  ;;  %5536 = vmatprep.subr.bf16.mxu1 %v6353_v29  ;;  %5804 = vmatprep.subr.bf16.mxu0 %v7025_v30  ;;  %v6367_v25 = vcombine.high %v1601_v19, %v1609_v20  ;;  %v7046_v14 = vld [vmem:[%s8379_s25 + $0x414] ss:$8 sps:$4 sm:$0xff]   ;;  %v6368_v29 = vcombine.low %v1601_v19, %v1609_v20  ;;  %v7048_v30 = vld [vmem:[%s8379_s25 + $0x410] ss:$8 sps:$4 sm:$0xff]   ;;  %v7051_v34 = vld [vmem:[%s8379_s25 + $0x420] ss:$8 sps:$4 sm:$0xff]  }
 0xa68   : > { %7261 = vpow2.f32 %v4658_v35  ;;  %v1617_v26 = vld [vmem:[%s8371_s14 + $0x7b8] sm:$0xff]  ;;  %v7085_v19 = vld [vmem:[%s8379_s25 + $0x4e4] ss:$8 sps:$4 sm:$0xff]   ;;  %v7087_v20 = vld [vmem:[%s8379_s25 + $0x4e0] ss:$8 sps:$4 sm:$0xff]  }
 0xa69   : > { %v1625_v28 = vld [vmem:[%s8371_s14 + $0x7f8] sm:$0xff] }
 0xa6a   : > { %5538 = vmatpush1.bf16.msra.mxu1 %v6354_v36  ;;  %5806 = vmatpush1.bf16.msra.mxu0 %v7027_v2  ;;  %v6369_v31 = vcombine.high %v1617_v26, %v1625_v28  ;;  %v6370_v33 = vcombine.low %v1617_v26, %v1625_v28  ;;  %v7052_v35 = vld [vmem:[%s8379_s25 + $0x434] ss:$8 sps:$4 sm:$0xff]   ;;  %v7054_v36 = vld [vmem:[%s8379_s25 + $0x430] ss:$8 sps:$4 sm:$0xff]   ;;  %v7055_v2 = vld [vmem:[%s8379_s25 + $0x444] ss:$8 sps:$4 sm:$0xff]  }
 0xa6b   : > { %5540 = vmatprep.subr.bf16.mxu1 %v6355_v37  ;;  %5808 = vmatprep.subr.bf16.mxu0 %v7028_v38  ;;  %v7057_v37 = vld [vmem:[%s8379_s25 + $0x440] ss:$8 sps:$4 sm:$0xff]   ;;  %v7058_v38 = vld [vmem:[%s8379_s25 + $0x454] ss:$8 sps:$4 sm:$0xff]   ;;  %v7096_v28 = vld [vmem:[%s8379_s25 + $0x510] ss:$8 sps:$4 sm:$0xff]  }
 0xa6c   : > { %v7094_v26 = vld [vmem:[%s8379_s25 + $0x514] ss:$8 sps:$4 sm:$0xff]  }
 0xa6e   : > { %5542 = vmatpush1.bf16.msra.mxu1 %v6356_v41  ;;  %5810 = vmatpush1.bf16.msra.mxu0 %v7030_v42  ;;  %v7063_v41 = vld [vmem:[%s8379_s25 + $0x460] ss:$8 sps:$4 sm:$0xff]   ;;  %v7064_v42 = vld [vmem:[%s8379_s25 + $0x474] ss:$8 sps:$4 sm:$0xff]  }
 0xa6f   : > { %5544 = vmatprep.subr.bf16.mxu1 %v6357_v43  ;;  %5812 = vmatprep.subr.bf16.mxu0 %v7031_v58  ;;  %v7066_v43 = vld [vmem:[%s8379_s25 + $0x470] ss:$8 sps:$4 sm:$0xff]  }
 0xa70   : > { %v8946_v58 = vld [vmem:[%s8377_s27 + $0x10] ss:$2 sm:$0xff] }
 0xa71   : > { %v7260_v51 = vpop.eup %7259  ;;  %v2746_v45 = vrot.slane %v8946_v58, %v8651_v8 }
 0xa72   : > { %v7262_v53 = vpop.eup %7261  ;;  %v2963_v54 = vadd.f32 1.0, %v7260_v51  ;;  %5546 = vmatpush1.bf16.msra.mxu1 %v6358_v46  ;;  %5814 = vmatpush1.bf16.msra.mxu0 %v7033_v47  ;;  %v2750_v46 = vrot.slane %v8946_v58, %v8657_v12  ;;  %v7069_v47 = vld [vmem:[%s8379_s25 + $0x480] ss:$8 sps:$4 sm:$0xff]  }
 0xa73   : > { %v2964_v62 = vadd.f32 1.0, %v7262_v53  ;;  %5548 = vmatprep.subr.bf16.mxu1 %v6359_v48  ;;  %5816 = vmatprep.subr.bf16.mxu0 %v7034_v49  ;;  %v2848_v48 = vrot.slane %v8950_v44, %v8651_v8  ;;  %v7070_v49 = vld [vmem:[%s8379_s25 + $0x494] ss:$8 sps:$4 sm:$0xff]  }
 0xa74   : > { %7263 = vrcp.f32 %v2963_v54 }
 0xa75   : > { %7265 = vrcp.f32 %v2964_v62  ;;  %v7073_v62 = vld [vmem:[%s8379_s25 + $0x4a4] ss:$8 sps:$4 sm:$0xff]  }
 0xa76   : > { %5550 = vmatpush1.bf16.msra.mxu1 %v6360_v59  ;;  %5818 = vmatpush1.bf16.msra.mxu0 %v7036_v10  ;;  %v7072_v59 = vld [vmem:[%s8379_s25 + $0x490] ss:$8 sps:$4 sm:$0xff]  }
 0xa77   : > { %5552 = vmatprep.subr.bf16.mxu1 %v6361_v16  ;;  %5820 = vmatprep.subr.bf16.mxu0 %v7037_v0 }
 0xa7a   : > { %5554 = vmatpush1.bf16.msra.mxu1 %v6362_v5  ;;  %5822 = vmatpush1.bf16.msra.mxu0 %v7039_v6  ;;  %v7076_v5 = vld [vmem:[%s8379_s25 + $0x4b4] ss:$8 sps:$4 sm:$0xff]   ;;  %v7078_v6 = vld [vmem:[%s8379_s25 + $0x4b0] ss:$8 sps:$4 sm:$0xff]  }
 0xa7b   : > { %5556 = vmatprep.subr.bf16.mxu1 %v6363_v7  ;;  %5824 = vmatprep.subr.bf16.mxu0 %v7040_v9  ;;  %v7079_v7 = vld [vmem:[%s8379_s25 + $0x4c4] ss:$8 sps:$4 sm:$0xff]   ;;  %v7081_v9 = vld [vmem:[%s8379_s25 + $0x4c0] ss:$8 sps:$4 sm:$0xff]  }
 0xa7e   : > { %v7264_v21 = vpop.eup %7263  ;;  %5558 = vmatpush1.bf16.msra.mxu1 %v6364_v3  ;;  %5826 = vmatpush1.bf16.msra.mxu0 %v7042_v17 }
 0xa7f   : > { %v7266_v24 = vpop.eup %7265  ;;  %5560 = vmatprep.subr.bf16.mxu1 %v6365_v18  ;;  %5828 = vmatprep.subr.bf16.mxu0 %v7043_v11  ;;  %v7084_v18 = vld [vmem:[%s8379_s25 + $0x4d0] ss:$8 sps:$4 sm:$0xff]  }
 0xa80   : > { %4052 = vmatprep.mubr.f32.mxu0 %v7266_v24 }
 0xa81   : > { %4053 = vmatmul.mubr.f32.vlgmr.msra.gmra.mrb[0].mxu0 %v7264_v21  ;;  %v7088_v21 = vld [vmem:[%s8379_s25 + $0x4f4] ss:$8 sps:$4 sm:$0xff]  }
 0xa82   : > { %5562 = vmatpush1.bf16.msra.mxu1 %v6366_v22  ;;  %5830 = vmatpush1.bf16.msra.mxu0 %v7045_v23  ;;  %v7090_v22 = vld [vmem:[%s8379_s25 + $0x4f0] ss:$8 sps:$4 sm:$0xff]   ;;  %v7091_v23 = vld [vmem:[%s8379_s25 + $0x504] ss:$8 sps:$4 sm:$0xff]  }
 0xa83   : > { %5564 = vmatprep.subr.bf16.mxu1 %v6367_v25  ;;  %5832 = vmatprep.subr.bf16.mxu0 %v7046_v14  ;;  %v7093_v25 = vld [vmem:[%s8379_s25 + $0x500] ss:$8 sps:$4 sm:$0xff]  }
 0xa86   : > { %5566 = vmatpush1.bf16.msra.mxu1 %v6368_v29  ;;  %5834 = vmatpush1.bf16.msra.mxu0 %v7048_v30  ;;  %v7097_v29 = vld [vmem:[%s8379_s25 + $0x524] ss:$8 sps:$4 sm:$0xff]   ;;  %v7099_v30 = vld [vmem:[%s8379_s25 + $0x520] ss:$8 sps:$4 sm:$0xff]  }
 0xa87   : > { %5568 = vmatprep.subr.bf16.mxu1 %v6369_v31  ;;  %5836 = vmatprep.subr.bf16.mxu0 %v7049_v32  ;;  %v7100_v31 = vld [vmem:[%s8379_s25 + $0x534] ss:$8 sps:$4 sm:$0xff]   ;;  %v7102_v32 = vld [vmem:[%s8379_s25 + $0x530] ss:$8 sps:$4 sm:$0xff]  }
 0xa8a   : > { %5570 = vmatpush1.bf16.msra.mxu1 %v6370_v33  ;;  %5838 = vmatpush1.bf16.msra.mxu0 %v7051_v34  ;;  %v7103_v33 = vld [vmem:[%s8379_s25 + $0x544] ss:$8 sps:$4 sm:$0xff]   ;;  %v7105_v34 = vld [vmem:[%s8379_s25 + $0x540] ss:$8 sps:$4 sm:$0xff]  }
 0xa8b   : > { %5840 = vmatprep.subr.bf16.mxu0 %v7052_v35  ;;  %v7106_v35 = vld [vmem:[%s8379_s25 + $0x554] ss:$8 sps:$4 sm:$0xff]  }
 0xa8d   : > { %2700 = vmatmul.mubr.f32.vlgmr.msra.gmra.mrb[14].mxu1 %v8864_v27  ;;  %v7067_v27 = vld [vmem:[%s8379_s25 + $0x484] ss:$8 sps:$4 sm:$0xff]  }
 0xa8e   : > { %5842 = vmatpush1.bf16.msra.mxu0 %v7054_v36  ;;  %v7108_v36 = vld [vmem:[%s8379_s25 + $0x550] ss:$8 sps:$4 sm:$0xff]  }
 0xa8f   : > { %5844 = vmatprep.subr.bf16.mxu0 %v7055_v2  ;;  %v7109_v2 = vld [vmem:[%s8379_s25 + $0x564] ss:$8 sps:$4 sm:$0xff]  }
 0xa92   : > { %5846 = vmatpush1.bf16.msra.mxu0 %v7057_v37  ;;  %v7111_v37 = vld [vmem:[%s8379_s25 + $0x560] ss:$8 sps:$4 sm:$0xff]  }
 0xa93   : > { %5848 = vmatprep.subr.bf16.mxu0 %v7058_v38  ;;  %v7112_v38 = vld [vmem:[%s8379_s25 + $0x574] ss:$8 sps:$4 sm:$0xff]  }
 0xa96   : > { %5850 = vmatpush1.bf16.msra.mxu0 %v7060_v39  ;;  %v7114_v39 = vld [vmem:[%s8379_s25 + $0x570] ss:$8 sps:$4 sm:$0xff]  }
 0xa97   : > { %5852 = vmatprep.subr.bf16.mxu0 %v7061_v40  ;;  %v7115_v40 = vld [vmem:[%s8379_s25 + $0x584] ss:$8 sps:$4 sm:$0xff]  }
 0xa9a   : > { %5854 = vmatpush1.bf16.msra.mxu0 %v7063_v41  ;;  %v2754_v41 = vrot.slane %v8946_v58, %v8719_v52 }
 0xa9b   : > { %5856 = vmatprep.subr.bf16.mxu0 %v7064_v42  ;;  %v2758_v42 = vrot.slane %v8946_v58, %v8723_v55 }
 0xa9e   : > { %5858 = vmatpush1.bf16.msra.mxu0 %v7066_v43  ;;  %v7117_v43 = vld [vmem:[%s8379_s25 + $0x580] ss:$8 sps:$4 sm:$0xff]  }
 0xa9f   : > { %5860 = vmatprep.subr.bf16.mxu0 %v7067_v27  ;;  %v2856_v27 = vrot.slane %v8950_v44, %v8719_v52 }
 0xaa0   : > { %v2488_v50 = vpop.f32.mrb[8].mxu1 }
 0xaa1   : > { %v2799_v51 = vmul.f32 %v2746_v45, %v2488_v50  ;;  %v2490_v53 = vpop.f32.mrb[9].mxu1  ;;  %v7118_v45 = vld [vmem:[%s8379_s25 + $0x594] ss:$8 sps:$4 sm:$0xff]  }
 0xaa2   : > { %v2800_v54 = vmul.f32 %v2750_v46, %v2490_v53  ;;  %5862 = vmatpush1.bf16.msra.mxu0 %v7069_v47  ;;  %v2860_v47 = vrot.slane %v8950_v44, %v8723_v55  ;;  %v7121_v53 = vld [vmem:[%s8379_s25 + $0x5a4] ss:$8 sps:$4 sm:$0xff]   ;;  %v7124_v55 = vld [vmem:[%s8379_s25 + $0x5b4] ss:$8 sps:$4 sm:$0xff]  }
 0xaa3   : > { %v2901_v10 = vadd.f32 %v2848_v48, %v2799_v51  ;;  %5864 = vmatprep.subr.bf16.mxu0 %v7070_v49 }
 0xaa4   : > { %v2902_v16 = vadd.f32 %v2852_v57, %v2800_v54  ;;  %v7120_v57 = vld [vmem:[%s8379_s25 + $0x590] ss:$8 sps:$4 sm:$0xff]  }
 0xaa5   : > { %v4659_v0 = vmul.f32 -1.442695, %v2901_v10  ;;  %v7123_v10 = vld [vmem:[%s8379_s25 + $0x5a0] ss:$8 sps:$4 sm:$0xff]  }
 0xaa6   : > { %v4660_v1 = vmul.f32 -1.442695, %v2902_v16  ;;  %5866 = vmatpush1.bf16.msra.mxu0 %v7072_v59  ;;  %v7127_v16 = vld [vmem:[%s8379_s25 + $0x5c4] ss:$8 sps:$4 sm:$0xff]  }
 0xaa7   : > { %7267 = vpow2.f32 %v4659_v0  ;;  %5868 = vmatprep.subr.bf16.mxu0 %v7073_v62  ;;  %v7126_v62 = vld [vmem:[%s8379_s25 + $0x5b0] ss:$8 sps:$4 sm:$0xff]   ;;  %v7129_v0 = vld [vmem:[%s8379_s25 + $0x5c0] ss:$8 sps:$4 sm:$0xff]  }
 0xaa8   : > { %7269 = vpow2.f32 %v4660_v1  ;;  %v7130_v1 = vld [vmem:[%s8379_s25 + $0x5d4] ss:$8 sps:$4 sm:$0xff]  }
 0xaaa   : > { %5870 = vmatpush1.bf16.msra.mxu0 %v7075_v4 }
 0xaab   : > { %5872 = vmatprep.subr.bf16.mxu0 %v7076_v5 }
 0xaae   : > { %5874 = vmatpush1.bf16.msra.mxu0 %v7078_v6 }
 0xaaf   : > { %5876 = vmatprep.subr.bf16.mxu0 %v7079_v7  ;;  %v7132_v7 = vld [vmem:[%s8379_s25 + $0x5d0] ss:$8 sps:$4 sm:$0xff]  }
 0xab1   : > { %v7268_v15 = vpop.eup %7267 }
 0xab2   : > { %v7270_v3 = vpop.eup %7269  ;;  %v2965_v17 = vadd.f32 1.0, %v7268_v15  ;;  %5878 = vmatpush1.bf16.msra.mxu0 %v7081_v9  ;;  %v7135_v15 = vld [vmem:[%s8379_s25 + $0x5e0] ss:$8 sps:$4 sm:$0xff]  }
 0xab3   : > { %v2966_v11 = vadd.f32 1.0, %v7270_v3  ;;  %5880 = vmatprep.subr.bf16.mxu0 %v7082_v13  ;;  %v7133_v13 = vld [vmem:[%s8379_s25 + $0x5e4] ss:$8 sps:$4 sm:$0xff]   ;;  %v7136_v3 = vld [vmem:[%s8379_s25 + $0x5f4] ss:$8 sps:$4 sm:$0xff]  }
 0xab4   : > { %7271 = vrcp.f32 %v2965_v17  ;;  %v7138_v17 = vld [vmem:[%s8379_s25 + $0x5f0] ss:$8 sps:$4 sm:$0xff]  }
 0xab5   : > { %7273 = vrcp.f32 %v2966_v11 }
 0xab6   : > { %5882 = vmatpush1.bf16.msra.mxu0 %v7084_v18  ;;  %v7139_v18 = vld [vmem:[%s8379_s25 + $0x604] ss:$8 sps:$4 sm:$0xff]  }
 0xab7   : > { %5884 = vmatprep.subr.bf16.mxu0 %v7085_v19  ;;  %v7141_v19 = vld [vmem:[%s8379_s25 + $0x600] ss:$8 sps:$4 sm:$0xff]  }
 0xaba   : > { %5886 = vmatpush1.bf16.msra.mxu0 %v7087_v20 }
 0xabb   : > { %5888 = vmatprep.subr.bf16.mxu0 %v7088_v21  ;;  %v7142_v21 = vld [vmem:[%s8379_s25 + $0x614] ss:$8 sps:$4 sm:$0xff]  }
 0xabe   : > { %v7272_v24 = vpop.eup %7271  ;;  %5890 = vmatpush1.bf16.msra.mxu0 %v7090_v22  ;;  %v7144_v22 = vld [vmem:[%s8379_s25 + $0x610] ss:$8 sps:$4 sm:$0xff]  }
 0xabf   : > { %v7274_v14 = vpop.eup %7273  ;;  %5892 = vmatprep.subr.bf16.mxu0 %v7091_v23  ;;  %v7145_v23 = vld [vmem:[%s8379_s25 + $0x624] ss:$8 sps:$4 sm:$0xff]  }
 0xac0   : > { %4123 = vmatprep.mubr.f32.mxu0 %v7274_v14  ;;  %v7150_v14 = vld [vmem:[%s8379_s25 + $0x630] ss:$8 sps:$4 sm:$0xff]  }
 0xac1   : > { %4124 = vmatmul.mubr.f32.vlgmr.msra.gmra.mrb[0].mxu0 %v7272_v24  ;;  %v7147_v24 = vld [vmem:[%s8379_s25 + $0x620] ss:$8 sps:$4 sm:$0xff]  }
 0xac2   : > { %5894 = vmatpush1.bf16.msra.mxu0 %v7093_v25  ;;  %v7148_v25 = vld [vmem:[%s8379_s25 + $0x634] ss:$8 sps:$4 sm:$0xff]  }
 0xac3   : > { %5896 = vmatprep.subr.bf16.mxu0 %v7094_v26  ;;  %v7151_v26 = vld [vmem:[%s8379_s25 + $0x644] ss:$8 sps:$4 sm:$0xff]  }
 0xac6   : > { %5898 = vmatpush1.bf16.msra.mxu0 %v7096_v28  ;;  %v7153_v28 = vld [vmem:[%s8379_s25 + $0x640] ss:$8 sps:$4 sm:$0xff]  }
 0xac7   : > { %5900 = vmatprep.subr.bf16.mxu0 %v7097_v29  ;;  %v7154_v29 = vld [vmem:[%s8379_s25 + $0x654] ss:$8 sps:$4 sm:$0xff]  }
 0xaca   : > { %5902 = vmatpush1.bf16.msra.mxu0 %v7099_v30  ;;  %v7156_v30 = vld [vmem:[%s8379_s25 + $0x650] ss:$8 sps:$4 sm:$0xff]  }
 0xacb   : > { %5904 = vmatprep.subr.bf16.mxu0 %v7100_v31  ;;  %v7157_v31 = vld [vmem:[%s8379_s25 + $0x664] ss:$8 sps:$4 sm:$0xff]  }
 0xace   : > { %5906 = vmatpush1.bf16.msra.mxu0 %v7102_v32  ;;  %v7159_v32 = vld [vmem:[%s8379_s25 + $0x660] ss:$8 sps:$4 sm:$0xff]  }
 0xacf   : > { %5908 = vmatprep.subr.bf16.mxu0 %v7103_v33  ;;  %v7160_v33 = vld [vmem:[%s8379_s25 + $0x674] ss:$8 sps:$4 sm:$0xff]  }
 0xad2   : > { %5910 = vmatpush1.bf16.msra.mxu0 %v7105_v34  ;;  %v7162_v34 = vld [vmem:[%s8379_s25 + $0x670] ss:$8 sps:$4 sm:$0xff]  }
 0xad3   : > { %5912 = vmatprep.subr.bf16.mxu0 %v7106_v35  ;;  %v7163_v35 = vld [vmem:[%s8379_s25 + $0x684] ss:$8 sps:$4 sm:$0xff]  }
 0xad6   : > { %5914 = vmatpush1.bf16.msra.mxu0 %v7108_v36  ;;  %v2762_v36 = vrot.slane %v8946_v58, %v8799_v56 }
 0xad7   : > { %5916 = vmatprep.subr.bf16.mxu0 %v7109_v2  ;;  %v2766_v2 = vrot.slane %v8946_v58, %v8803_v60 }
 0xada   : > { %5918 = vmatpush1.bf16.msra.mxu0 %v7111_v37  ;;  %v7165_v37 = vld [vmem:[%s8379_s25 + $0x680] ss:$8 sps:$4 sm:$0xff]  }
 0xadb   : > { %5920 = vmatprep.subr.bf16.mxu0 %v7112_v38  ;;  %v2864_v38 = vrot.slane %v8950_v44, %v8799_v56 }
 0xade   : > { %5922 = vmatpush1.bf16.msra.mxu0 %v7114_v39  ;;  %v7166_v39 = vld [vmem:[%s8379_s25 + $0x694] ss:$8 sps:$4 sm:$0xff]  }
 0xadf   : > { %5924 = vmatprep.subr.bf16.mxu0 %v7115_v40 }
 0xae0   : > { %v2559_v46 = vpop.f32.mrb[10].mxu1 }
 0xae1   : > { %v2801_v48 = vmul.f32 %v2754_v41, %v2559_v46  ;;  %v2561_v49 = vpop.f32.mrb[11].mxu1  ;;  %v2868_v41 = vrot.slane %v8950_v44, %v8803_v60  ;;  %v7172_v60 = vld [vmem:[%s8379_s25 + $0x6b4] ss:$8 sps:$4 sm:$0xff]  }
 0xae2   : > { %v2802_v50 = vmul.f32 %v2758_v42, %v2561_v49  ;;  %5926 = vmatpush1.bf16.msra.mxu0 %v7117_v43 }
 0xae3   : > { %v2903_v51 = vadd.f32 %v2856_v27, %v2801_v48  ;;  %5928 = vmatprep.subr.bf16.mxu0 %v7118_v45  ;;  %v7168_v45 = vld [vmem:[%s8379_s25 + $0x690] ss:$8 sps:$4 sm:$0xff]  }
 0xae4   : > { %v2904_v52 = vadd.f32 %v2860_v47, %v2802_v50  ;;  %v7169_v47 = vld [vmem:[%s8379_s25 + $0x6a4] ss:$8 sps:$4 sm:$0xff]   ;;  %v7171_v50 = vld [vmem:[%s8379_s25 + $0x6a0] ss:$8 sps:$4 sm:$0xff]  }
 0xae5   : > { %v4661_v54 = vmul.f32 -1.442695, %v2903_v51  ;;  %v7175_v51 = vld [vmem:[%s8379_s25 + $0x6c4] ss:$8 sps:$4 sm:$0xff]  }
 0xae6   : > { %v4662_v59 = vmul.f32 -1.442695, %v2904_v52  ;;  %5930 = vmatpush1.bf16.msra.mxu0 %v7120_v57  ;;  %v7174_v57 = vld [vmem:[%s8379_s25 + $0x6b0] ss:$8 sps:$4 sm:$0xff]   ;;  %v7178_v52 = vld [vmem:[%s8379_s25 + $0x6d4] ss:$8 sps:$4 sm:$0xff]  }
 0xae7   : > { %7275 = vpow2.f32 %v4661_v54  ;;  %5932 = vmatprep.subr.bf16.mxu0 %v7121_v53  ;;  %v7177_v53 = vld [vmem:[%s8379_s25 + $0x6c0] ss:$8 sps:$4 sm:$0xff]  }
 0xae8   : > { %7277 = vpow2.f32 %v4662_v59 }
 0xaea   : > { %5934 = vmatpush1.bf16.msra.mxu0 %v7123_v10 }
 0xaeb   : > { %5936 = vmatprep.subr.bf16.mxu0 %v7124_v55  ;;  %v7180_v55 = vld [vmem:[%s8379_s25 + $0x6d0] ss:$8 sps:$4 sm:$0xff]  }
 0xaee   : > { %5938 = vmatpush1.bf16.msra.mxu0 %v7126_v62 }
 0xaef   : > { %5940 = vmatprep.subr.bf16.mxu0 %v7127_v16  ;;  %v7181_v16 = vld [vmem:[%s8379_s25 + $0x6e4] ss:$8 sps:$4 sm:$0xff]  }
 0xaf1   : > { %v7276_v4 = vpop.eup %7275 }
 0xaf2   : > { %v7278_v5 = vpop.eup %7277  ;;  %v2967_v6 = vadd.f32 1.0, %v7276_v4  ;;  %5942 = vmatpush1.bf16.msra.mxu0 %v7129_v0  ;;  %v7183_v0 = vld [vmem:[%s8379_s25 + $0x6e0] ss:$8 sps:$4 sm:$0xff]   ;;  %v7186_v4 = vld [vmem:[%s8379_s25 + $0x6f0] ss:$8 sps:$4 sm:$0xff]  }
 0xaf3   : > { %v2968_v9 = vadd.f32 1.0, %v7278_v5  ;;  %5944 = vmatprep.subr.bf16.mxu0 %v7130_v1  ;;  %v7184_v1 = vld [vmem:[%s8379_s25 + $0x6f4] ss:$8 sps:$4 sm:$0xff]   ;;  %v7187_v5 = vld [vmem:[%s8379_s25 + $0x704] ss:$8 sps:$4 sm:$0xff]  }
 0xaf4   : > { %7279 = vrcp.f32 %v2967_v6 }
 0xaf5   : > { %7281 = vrcp.f32 %v2968_v9 }
 0xaf6   : > { %5946 = vmatpush1.bf16.msra.mxu0 %v7132_v7  ;;  %v7189_v7 = vld [vmem:[%s8379_s25 + $0x700] ss:$8 sps:$4 sm:$0xff]  }
 0xaf7   : > { %5948 = vmatprep.subr.bf16.mxu0 %v7133_v13  ;;  %v7190_v13 = vld [vmem:[%s8379_s25 + $0x714] ss:$8 sps:$4 sm:$0xff]  }
 0xafa   : > { %5950 = vmatpush1.bf16.msra.mxu0 %v7135_v15  ;;  %v7192_v15 = vld [vmem:[%s8379_s25 + $0x710] ss:$8 sps:$4 sm:$0xff]  }
 0xafb   : > { %5952 = vmatprep.subr.bf16.mxu0 %v7136_v3  ;;  %v7193_v3 = vld [vmem:[%s8379_s25 + $0x724] ss:$8 sps:$4 sm:$0xff]  }
 0xafe   : > { %v7280_v11 = vpop.eup %7279  ;;  %5954 = vmatpush1.bf16.msra.mxu0 %v7138_v17  ;;  %v7195_v17 = vld [vmem:[%s8379_s25 + $0x720] ss:$8 sps:$4 sm:$0xff]  }
 0xaff   : > { %v7282_v20 = vpop.eup %7281  ;;  %5956 = vmatprep.subr.bf16.mxu0 %v7139_v18  ;;  %v7196_v18 = vld [vmem:[%s8379_s25 + $0x734] ss:$8 sps:$4 sm:$0xff]  }
 0xb00   : > { %4194 = vmatprep.mubr.f32.mxu0 %v7282_v20  ;;  %v7201_v20 = vld [vmem:[%s8379_s25 + $0x740] ss:$8 sps:$4 sm:$0xff]  }
 0xb01   : > { %4195 = vmatmul.mubr.f32.vlgmr.msra.gmra.mrb[0].mxu0 %v7280_v11  ;;  %v7198_v11 = vld [vmem:[%s8379_s25 + $0x730] ss:$8 sps:$4 sm:$0xff]  }
 0xb02   : > { %5958 = vmatpush1.bf16.msra.mxu0 %v7141_v19  ;;  %v7199_v19 = vld [vmem:[%s8379_s25 + $0x744] ss:$8 sps:$4 sm:$0xff]  }
 0xb03   : > { %5960 = vmatprep.subr.bf16.mxu0 %v7142_v21  ;;  %v7202_v21 = vld [vmem:[%s8379_s25 + $0x754] ss:$8 sps:$4 sm:$0xff]  }
 0xb06   : > { %5962 = vmatpush1.bf16.msra.mxu0 %v7144_v22  ;;  %v7204_v22 = vld [vmem:[%s8379_s25 + $0x750] ss:$8 sps:$4 sm:$0xff]  }
 0xb07   : > { %5964 = vmatprep.subr.bf16.mxu0 %v7145_v23  ;;  %v7205_v23 = vld [vmem:[%s8379_s25 + $0x764] ss:$8 sps:$4 sm:$0xff]  }
 0xb0a   : > { %5966 = vmatpush1.bf16.msra.mxu0 %v7147_v24  ;;  %v7207_v24 = vld [vmem:[%s8379_s25 + $0x760] ss:$8 sps:$4 sm:$0xff]  }
 0xb0b   : > { %5968 = vmatprep.subr.bf16.mxu0 %v7148_v25  ;;  %v7208_v25 = vld [vmem:[%s8379_s25 + $0x774] ss:$8 sps:$4 sm:$0xff]  }
 0xb0e   : > { %5970 = vmatpush1.bf16.msra.mxu0 %v7150_v14  ;;  %v7210_v14 = vld [vmem:[%s8379_s25 + $0x770] ss:$8 sps:$4 sm:$0xff]  }
 0xb0f   : > { %5972 = vmatprep.subr.bf16.mxu0 %v7151_v26  ;;  %v7211_v26 = vld [vmem:[%s8379_s25 + $0x784] ss:$8 sps:$4 sm:$0xff]  }
 0xb12   : > { %5974 = vmatpush1.bf16.msra.mxu0 %v7153_v28  ;;  %v2770_v28 = vrot.slane %v8946_v58, %v8880_v61 }
 0xb13   : > { %5976 = vmatprep.subr.bf16.mxu0 %v7154_v29  ;;  %v2774_v29 = vrot.slane %v8946_v58, %v8884_v63 }
 0xb16   : > { %5978 = vmatpush1.bf16.msra.mxu0 %v7156_v30  ;;  %v7213_v30 = vld [vmem:[%s8379_s25 + $0x780] ss:$8 sps:$4 sm:$0xff]  }
 0xb17   : > { %5980 = vmatprep.subr.bf16.mxu0 %v7157_v31  ;;  %v2872_v31 = vrot.slane %v8950_v44, %v8880_v61 }
 0xb1a   : > { %5982 = vmatpush1.bf16.msra.mxu0 %v7159_v32  ;;  %v7214_v32 = vld [vmem:[%s8379_s25 + $0x794] ss:$8 sps:$4 sm:$0xff]  }
 0xb1b   : > { %5984 = vmatprep.subr.bf16.mxu0 %v7160_v33 }
 0xb1e   : > { %5986 = vmatpush1.bf16.msra.mxu0 %v7162_v34  ;;  %v2876_v34 = vrot.slane %v8950_v44, %v8884_v63  ;;  %v7220_v63 = vld [vmem:[%s8379_s25 + $0x7b4] ss:$8 sps:$4 sm:$0xff]   ;;  %v7222_v44 = vld [vmem:[%s8379_s25 + $0x7b0] ss:$8 sps:$4 sm:$0xff]  }
 0xb1f   : > { %5988 = vmatprep.subr.bf16.mxu0 %v7163_v35 }
 0xb20   : > { %v2630_v40 = vpop.f32.mrb[12].mxu1 }
 0xb21   : > { %v2803_v42 = vmul.f32 %v2762_v36, %v2630_v40  ;;  %v2632_v43 = vpop.f32.mrb[13].mxu1 }
 0xb22   : > { %v2804_v27 = vmul.f32 %v2766_v2, %v2632_v43  ;;  %5990 = vmatpush1.bf16.msra.mxu0 %v7165_v37  ;;  %v7216_v37 = vld [vmem:[%s8379_s25 + $0x790] ss:$8 sps:$4 sm:$0xff]   ;;  %v7225_v43 = vld [vmem:[%s8379_s25 + $0x7c0] ss:$8 sps:$4 sm:$0xff]  }
 0xb23   : > { %v2905_v46 = vadd.f32 %v2864_v38, %v2803_v42  ;;  %5992 = vmatprep.subr.bf16.mxu0 %v7166_v39  ;;  %v7217_v38 = vld [vmem:[%s8379_s25 + $0x7a4] ss:$8 sps:$4 sm:$0xff]  }
 0xb24   : > { %v2906_v56 = vadd.f32 %v2868_v41, %v2804_v27  ;;  %v7219_v41 = vld [vmem:[%s8379_s25 + $0x7a0] ss:$8 sps:$4 sm:$0xff]   ;;  %v7223_v42 = vld [vmem:[%s8379_s25 + $0x7c4] ss:$8 sps:$4 sm:$0xff]   ;;  %v7226_v27 = vld [vmem:[%s8379_s25 + $0x7d4] ss:$8 sps:$4 sm:$0xff]  }
 0xb25   : > { %v4663_v48 = vmul.f32 -1.442695, %v2905_v46 }
 0xb26   : > { %v4664_v49 = vmul.f32 -1.442695, %v2906_v56  ;;  %5994 = vmatpush1.bf16.msra.mxu0 %v7168_v45  ;;  %v7228_v56 = vld [vmem:[%s8379_s25 + $0x7d0] ss:$8 sps:$4 sm:$0xff]  }
 0xb27   : > { %7283 = vpow2.f32 %v4663_v48  ;;  %5996 = vmatprep.subr.bf16.mxu0 %v7169_v47 }
 0xb28   : > { %7285 = vpow2.f32 %v4664_v49  ;;  %v7229_v49 = vld [vmem:[%s8379_s25 + $0x7e4] ss:$8 sps:$4 sm:$0xff]  }
 0xb2a   : > { %5998 = vmatpush1.bf16.msra.mxu0 %v7171_v50  ;;  %v7231_v50 = vld [vmem:[%s8379_s25 + $0x7e0] ss:$8 sps:$4 sm:$0xff]  }
 0xb2b   : > { %6000 = vmatprep.subr.bf16.mxu0 %v7172_v60  ;;  %v7232_v60 = vld [vmem:[%s8379_s25 + $0x7f4] ss:$8 sps:$4 sm:$0xff]  }
 0xb2e   : > { %6002 = vmatpush1.bf16.msra.mxu0 %v7174_v57  ;;  %v7234_v57 = vld [vmem:[%s8379_s25 + $0x7f0] ss:$8 sps:$4 sm:$0xff]  }
 0xb2f   : > { %6004 = vmatprep.subr.bf16.mxu0 %v7175_v51 }
 0xb31   : > { %v7284_v54 = vpop.eup %7283 }
 0xb32   : > { %v7286_v59 = vpop.eup %7285  ;;  %v2969_v10 = vadd.f32 1.0, %v7284_v54  ;;  %6006 = vmatpush1.bf16.msra.mxu0 %v7177_v53  ;;  %v3006_v54 = vld [vmem:[#allocation3 + $0x8] sm:$0xff] }
 0xb33   : > { %v2970_v62 = vadd.f32 1.0, %v7286_v59  ;;  %6008 = vmatprep.subr.bf16.mxu0 %v7178_v52  ;;  %v3005_v52 = vld [vmem:[#allocation3] sm:$0xff] }
 0xb34   : > { %7287 = vrcp.f32 %v2969_v10 }
 0xb35   : > { %7289 = vrcp.f32 %v2970_v62 }
 0xb36   : > { %6010 = vmatpush1.bf16.msra.mxu0 %v7180_v55 }
 0xb37   : > { %6012 = vmatprep.subr.bf16.mxu0 %v7181_v16 }
 0xb3a   : > { %6014 = vmatpush1.bf16.msra.mxu0 %v7183_v0  ;;  %v4353_v0 = vld [vmem:[#allocation25] ss:$2 sm:$0x3] (!%p4667_p4) }
 0xb3b   : > { %6016 = vmatprep.subr.bf16.mxu0 %v7184_v1 }
 0xb3e   : > { %v7288_v6 = vpop.eup %7287  ;;  %6018 = vmatpush1.bf16.msra.mxu0 %v7186_v4  ;;  %v4358_v4 = vrot.slane (!%p4667_p4), %v4353_v0, %v8651_v8 }
 0xb3f   : > { %v7290_v9 = vpop.eup %7289  ;;  %6020 = vmatprep.subr.bf16.mxu0 %v7187_v5  ;;  %v4368_v5 = vld [vmem:[#allocation25 + $0x1] ss:$2 sm:$0x3] (!%p4667_p4) }
 0xb40   : > { %4265 = vmatprep.mubr.f32.mxu0 %v7290_v9  ;;  %v4377_v9 = vrot.slane (!%p4667_p4), %v4368_v5, %v8657_v12 }
 0xb41   : > { %4266 = vmatmul.mubr.f32.vlgmr.msra.gmra.mrb[0].mxu0 %v7288_v6  ;;  %v4362_v6 = vrot.slane (!%p4667_p4), %v4353_v0, %v8657_v12 }
 0xb42   : > { %6022 = vmatpush1.bf16.msra.mxu0 %v7189_v7  ;;  %v4373_v7 = vrot.slane (!%p4667_p4), %v4368_v5, %v8651_v8 }
 0xb43   : > { %6024 = vmatprep.subr.bf16.mxu0 %v7190_v13 }
 0xb46   : > { %6026 = vmatpush1.bf16.msra.mxu0 %v7192_v15 }
 0xb47   : > { %6028 = vmatprep.subr.bf16.mxu0 %v7193_v3 }
 0xb4a   : > { %6030 = vmatpush1.bf16.msra.mxu0 %v7195_v17 }
 0xb4b   : > { %6032 = vmatprep.subr.bf16.mxu0 %v7196_v18 }
 0xb4e   : > { %6034 = vmatpush1.bf16.msra.mxu0 %v7198_v11 }
 0xb4f   : > { %6036 = vmatprep.subr.bf16.mxu0 %v7199_v19 }
 0xb52   : > { %6038 = vmatpush1.bf16.msra.mxu0 %v7201_v20 }
 0xb53   : > { %6040 = vmatprep.subr.bf16.mxu0 %v7202_v21 }
 0xb56   : > { %6042 = vmatpush1.bf16.msra.mxu0 %v7204_v22 }
 0xb57   : > { %6044 = vmatprep.subr.bf16.mxu0 %v7205_v23 }
 0xb5a   : > { %6046 = vmatpush1.bf16.msra.mxu0 %v7207_v24 }
 0xb5b   : > { %6048 = vmatprep.subr.bf16.mxu0 %v7208_v25 }
 0xb5e   : > { %6050 = vmatpush1.bf16.msra.mxu0 %v7210_v14 }
 0xb5f   : > { %6052 = vmatprep.subr.bf16.mxu0 %v7211_v26 }
 0xb60   : > { %v2701_v33 = vpop.f32.mrb[14].mxu1 }
 0xb61   : > { %v2805_v35 = vmul.f32 %v2770_v28, %v2701_v33  ;;  %v2703_v36 = vpop.f32.mrb[15].mxu1 }
 0xb62   : > { %v2806_v2 = vmul.f32 %v2774_v29, %v2703_v36  ;;  %6054 = vmatpush1.bf16.msra.mxu0 %v7213_v30 }
 0xb63   : > { %v2907_v58 = vadd.f32 %v2872_v31, %v2805_v35  ;;  %6056 = vmatprep.subr.bf16.mxu0 %v7214_v32 }
 0xb64   : > { %v2908_v61 = vadd.f32 %v2876_v34, %v2806_v2 }
 0xb65   : > { %v4665_v39 = vmul.f32 -1.442695, %v2907_v58 }
 0xb66   : > { %v4666_v40 = vmul.f32 -1.442695, %v2908_v61  ;;  %6058 = vmatpush1.bf16.msra.mxu0 %v7216_v37 }
 0xb67   : > { %7291 = vpow2.f32 %v4665_v39  ;;  %6060 = vmatprep.subr.bf16.mxu0 %v7217_v38 }
 0xb68   : > { %7293 = vpow2.f32 %v4666_v40 }
 0xb6a   : > { %6062 = vmatpush1.bf16.msra.mxu0 %v7219_v41 }
 0xb6b   : > { %6064 = vmatprep.subr.bf16.mxu0 %v7220_v63 }
 0xb6e   : > { %6066 = vmatpush1.bf16.msra.mxu0 %v7222_v44 }
 0xb6f   : > { %6068 = vmatprep.subr.bf16.mxu0 %v7223_v42 }
 0xb71   : > { %v7292_v45 = vpop.eup %7291 }
 0xb72   : > { %v7294_v46 = vpop.eup %7293  ;;  %v2971_v47 = vadd.f32 1.0, %v7292_v45  ;;  %6070 = vmatpush1.bf16.msra.mxu0 %v7225_v43 }
 0xb73   : > { %v2972_v48 = vadd.f32 1.0, %v7294_v46  ;;  %6072 = vmatprep.subr.bf16.mxu0 %v7226_v27 }
 0xb75   : > { %7295 = vrcp.f32 %v2972_v48 }
 0xb76   : > { %7297 = vrcp.f32 %v2971_v47  ;;  %6074 = vmatpush1.bf16.msra.mxu0 %v7228_v56 }
 0xb77   : > { %6076 = vmatprep.subr.bf16.mxu0 %v7229_v49 }
 0xb7a   : > { %6078 = vmatpush1.bf16.msra.mxu0 %v7231_v50 }
 0xb7b   : > { %6080 = vmatprep.subr.bf16.mxu0 %v7232_v60 }
 0xb7e   : > { %6082 = vmatpush1.bf16.msra.mxu0 %v7234_v57 }
 0xb7f   : > { %v7296_v51 = vpop.eup %7295 }
 0xb80   : > { %v7298_v53 = vpop.eup %7297  ;;  %4336 = vmatprep.mubr.f32.mxu0 %v7296_v51 }
 0xb81   : > { %4337 = vmatmul.mubr.f32.vlgmr.msra.gmra.mrb[0].mxu0 %v7298_v53 }
 0xc52   : > { %4350 = sbr.rel (%p4667_p4) target bundleno = 3199 (0xc7f), region = 144 }
 0xc54   : > { %v4338_v59 = vpop.f32.mrb[0].mxu0 }
 0xc55   : > { %v4343_v10 = vadd.f32 %v4338_v59, %v3005_v52  ;;  %v4340_v55 = vpop.f32.mrb[1].mxu0 }
 0xc56   : > { %v4344_v62 = vadd.f32 %v4340_v55, %v3006_v54 }
 0xc57   : > { %4345 = vst [vmem:[#allocation3] sm:$0xff] %v4343_v10 }
 0xc58   : > { %4346 = vst [vmem:[#allocation3 + $0x8] sm:$0xff] %v4344_v62 }
 0xc5e   : > { %v4351_v16 = vld [vmem:[#allocation3] sm:$0xff] }
 0xc5f   : > { %v4352_v1 = vld [vmem:[#allocation3 + $0x8] sm:$0xff]  ;;  %v4365_v13 = vmul.f32 %v4358_v4, %v4351_v16 }
 0xc60   : > { %v4366_v15 = vmul.f32 %v4362_v6, %v4352_v1 }
 0xc61   : > { %v4380_v3 = vadd.f32 %v4373_v7, %v4365_v13 }
 0xc62   : > { %v4381_v17 = vadd.f32 %v4377_v9, %v4366_v15 }
 0xc63   : > { %v4668_v18 = vmul.f32 -1.442695, %v4380_v3 }
 0xc64   : > { %v4669_v11 = vmul.f32 -1.442695, %v4381_v17 }
 0xc65   : > { %7305 = vpow2.f32 %v4668_v18 }
 0xc66   : > { %7307 = vpow2.f32 %v4669_v11 }
 0xc6f   : > { %v7306_v19 = vpop.eup %7305 }
 0xc70   : > { %v7308_v20 = vpop.eup %7307  ;;  %v4388_v21 = vadd.f32 1.0, %v7306_v19 }
 0xc71   : > { %v4389_v22 = vadd.f32 1.0, %v7308_v20 }
 0xc72   : > { %7309 = vrcp.f32 %v4388_v21 }
 0xc73   : > { %7311 = vrcp.f32 %v4389_v22 }
 0xc7c   : > { %v7310_v23 = vpop.eup %7309 }
 0xc7d   : > { %v7312_v24 = vpop.eup %7311  ;;  %4394 = vst [vmem:[#allocation27] sm:$0xff] %v7310_v23 }
 0xc7e   : > { %4395 = vst [vmem:[#allocation27 + $0x8] sm:$0xff] %v7312_v24 }
 0xc7f PF: > { %p6748_p13 = scmp.eq.s32.totalorder %s7935_s24, 1  ;;  %s7833_s14 = smov [#allocation27]  }
 0xc80   : > { %s4403_s27 = sshll.u32 %s7833_s14, 4  ;;  %s4404_s27 = int_to_ptr.vmem [resolvable:$true] %s4403_s27 }
 0xc81   : > { %s7711_s25 = scalar_lea.vmem %s4404_s27, 256  ;;  %p7718_p0 = scmp.lt.s32.totalorder %s4404_s27, %s4404_s27 }
 0xc82   : > { %p7712_p7 = scmp.ne.s32.totalorder %s4404_s27, %s7711_s25  ;;  %p7719_p3 = scmp.lt.s32.totalorder %s7711_s25, %s7711_s25 }
 0xc84   : > { %p7713_p11 = pnand %p7712_p7, %p6748_p13  ;;  %p7720_p6 = por %p7719_p3, %p7718_p0 }
 0xc86   : > { %p7714_p8 = pneg %p7713_p11 }
 0xc88   : > { %p7721_p2 = pnand %p7720_p6, %p7714_p8 }
 0xc8a   : > { %7724 = shalt.err (!%p7721_p2)
}
 0xc8b   : > { %s9234_s1 = sld [smem:[#allocation51_spill]] }
 0xc91   : > { %s7725_s28 = scalar_lea.hbm %s9234_s1, 256 }
 0xc92   : > { %p7726_p9 = scmp.ne.s32.totalorder %s9234_s1, %s7725_s28  ;;  %p7731_p5 = scmp.lt.u32.totalorder %s7725_s28, %s9234_s1 }
 0xc94   : > { %p7727_p10 = pnand %p7726_p9, %p6748_p13 }
 0xc96   : > { %p7728_p1 = pneg %p7727_p10 }
 0xc98   : > { %p7733_p12 = pnand %p7731_p5, %p7728_p1 }
 0xc9a   : > { %7736 = shalt.err (!%p7733_p12)
}
 0xc9b   : > { %6678 = dma.vmem_to_hbm [thread:$0]  (%p6748_p13), %s4404_s27, 256, %s9234_s1, [#allocation6]  }
 0xc9c   : > { %7790 = dma.done.wait (%p6748_p13), [#allocation6], 256  }
 0xc9d   : > { %7792 = vsyncadd (%p6748_p13), [#allocation6], 4294967040 }
 0xc9e PF: > { %s9235_s10 = sld [smem:[#allocation39_spill]]  ;;  %p35_p4 = scmp.ge.s32.totalorder %s8081_s9, 4  }
 0xc9f   : > { %s9236_s18 = smov %s7799_s19  ;;  %s9237_s19 = smov %s7803_s20 }
 0xca0   : > { %s9239_s21 = smov %s8081_s9  ;;  %37 = sbr.rel (!%p35_p4) target bundleno = 25 (0x19), region = 199 }
 0xca4   : > { %s9238_s20 = smov %s9235_s10 }
 0xca7   :  { %4416 = vsyncpa [#allocation5], 1 }
 0xca8   :  { %4418 = vsyncpa [#allocation5 + $0x1], 1 }
 0xca9   :  { %4419 = vsyncpa [#allocation8], 1 }
 0xcaa   :  { %4420 = vsyncpa [#allocation11], 1 }
 0xcab   :  { %4421 = vsyncpa [#allocation14], 1 }
 0xcac   :  { %4422 = vsyncpa [#allocation17], 1 }
 0xcad   :  { %4423 = vsyncpa [#allocation20], 1 }
 0xcae   :  { %4425 = vsyncpa [#allocation20 + $0x1], 1 }
 0xcaf   :  { %4426 = vsyncpa [#allocation23], 1 }
 0xcb0   :  { %4428 = vsyncpa [#allocation23 + $0x1], 1 }
 0xcb1   :  { %4429 = vsyncpa [#allocation26], 1 }
 0xcb2   :  { %4430 = vsyncpa [#allocation6], 1 }
 0xcb3   :  { %4432 = vsyncpa [#allocation6 + $0x1], 1 }

</bundles_post_ra>
